<compile_context>
chip_gen: v6e
topology: v6e:2x2x1
jax: 0.10.0
libtpu: 0.0.40
codegen_flags: <defaults>
</compile_context>

<pallas_src>
import functools

import jax
import jax.numpy as jnp
from jax.experimental import pallas as pl
from jax.experimental.pallas import tpu as pltpu


# ----------------------------------------------------------------------------
# helpers
# ----------------------------------------------------------------------------
def _round_up(x, m):
    return ((x + m - 1) // m) * m


def _nbytes(shape, dtype):
    n = 1
    for s in shape:
        n *= int(s)
    return n * jnp.dtype(dtype).itemsize


def _vmem_limit(*block_bytes):
    """Scoped-VMEM request derived from the actual block footprint (double
    buffering + in-kernel f32 temporaries + slack), clamped so we always leave
    headroom on v7x (64 MiB per TensorCore)."""
    need = int(sum(block_bytes))
    return int(min(max(4 * need + (2 << 20), 8 << 20), 40 << 20))


# ----------------------------------------------------------------------------
# Pallas kernel 1: single-K-block matmul + bias (+ optional ReLU).
#   Used by the stride-2 im2col convs.  K fits a single block (K <= 640 here),
#   so there is no K grid axis, no accumulator scratch and no init/finalize.
# ----------------------------------------------------------------------------
def _matmul_bias_kernel(x_ref, w_ref, b_ref, o_ref, *, relu):
    out = jnp.dot(x_ref[...], w_ref[...], preferred_element_type=jnp.float32)
    out = out + b_ref[...]                       # (tm, tn) + (1, tn), f32
    if relu:
        out = jnp.maximum(out, 0.0)
    o_ref[...] = out.astype(o_ref.dtype)


def matmul_bias(x, w, b, relu=False, out_dtype=jnp.bfloat16):
    """x: (M, Kp) bf16 (K already padded by caller), w: (K, N), b: (N,)."""
    M, Kx = x.shape
    K, N = w.shape
    assert Kx >= K

    tm = min(512, _round_up(M, 16))
    Mp = _round_up(M, tm)
    tn = min(256, _round_up(N, 128))
    Np = _round_up(N, tn)

    xp = x.astype(jnp.bfloat16)
    if Mp > M:
        xp = jnp.pad(xp, ((0, Mp - M), (0, 0)))
    wp = jnp.pad(w.astype(jnp.bfloat16), ((0, Kx - K), (0, Np - N)))
    bp = jnp.pad(b.astype(jnp.float32), (0, Np - N)).reshape(1, Np)

    vmem = _vmem_limit(
        _nbytes((tm, Kx), jnp.bfloat16),
        _nbytes((Kx, tn), jnp.bfloat16),
        _nbytes((tm, tn), jnp.float32),
        _nbytes((tm, tn), out_dtype),
    )

    out = pl.pallas_call(
        functools.partial(_matmul_bias_kernel, relu=relu),
        out_shape=jax.ShapeDtypeStruct((Mp, Np), out_dtype),
        grid=(Mp // tm, Np // tn),
        in_specs=[
            pl.BlockSpec((tm, Kx), lambda i, j: (i, 0)),   # full-K block
            pl.BlockSpec((Kx, tn), lambda i, j: (0, j)),
            pl.BlockSpec((1, tn), lambda i, j: (0, j)),
        ],
        out_specs=pl.BlockSpec((tm, tn), lambda i, j: (i, j)),
        compiler_params=pltpu.CompilerParams(
            dimension_semantics=("parallel", "parallel"),
            vmem_limit_bytes=vmem,
        ),
    )(xp, wp, bp)
    return out[:M, :N]


def conv2d_im2col(x, w, b, stride=2, padding=1, relu=False, out_dtype=jnp.bfloat16):
    """Strided conv via im2col + single-K-block Pallas matmul (NHWC activations).

    Only used for the stride-2 feature-extraction convs, where the im2col blowup
    is ~2.25x (output spatial is 1/4 of input).
    """
    # TODO(synk): fuse stride-2 convs too (space-to-depth -> stride-1 2x2 conv) to
    # remove the remaining ~2.25x patch materialization.
    N, H, W, Cin = x.shape
    Cout, _, kh, kw = w.shape
    xq = jnp.pad(x.astype(jnp.bfloat16),
                 ((0, 0), (padding, padding), (padding, padding), (0, 0)))
    Ho = (H + 2 * padding - kh) // stride + 1
    Wo = (W + 2 * padding - kw) // stride + 1
    K = kh * kw * Cin
    Kp = _round_up(K, 128) if K >= 128 else _round_up(K, 8)

    cols = []
    for ky in range(kh):
        for kx in range(kw):
            cols.append(xq[:, ky:ky + stride * (Ho - 1) + 1:stride,
                              kx:kx + stride * (Wo - 1) + 1:stride, :])
    if Kp > K:   # K padding fused into the single patch materialization
        cols.append(jnp.zeros((N, Ho, Wo, Kp - K), jnp.bfloat16))
    patches = jnp.concatenate(cols, axis=-1).reshape(N * Ho * Wo, Kp)

    wm = jnp.transpose(w, (2, 3, 1, 0)).reshape(K, Cout)       # (ky,kx,cin) order
    out = matmul_bias(patches, wm, b, relu=relu, out_dtype=out_dtype)
    return out.reshape(N, Ho, Wo, Cout)


# ----------------------------------------------------------------------------
# Pallas kernel 2: fused 3x3 / stride-1 / pad-1 conv (post_convolution).
#   Per image: 9 row-shifted matmuls over the flattened padded input, accumulated
#   in f32 inside the kernel; bias (+ReLU) folded in; lane-dense output store.
#   The extra 2 "junk" W-padding output columns are sliced off in the wrapper.
# ----------------------------------------------------------------------------
def _conv3x3_s1_kernel(x_ref, w_ref, b_ref, o_ref, *, Wp, HoWp, relu):
    acc = None
    for ky in range(3):
        for kx in range(3):
            off = ky * Wp + kx                                # static row offset
            xs = x_ref[off:off + HoWp, :]                     # (HoWp, Cin) bf16
            c = jnp.dot(xs, w_ref[ky * 3 + kx],
                        preferred_element_type=jnp.float32)   # (HoWp, Coutp) f32
            acc = c if acc is None else acc + c
    out = acc + b_ref[...]
    if relu:
        out = jnp.maximum(out, 0.0)
    o_ref[...] = out.astype(o_ref.dtype)


def conv2d_3x3_s1(x, w, b, relu=False, out_dtype=jnp.bfloat16):
    """nn.Conv2d(Cin, Cout, 3, 1, 1) with NHWC activations, fully fused (no im2col)."""
    N, Ho, Wo, Cin = x.shape
    Cout = w.shape[0]
    Wp = Wo + 2
    Hpad = Ho + 3            # pad H by (1, 2): the extra bottom row keeps the
    #                          shifted row-slabs in-bounds (junk columns only).
    Coutp = _round_up(Cout, 128)
    HoWp = Ho * Wp

    xp = jnp.pad(x.astype(jnp.bfloat16), ((0, 0), (1, 2), (1, 1), (0, 0)))
    xf = xp.reshape(N, Hpad * Wp, Cin)
    wt = jnp.transpose(w, (2, 3, 1, 0)).reshape(9, Cin, Cout).astype(jnp.bfloat16)
    wt = jnp.pad(wt, ((0, 0), (0, 0), (0, Coutp - Cout)))
    bp = jnp.pad(b.astype(jnp.float32), (0, Coutp - Cout)).reshape(1, Coutp)

    vmem = _vmem_limit(
        _nbytes((Hpad * Wp, Cin), jnp.bfloat16),
        _nbytes((9, Cin, Coutp), jnp.bfloat16),
        _nbytes((HoWp, Cin), jnp.bfloat16),        # shifted-slice temporary
        _nbytes((HoWp, Coutp), jnp.float32),       # f32 accumulator
        _nbytes((HoWp, Coutp), out_dtype),
    )

    out = pl.pallas_call(
        functools.partial(_conv3x3_s1_kernel, Wp=Wp, HoWp=HoWp, relu=relu),
        out_shape=jax.ShapeDtypeStruct((N, HoWp, Coutp), out_dtype),
        grid=(N,),
        in_specs=[
            pl.BlockSpec((None, Hpad * Wp, Cin), lambda n: (n, 0, 0)),
            pl.BlockSpec((9, Cin, Coutp), lambda n: (0, 0, 0)),
            pl.BlockSpec((1, Coutp), lambda n: (0, 0)),
        ],
        out_specs=pl.BlockSpec((None, HoWp, Coutp), lambda n: (n, 0, 0)),
        compiler_params=pltpu.CompilerParams(
            dimension_semantics=("parallel",),
            vmem_limit_bytes=vmem,
        ),
    )(xf, wt, bp)
    # TODO(synk): add a halo-tiled row grid for very large feature maps; whole-image
    # blocks are used here (fits VMEM comfortably up to ~128x128 feature maps).
    return out.reshape(N, Ho, Wp, Coutp)[:, :, :Wo, :Cout]


# ----------------------------------------------------------------------------
# Pallas kernel 3: colorizer attention  softmax(q @ k^T) @ v
#   flash-style online softmax tiled over the key/value length L; K is passed
#   pre-transposed (B, D, L); padded keys are handled by one additive bias pass.
# ----------------------------------------------------------------------------
def _colorize_attn_kernel(q_ref, kt_ref, v_ref, kb_ref, o_ref, m_sc, l_sc, acc_sc):
    ki = pl.program_id(2)

    @pl.when(ki == 0)
    def _init():
        m_sc[...] = jnp.full_like(m_sc, -1e30)
        l_sc[...] = jnp.zeros_like(l_sc)
        acc_sc[...] = jnp.zeros_like(acc_sc)

    # scores for this KV tile: (tq, tkl), f32 accumulation on the MXU.
    s = jnp.dot(q_ref[...], kt_ref[...], preferred_element_type=jnp.float32)
    s = s + kb_ref[...]            # (1, tkl) key bias: 0 valid, -1e30 padded tail
    # TODO(synk): MAST's Colorizer restricts correlation to a local ROI window and
    # uses its own similarity scaling; global un-scaled softmax attention kept here.

    m_prev = m_sc[...]
    m_new = jnp.maximum(m_prev, jnp.max(s, axis=-1, keepdims=True))
    alpha = jnp.exp(m_prev - m_new)
    p = jnp.exp(s - m_new)                                              # (tq, tkl)
    l_sc[...] = alpha * l_sc[...] + jnp.sum(p, axis=-1, keepdims=True)
    acc_sc[...] = alpha * acc_sc[...] + jnp.dot(
        p.astype(v_ref.dtype), v_ref[...], preferred_element_type=jnp.float32)
    m_sc[...] = m_new

    @pl.when(ki == pl.num_programs(2) - 1)
    def _finalize():
        o_ref[...] = (acc_sc[...] *
                      pl.reciprocal(l_sc[...], approx=True)).astype(o_ref.dtype)


def colorize_attention(q, k, v, out_dtype=jnp.float32):
    """q: (B, HWt, D), k: (B, L, D), v: (B, L, C) -> (B, HWt, C)."""
    B, HWt, D = q.shape
    _, L, C = v.shape

    Dp = _round_up(D, 128)                 # lane-dense contraction
    Cp = _round_up(C, 128)                 # lane-dense value / output channels
    tq = min(128, _round_up(HWt, 16))      # v5e-safe q tile
    HWtp = _round_up(HWt, tq)
    tkl = min(1024, _round_up(L, 128))     # large KV tile, never degenerate
    Lp = _round_up(L, tkl)

    qp = jnp.pad(q.astype(jnp.bfloat16), ((0, 0), (0, HWtp - HWt), (0, Dp - D)))
    kt = jnp.pad(jnp.transpose(k, (0, 2, 1)).astype(jnp.bfloat16),
                 ((0, 0), (0, Dp - D), (0, Lp - L)))                     # (B, Dp, Lp)
    vp = jnp.pad(v.astype(jnp.bfloat16), ((0, 0), (0, Lp - L), (0, Cp - C)))
    kbias = jnp.where(jnp.arange(Lp) < L, 0.0, -1e30).astype(jnp.float32).reshape(1, Lp)

    vmem = _vmem_limit(
        _nbytes((tq, Dp), jnp.bfloat16),
        _nbytes((Dp, tkl), jnp.bfloat16),
        _nbytes((tkl, Cp), jnp.bfloat16),
        2 * _nbytes((tq, tkl), jnp.float32),   # scores + probs
        _nbytes((tq, Cp), jnp.float32),
        _nbytes((tq, Cp), out_dtype),
    )

    out = pl.pallas_call(
        _colorize_attn_kernel,
        out_shape=jax.ShapeDtypeStruct((B, HWtp, Cp), out_dtype),
        grid=(B, HWtp // tq, Lp // tkl),
        in_specs=[
            pl.BlockSpec((None, tq, Dp), lambda b, qi, ki: (b, qi, 0)),
            pl.BlockSpec((None, Dp, tkl), lambda b, qi, ki: (b, 0, ki)),
            pl.BlockSpec((None, tkl, Cp), lambda b, qi, ki: (b, ki, 0)),
            pl.BlockSpec((1, tkl), lambda b, qi, ki: (0, ki)),
        ],
        out_specs=pl.BlockSpec((None, tq, Cp), lambda b, qi, ki: (b, qi, 0)),
        scratch_shapes=[
            pltpu.VMEM((tq, 1), jnp.float32),    # running max m
            pltpu.VMEM((tq, 1), jnp.float32),    # running denom l
            pltpu.VMEM((tq, Cp), jnp.float32),   # running acc
        ],
        compiler_params=pltpu.CompilerParams(
            dimension_semantics=("parallel", "parallel", "arbitrary"),
            vmem_limit_bytes=vmem,
        ),
    )(qp, kt, vp, kbias)
    return out[:, :HWt, :C]


# ----------------------------------------------------------------------------
# MAST module (inference path: multi_scale=None, training=False)
# ----------------------------------------------------------------------------
class MASTPallas:
    def __init__(self, key, multi_scale=None, training=False):
        assert multi_scale is None  # TODO(synk): multi_scale 'a'/'b' branches (post_convolution1) not implemented.
        self.p = 0.3
        self.C = 7
        self.D = 4
        self.R = 6 if training else 12
        self.training = training
        ks = jax.random.split(key, 3)
        # TODO(synk): ResNet18 source is not provided with the module; deterministic
        # 2-conv stride-2 stand-in reproduces the contract used here (feats[4] = 256-ch, 1/4-res map).
        self.fe_w1 = 0.10 * jax.random.normal(ks[0], (64, 3, 3, 3), jnp.float32)
        self.fe_b1 = jnp.zeros((64,), jnp.float32)
        self.fe_w2 = 0.05 * jax.random.normal(ks[1], (256, 64, 3, 3), jnp.float32)
        self.fe_b2 = jnp.zeros((256,), jnp.float32)
        # post_convolution: nn.Conv2d(256, 64, 3, 1, 1)
        self.pc_w = 0.05 * jax.random.normal(ks[2], (64, 256, 3, 3), jnp.float32)
        self.pc_b = jnp.zeros((64,), jnp.float32)

    # activations are NHWC bf16 throughout the feature path.
    def feature_extraction(self, x_nhwc):
        f1 = conv2d_im2col(x_nhwc, self.fe_w1, self.fe_b1, stride=2, padding=1, relu=True)  # (N, H/2, W/2, 64)
        f2 = conv2d_im2col(f1, self.fe_w2, self.fe_b2, stride=2, padding=1, relu=True)      # (N, H/4, W/4, 256)
        return [f1, None, None, None, f2]

    def post_convolution(self, f_nhwc):
        return conv2d_3x3_s1(f_nhwc, self.pc_w, self.pc_b, relu=False)                      # (N, H/4, W/4, 64)

    def colorizer(self, feats_r, feats_t, quantized_r):
        B, Ht, Wt, Cf = feats_t.shape
        q = feats_t.reshape(B, Ht * Wt, Cf)                                        # (B, HWt, 64)
        keys, vals = [], []
        for fr, qr in zip(feats_r, quantized_r):
            keys.append(fr.reshape(B, Ht * Wt, Cf))                                # (B, HWr, 64)
            Bq, Cq, H, W = qr.shape
            # downsample quantized labels by D=4 (average pool) to feature resolution
            qd = qr.reshape(Bq, Cq, H // self.D, self.D, W // self.D, self.D).mean(axis=(3, 5))
            vals.append(qd.reshape(Bq, Cq, -1).transpose(0, 2, 1))                 # (B, HWr, C)
        K = jnp.concatenate(keys, axis=1)                                          # (B, L, 64)
        V = jnp.concatenate(vals, axis=1)                                          # (B, L, C)
        out = colorize_attention(q, K, V)                                          # (B, HWt, C) f32
        quantized_t = out.reshape(B, Ht, Wt, self.C).transpose(0, 3, 1, 2)         # back to NCHW once
        # TODO(synk): MAST's inference Colorizer also returns an ROI-align sampling grid;
        # local-window ROI restriction is not reproduced — return the identity sampling grid.
        ys = jnp.linspace(-1.0, 1.0, Ht)
        xs = jnp.linspace(-1.0, 1.0, Wt)
        gy, gx = jnp.meshgrid(ys, xs, indexing="ij")
        grid = jnp.broadcast_to(jnp.stack([gx, gy], axis=-1), (B, Ht, Wt, 2))
        return quantized_t, grid

    def __call__(self, rgb_r, quantized_r, rgb_t, ref_index=None, current_ind=None, dirates=None):
        nr = len(rgb_r)
        B = rgb_t.shape[0]
        # batch all reference frames + the target frame through a single feature pass.
        rgb_all = jnp.concatenate(list(rgb_r) + [rgb_t], axis=0)                   # ((nr+1)*B, 3, H, W)
        x = jnp.transpose(rgb_all, (0, 2, 3, 1)).astype(jnp.bfloat16)              # NHWC once, bf16 once
        f4 = self.feature_extraction(x)[4]
        feats = self.post_convolution(f4)                                          # ((nr+1)*B, h, w, 64)
        feats_r = [feats[i * B:(i + 1) * B] for i in range(nr)]
        feats_t = feats[nr * B:(nr + 1) * B]
        quantized_t, grid = self.colorizer(feats_r, feats_t, quantized_r)
        return quantized_t, grid


if __name__ == "__main__":
    key = jax.random.PRNGKey(0)
    kmod, k1, k2, k3, k4, k5 = jax.random.split(key, 6)
    B, H, W = 2, 16, 16

    model = MASTPallas(kmod, multi_scale=None, training=False)

    rgb_r = [
        jax.random.normal(k1, (B, 3, H, W), jnp.float32),
        jax.random.normal(k2, (B, 3, H, W), jnp.float32),
    ]
    rgb_t = jax.random.normal(k3, (B, 3, H, W), jnp.float32)
    quantized_r = [
        jax.nn.softmax(jax.random.normal(k4, (B, 7, H, W), jnp.float32), axis=1),
        jax.nn.softmax(jax.random.normal(k5, (B, 7, H, W), jnp.float32), axis=1),
    ]

    fwd = jax.jit(lambda rr, qr, rt: model(rr, qr, rt))
    quantized_t, grid = fwd(rgb_r, quantized_r, rgb_t)
    jax.block_until_ready((quantized_t, grid))

    assert quantized_t.shape == (B, 7, H // 4, W // 4)
    assert grid.shape == (B, H // 4, W // 4, 2)
    assert bool(jnp.all(jnp.isfinite(quantized_t)))
    print("KERNEL_OK")
</pallas_src>

<mosaic_0001>
module attributes {stable_mosaic.version = 11 : i64} {
  func.func @_matmul_bias_kernel(%arg0: i32, %arg1: i32, %arg2: memref<384x32xbf16, #tpu.memory_space<vmem>>, %arg3: memref<32x128xbf16, #tpu.memory_space<vmem>>, %arg4: memref<1x128xf32, #tpu.memory_space<vmem>>, %arg5: memref<384x128xbf16, #tpu.memory_space<vmem>>) attributes {dimension_semantics = [#tpu.dimension_semantics<parallel>, #tpu.dimension_semantics<parallel>], iteration_bounds = array<i64: 1, 1>, scalar_prefetch = 0 : i64, scratch_operands = 0 : i64, tpu.core_type = #tpu.core_type<tc>, window_params = [{transform_indices = @transform_0, window_bounds = array<i64: 384, 32>}, {transform_indices = @transform_1, window_bounds = array<i64: 32, 128>}, {transform_indices = @transform_2, window_bounds = array<i64: 1, 128>}, {transform_indices = @transform_3, window_bounds = array<i64: 384, 128>}]} {
    %c0 = arith.constant 0 : index
    %c0_0 = arith.constant 0 : index
    %0 = vector.load %arg2[%c0, %c0_0] : memref<384x32xbf16, #tpu.memory_space<vmem>>, vector<384x32xbf16>
    %c0_1 = arith.constant 0 : index
    %c0_2 = arith.constant 0 : index
    %1 = vector.load %arg3[%c0_1, %c0_2] : memref<32x128xbf16, #tpu.memory_space<vmem>>, vector<32x128xbf16>
    %cst = arith.constant dense<0.000000e+00> : vector<384x128xf32>
    %2 = tpu.matmul %0, %1, %cst {dimension_numbers = #tpu.dot_dimension_numbers<[1], [0], [0], [1], [0, 0, 1, 1], [], []>} : vector<384x32xbf16>, vector<32x128xbf16>, vector<384x128xf32> -> vector<384x128xf32>
    %c0_3 = arith.constant 0 : index
    %c0_4 = arith.constant 0 : index
    %3 = vector.load %arg4[%c0_3, %c0_4] : memref<1x128xf32, #tpu.memory_space<vmem>>, vector<1x128xf32>
    %4 = vector.broadcast %3 : vector<1x128xf32> to vector<384x128xf32>
    %5 = arith.addf %2, %4 : vector<384x128xf32>
    %cst_5 = arith.constant 0.000000e+00 : f32
    %6 = vector.broadcast %cst_5 : f32 to vector<384x128xf32>
    %7 = arith.maximumf %5, %6 : vector<384x128xf32>
    %8 = arith.truncf %7 : vector<384x128xf32> to vector<384x128xbf16>
    %c0_6 = arith.constant 0 : index
    %c0_7 = arith.constant 0 : index
    %9 = vector.load %arg5[%c0_6, %c0_7] : memref<384x128xbf16, #tpu.memory_space<vmem>>, vector<384x128xbf16>
    tpu.vector_store %arg5[%c0_6, %c0_7], %8 {strides = array<i32>} : memref<384x128xbf16, #tpu.memory_space<vmem>>, vector<384x128xbf16>,
    return
  }
  func.func @transform_0(%arg0: i32, %arg1: i32) -> (i32, i32) {
    %c0_i32 = arith.constant 0 : i32
    %c0_i32_0 = arith.constant 0 : i32
    return %arg0, %c0_i32 : i32, i32
  }
  func.func @transform_1(%arg0: i32, %arg1: i32) -> (i32, i32) {
    %c0_i32 = arith.constant 0 : i32
    %c0_i32_0 = arith.constant 0 : i32
    return %c0_i32, %arg1 : i32, i32
  }
  func.func @transform_2(%arg0: i32, %arg1: i32) -> (i32, i32) {
    %c0_i32 = arith.constant 0 : i32
    %c0_i32_0 = arith.constant 0 : i32
    return %c0_i32, %arg1 : i32, i32
  }
  func.func @transform_3(%arg0: i32, %arg1: i32) -> (i32, i32) {
    %c0_i32 = arith.constant 0 : i32
    return %arg0, %arg1 : i32, i32
  }
}

module attributes {stable_mosaic.version = 11 : i64} {
  func.func @_matmul_bias_kernel(%arg0: i32, %arg1: i32, %arg2: memref<96x640xbf16, #tpu.memory_space<vmem>>, %arg3: memref<640x256xbf16, #tpu.memory_space<vmem>>, %arg4: memref<1x256xf32, #tpu.memory_space<vmem>>, %arg5: memref<96x256xbf16, #tpu.memory_space<vmem>>) attributes {dimension_semantics = [#tpu.dimension_semantics<parallel>, #tpu.dimension_semantics<parallel>], iteration_bounds = array<i64: 1, 1>, scalar_prefetch = 0 : i64, scratch_operands = 0 : i64, tpu.core_type = #tpu.core_type<tc>, window_params = [{transform_indices = @transform_0, window_bounds = array<i64: 96, 640>}, {transform_indices = @transform_1, window_bounds = array<i64: 640, 256>}, {transform_indices = @transform_2, window_bounds = array<i64: 1, 256>}, {transform_indices = @transform_3, window_bounds = array<i64: 96, 256>}]} {
    %c0 = arith.constant 0 : index
    %c0_0 = arith.constant 0 : index
    %0 = vector.load %arg2[%c0, %c0_0] : memref<96x640xbf16, #tpu.memory_space<vmem>>, vector<96x640xbf16>
    %c0_1 = arith.constant 0 : index
    %c0_2 = arith.constant 0 : index
    %1 = vector.load %arg3[%c0_1, %c0_2] : memref<640x256xbf16, #tpu.memory_space<vmem>>, vector<640x256xbf16>
    %cst = arith.constant dense<0.000000e+00> : vector<96x256xf32>
    %2 = tpu.matmul %0, %1, %cst {dimension_numbers = #tpu.dot_dimension_numbers<[1], [0], [0], [1], [0, 0, 1, 1], [], []>} : vector<96x640xbf16>, vector<640x256xbf16>, vector<96x256xf32> -> vector<96x256xf32>
    %c0_3 = arith.constant 0 : index
    %c0_4 = arith.constant 0 : index
    %3 = vector.load %arg4[%c0_3, %c0_4] : memref<1x256xf32, #tpu.memory_space<vmem>>, vector<1x256xf32>
    %4 = vector.broadcast %3 : vector<1x256xf32> to vector<96x256xf32>
    %5 = arith.addf %2, %4 : vector<96x256xf32>
    %cst_5 = arith.constant 0.000000e+00 : f32
    %6 = vector.broadcast %cst_5 : f32 to vector<96x256xf32>
    %7 = arith.maximumf %5, %6 : vector<96x256xf32>
    %8 = arith.truncf %7 : vector<96x256xf32> to vector<96x256xbf16>
    %c0_6 = arith.constant 0 : index
    %c0_7 = arith.constant 0 : index
    %9 = vector.load %arg5[%c0_6, %c0_7] : memref<96x256xbf16, #tpu.memory_space<vmem>>, vector<96x256xbf16>
    tpu.vector_store %arg5[%c0_6, %c0_7], %8 {strides = array<i32>} : memref<96x256xbf16, #tpu.memory_space<vmem>>, vector<96x256xbf16>,
    return
  }
  func.func @transform_0(%arg0: i32, %arg1: i32) -> (i32, i32) {
    %c0_i32 = arith.constant 0 : i32
    %c0_i32_0 = arith.constant 0 : i32
    return %arg0, %c0_i32 : i32, i32
  }
  func.func @transform_1(%arg0: i32, %arg1: i32) -> (i32, i32) {
    %c0_i32 = arith.constant 0 : i32
    %c0_i32_0 = arith.constant 0 : i32
    return %c0_i32, %arg1 : i32, i32
  }
  func.func @transform_2(%arg0: i32, %arg1: i32) -> (i32, i32) {
    %c0_i32 = arith.constant 0 : i32
    %c0_i32_0 = arith.constant 0 : i32
    return %c0_i32, %arg1 : i32, i32
  }
  func.func @transform_3(%arg0: i32, %arg1: i32) -> (i32, i32) {
    %c0_i32 = arith.constant 0 : i32
    return %arg0, %arg1 : i32, i32
  }
}

module attributes {stable_mosaic.version = 11 : i64} {
  func.func @_conv3x3_s1_kernel(%arg0: i32, %arg1: memref<1x42x256xbf16, #tpu.memory_space<vmem>>, %arg2: memref<9x256x128xbf16, #tpu.memory_space<vmem>>, %arg3: memref<1x128xf32, #tpu.memory_space<vmem>>, %arg4: memref<1x24x128xbf16, #tpu.memory_space<vmem>>) attributes {dimension_semantics = [#tpu.dimension_semantics<parallel>], iteration_bounds = array<i64: 6>, scalar_prefetch = 0 : i64, scratch_operands = 0 : i64, tpu.core_type = #tpu.core_type<tc>, window_params = [{transform_indices = @transform_0, window_bounds = array<i64: 1, 42, 256>}, {pipeline_mode = #tpu.pipeline_mode<synchronous>, transform_indices = @transform_1, window_bounds = array<i64: 9, 256, 128>}, {pipeline_mode = #tpu.pipeline_mode<synchronous>, transform_indices = @transform_2, window_bounds = array<i64: 1, 128>}, {transform_indices = @transform_3, window_bounds = array<i64: 1, 24, 128>}]} {
    %c0 = arith.constant 0 : index
    %c0_0 = arith.constant 0 : index
    %c0_1 = arith.constant 0 : index
    %0 = vector.load %arg1[%c0, %c0_0, %c0_1] : memref<1x42x256xbf16, #tpu.memory_space<vmem>>, vector<1x24x256xbf16>
    %1 = vector.shape_cast %0 : vector<1x24x256xbf16> to vector<24x256xbf16>
    %c0_2 = arith.constant 0 : index
    %c0_3 = arith.constant 0 : index
    %c0_4 = arith.constant 0 : index
    %2 = vector.load %arg2[%c0_2, %c0_3, %c0_4] : memref<9x256x128xbf16, #tpu.memory_space<vmem>>, vector<1x256x128xbf16>
    %3 = vector.shape_cast %2 : vector<1x256x128xbf16> to vector<256x128xbf16>
    %cst = arith.constant dense<0.000000e+00> : vector<24x128xf32>
    %4 = tpu.matmul %1, %3, %cst {dimension_numbers = #tpu.dot_dimension_numbers<[1], [0], [0], [1], [0, 0, 1, 1], [], []>} : vector<24x256xbf16>, vector<256x128xbf16>, vector<24x128xf32> -> vector<24x128xf32>
    %c0_5 = arith.constant 0 : index
    %c1 = arith.constant 1 : index
    %c0_6 = arith.constant 0 : index
    %5 = vector.load %arg1[%c0_5, %c1, %c0_6] : memref<1x42x256xbf16, #tpu.memory_space<vmem>>, vector<1x24x256xbf16>
    %6 = vector.shape_cast %5 : vector<1x24x256xbf16> to vector<24x256xbf16>
    %c1_7 = arith.constant 1 : index
    %c0_8 = arith.constant 0 : index
    %c0_9 = arith.constant 0 : index
    %7 = vector.load %arg2[%c1_7, %c0_8, %c0_9] : memref<9x256x128xbf16, #tpu.memory_space<vmem>>, vector<1x256x128xbf16>
    %8 = vector.shape_cast %7 : vector<1x256x128xbf16> to vector<256x128xbf16>
    %cst_10 = arith.constant dense<0.000000e+00> : vector<24x128xf32>
    %9 = tpu.matmul %6, %8, %cst_10 {dimension_numbers = #tpu.dot_dimension_numbers<[1], [0], [0], [1], [0, 0, 1, 1], [], []>} : vector<24x256xbf16>, vector<256x128xbf16>, vector<24x128xf32> -> vector<24x128xf32>
    %10 = arith.addf %4, %9 : vector<24x128xf32>
    %c0_11 = arith.constant 0 : index
    %c2 = arith.constant 2 : index
    %c0_12 = arith.constant 0 : index
    %11 = vector.load %arg1[%c0_11, %c2, %c0_12] : memref<1x42x256xbf16, #tpu.memory_space<vmem>>, vector<1x24x256xbf16>
    %12 = vector.shape_cast %11 : vector<1x24x256xbf16> to vector<24x256xbf16>
    %c2_13 = arith.constant 2 : index
    %c0_14 = arith.constant 0 : index
    %c0_15 = arith.constant 0 : index
    %13 = vector.load %arg2[%c2_13, %c0_14, %c0_15] : memref<9x256x128xbf16, #tpu.memory_space<vmem>>, vector<1x256x128xbf16>
    %14 = vector.shape_cast %13 : vector<1x256x128xbf16> to vector<256x128xbf16>
    %cst_16 = arith.constant dense<0.000000e+00> : vector<24x128xf32>
    %15 = tpu.matmul %12, %14, %cst_16 {dimension_numbers = #tpu.dot_dimension_numbers<[1], [0], [0], [1], [0, 0, 1, 1], [], []>} : vector<24x256xbf16>, vector<256x128xbf16>, vector<24x128xf32> -> vector<24x128xf32>
    %16 = arith.addf %10, %15 : vector<24x128xf32>
    %c0_17 = arith.constant 0 : index
    %c6 = arith.constant 6 : index
    %c0_18 = arith.constant 0 : index
    %17 = vector.load %arg1[%c0_17, %c6, %c0_18] : memref<1x42x256xbf16, #tpu.memory_space<vmem>>, vector<1x24x256xbf16>
    %18 = vector.shape_cast %17 : vector<1x24x256xbf16> to vector<24x256xbf16>
    %c3 = arith.constant 3 : index
    %c0_19 = arith.constant 0 : index
    %c0_20 = arith.constant 0 : index
    %19 = vector.load %arg2[%c3, %c0_19, %c0_20] : memref<9x256x128xbf16, #tpu.memory_space<vmem>>, vector<1x256x128xbf16>
    %20 = vector.shape_cast %19 : vector<1x256x128xbf16> to vector<256x128xbf16>
    %cst_21 = arith.constant dense<0.000000e+00> : vector<24x128xf32>
    %21 = tpu.matmul %18, %20, %cst_21 {dimension_numbers = #tpu.dot_dimension_numbers<[1], [0], [0], [1], [0, 0, 1, 1], [], []>} : vector<24x256xbf16>, vector<256x128xbf16>, vector<24x128xf32> -> vector<24x128xf32>
    %22 = arith.addf %16, %21 : vector<24x128xf32>
    %c0_22 = arith.constant 0 : index
    %c7 = arith.constant 7 : index
    %c0_23 = arith.constant 0 : index
    %23 = vector.load %arg1[%c0_22, %c7, %c0_23] : memref<1x42x256xbf16, #tpu.memory_space<vmem>>, vector<1x24x256xbf16>
    %24 = vector.shape_cast %23 : vector<1x24x256xbf16> to vector<24x256xbf16>
    %c4 = arith.constant 4 : index
    %c0_24 = arith.constant 0 : index
    %c0_25 = arith.constant 0 : index
    %25 = vector.load %arg2[%c4, %c0_24, %c0_25] : memref<9x256x128xbf16, #tpu.memory_space<vmem>>, vector<1x256x128xbf16>
    %26 = vector.shape_cast %25 : vector<1x256x128xbf16> to vector<256x128xbf16>
    %cst_26 = arith.constant dense<0.000000e+00> : vector<24x128xf32>
    %27 = tpu.matmul %24, %26, %cst_26 {dimension_numbers = #tpu.dot_dimension_numbers<[1], [0], [0], [1], [0, 0, 1, 1], [], []>} : vector<24x256xbf16>, vector<256x128xbf16>, vector<24x128xf32> -> vector<24x128xf32>
    %28 = arith.addf %22, %27 : vector<24x128xf32>
    %c0_27 = arith.constant 0 : index
    %c8 = arith.constant 8 : index
    %c0_28 = arith.constant 0 : index
    %29 = vector.load %arg1[%c0_27, %c8, %c0_28] : memref<1x42x256xbf16, #tpu.memory_space<vmem>>, vector<1x24x256xbf16>
    %30 = vector.shape_cast %29 : vector<1x24x256xbf16> to vector<24x256xbf16>
    %c5 = arith.constant 5 : index
    %c0_29 = arith.constant 0 : index
    %c0_30 = arith.constant 0 : index
    %31 = vector.load %arg2[%c5, %c0_29, %c0_30] : memref<9x256x128xbf16, #tpu.memory_space<vmem>>, vector<1x256x128xbf16>
    %32 = vector.shape_cast %31 : vector<1x256x128xbf16> to vector<256x128xbf16>
    %cst_31 = arith.constant dense<0.000000e+00> : vector<24x128xf32>
    %33 = tpu.matmul %30, %32, %cst_31 {dimension_numbers = #tpu.dot_dimension_numbers<[1], [0], [0], [1], [0, 0, 1, 1], [], []>} : vector<24x256xbf16>, vector<256x128xbf16>, vector<24x128xf32> -> vector<24x128xf32>
    %34 = arith.addf %28, %33 : vector<24x128xf32>
    %c0_32 = arith.constant 0 : index
    %c12 = arith.constant 12 : index
    %c0_33 = arith.constant 0 : index
    %35 = vector.load %arg1[%c0_32, %c12, %c0_33] : memref<1x42x256xbf16, #tpu.memory_space<vmem>>, vector<1x24x256xbf16>
    %36 = vector.shape_cast %35 : vector<1x24x256xbf16> to vector<24x256xbf16>
    %c6_34 = arith.constant 6 : index
    %c0_35 = arith.constant 0 : index
    %c0_36 = arith.constant 0 : index
    %37 = vector.load %arg2[%c6_34, %c0_35, %c0_36] : memref<9x256x128xbf16, #tpu.memory_space<vmem>>, vector<1x256x128xbf16>
    %38 = vector.shape_cast %37 : vector<1x256x128xbf16> to vector<256x128xbf16>
    %cst_37 = arith.constant dense<0.000000e+00> : vector<24x128xf32>
    %39 = tpu.matmul %36, %38, %cst_37 {dimension_numbers = #tpu.dot_dimension_numbers<[1], [0], [0], [1], [0, 0, 1, 1], [], []>} : vector<24x256xbf16>, vector<256x128xbf16>, vector<24x128xf32> -> vector<24x128xf32>
    %40 = arith.addf %34, %39 : vector<24x128xf32>
    %c0_38 = arith.constant 0 : index
    %c13 = arith.constant 13 : index
    %c0_39 = arith.constant 0 : index
    %41 = vector.load %arg1[%c0_38, %c13, %c0_39] : memref<1x42x256xbf16, #tpu.memory_space<vmem>>, vector<1x24x256xbf16>
    %42 = vector.shape_cast %41 : vector<1x24x256xbf16> to vector<24x256xbf16>
    %c7_40 = arith.constant 7 : index
    %c0_41 = arith.constant 0 : index
    %c0_42 = arith.constant 0 : index
    %43 = vector.load %arg2[%c7_40, %c0_41, %c0_42] : memref<9x256x128xbf16, #tpu.memory_space<vmem>>, vector<1x256x128xbf16>
    %44 = vector.shape_cast %43 : vector<1x256x128xbf16> to vector<256x128xbf16>
    %cst_43 = arith.constant dense<0.000000e+00> : vector<24x128xf32>
    %45 = tpu.matmul %42, %44, %cst_43 {dimension_numbers = #tpu.dot_dimension_numbers<[1], [0], [0], [1], [0, 0, 1, 1], [], []>} : vector<24x256xbf16>, vector<256x128xbf16>, vector<24x128xf32> -> vector<24x128xf32>
    %46 = arith.addf %40, %45 : vector<24x128xf32>
    %c0_44 = arith.constant 0 : index
    %c14 = arith.constant 14 : index
    %c0_45 = arith.constant 0 : index
    %47 = vector.load %arg1[%c0_44, %c14, %c0_45] : memref<1x42x256xbf16, #tpu.memory_space<vmem>>, vector<1x24x256xbf16>
    %48 = vector.shape_cast %47 : vector<1x24x256xbf16> to vector<24x256xbf16>
    %c8_46 = arith.constant 8 : index
    %c0_47 = arith.constant 0 : index
    %c0_48 = arith.constant 0 : index
    %49 = vector.load %arg2[%c8_46, %c0_47, %c0_48] : memref<9x256x128xbf16, #tpu.memory_space<vmem>>, vector<1x256x128xbf16>
    %50 = vector.shape_cast %49 : vector<1x256x128xbf16> to vector<256x128xbf16>
    %cst_49 = arith.constant dense<0.000000e+00> : vector<24x128xf32>
    %51 = tpu.matmul %48, %50, %cst_49 {dimension_numbers = #tpu.dot_dimension_numbers<[1], [0], [0], [1], [0, 0, 1, 1], [], []>} : vector<24x256xbf16>, vector<256x128xbf16>, vector<24x128xf32> -> vector<24x128xf32>
    %52 = arith.addf %46, %51 : vector<24x128xf32>
    %c0_50 = arith.constant 0 : index
    %c0_51 = arith.constant 0 : index
    %53 = vector.load %arg3[%c0_50, %c0_51] : memref<1x128xf32, #tpu.memory_space<vmem>>, vector<1x128xf32>
    %54 = vector.broadcast %53 : vector<1x128xf32> to vector<24x128xf32>
    %55 = arith.addf %52, %54 : vector<24x128xf32>
    %56 = arith.truncf %55 : vector<24x128xf32> to vector<24x128xbf16>
    %c0_52 = arith.constant 0 : index
    %c0_53 = arith.constant 0 : index
    %c0_54 = arith.constant 0 : index
    %57 = vector.load %arg4[%c0_52, %c0_53, %c0_54] : memref<1x24x128xbf16, #tpu.memory_space<vmem>>, vector<1x24x128xbf16>
    %58 = vector.shape_cast %57 : vector<1x24x128xbf16> to vector<24x128xbf16>
    %59 = vector.shape_cast %56 : vector<24x128xbf16> to vector<1x24x128xbf16>
    tpu.vector_store %arg4[%c0_52, %c0_53, %c0_54], %59 {strides = array<i32>} : memref<1x24x128xbf16, #tpu.memory_space<vmem>>, vector<1x24x128xbf16>,
    return
  }
  func.func @transform_0(%arg0: i32) -> (i32, i32, i32) {
    %c0_i32 = arith.constant 0 : i32
    %c0_i32_0 = arith.constant 0 : i32
    %c0_i32_1 = arith.constant 0 : i32
    return %arg0, %c0_i32, %c0_i32_0 : i32, i32, i32
  }
  func.func @transform_1(%arg0: i32) -> (i32, i32, i32) {
    %c0_i32 = arith.constant 0 : i32
    %c0_i32_0 = arith.constant 0 : i32
    %c0_i32_1 = arith.constant 0 : i32
    %c0_i32_2 = arith.constant 0 : i32
    return %c0_i32, %c0_i32_0, %c0_i32_1 : i32, i32, i32
  }
  func.func @transform_2(%arg0: i32) -> (i32, i32) {
    %c0_i32 = arith.constant 0 : i32
    %c0_i32_0 = arith.constant 0 : i32
    %c0_i32_1 = arith.constant 0 : i32
    return %c0_i32, %c0_i32_0 : i32, i32
  }
  func.func @transform_3(%arg0: i32) -> (i32, i32, i32) {
    %c0_i32 = arith.constant 0 : i32
    %c0_i32_0 = arith.constant 0 : i32
    %c0_i32_1 = arith.constant 0 : i32
    return %arg0, %c0_i32, %c0_i32_0 : i32, i32, i32
  }
}

module attributes {stable_mosaic.version = 11 : i64} {
  func.func @_colorize_attn_kernel(%arg0: i32, %arg1: i32, %arg2: i32, %arg3: memref<1x16x128xbf16, #tpu.memory_space<vmem>>, %arg4: memref<1x128x128xbf16, #tpu.memory_space<vmem>>, %arg5: memref<1x128x128xbf16, #tpu.memory_space<vmem>>, %arg6: memref<1x128xf32, #tpu.memory_space<vmem>>, %arg7: memref<1x16x128xf32, #tpu.memory_space<vmem>>, %arg8: memref<16x1xf32, #tpu.memory_space<vmem>>, %arg9: memref<16x1xf32, #tpu.memory_space<vmem>>, %arg10: memref<16x128xf32, #tpu.memory_space<vmem>>) attributes {dimension_semantics = [#tpu.dimension_semantics<parallel>, #tpu.dimension_semantics<parallel>, #tpu.dimension_semantics<arbitrary>], iteration_bounds = array<i64: 2, 1, 1>, scalar_prefetch = 0 : i64, scratch_operands = 3 : i64, tpu.core_type = #tpu.core_type<tc>, window_params = [{transform_indices = @transform_0, window_bounds = array<i64: 1, 16, 128>}, {transform_indices = @transform_1, window_bounds = array<i64: 1, 128, 128>}, {transform_indices = @transform_2, window_bounds = array<i64: 1, 128, 128>}, {transform_indices = @transform_3, window_bounds = array<i64: 1, 128>}, {transform_indices = @transform_4, window_bounds = array<i64: 1, 16, 128>}]} {
    %c0_i32 = arith.constant 0 : i32
    %0 = arith.cmpi eq, %arg2, %c0_i32 : i32
    %1 = arith.extui %0 : i1 to i32
    %c0_i32_0 = arith.constant 0 : i32
    %2 = arith.cmpi ne, %1, %c0_i32_0 : i32
    scf.if %2 {
      %cst_28 = arith.constant -1.000000e+30 : f32
      %39 = vector.broadcast %cst_28 : f32 to vector<16x1xf32>
      %c0_29 = arith.constant 0 : index
      %c0_30 = arith.constant 0 : index
      %40 = vector.load %arg8[%c0_29, %c0_30] : memref<16x1xf32, #tpu.memory_space<vmem>>, vector<16x1xf32>
      tpu.vector_store %arg8[%c0_29, %c0_30], %39 {strides = array<i32>} : memref<16x1xf32, #tpu.memory_space<vmem>>, vector<16x1xf32>,
      %cst_31 = arith.constant 0.000000e+00 : f32
      %41 = vector.broadcast %cst_31 : f32 to vector<16x1xf32>
      %c0_32 = arith.constant 0 : index
      %c0_33 = arith.constant 0 : index
      %42 = vector.load %arg9[%c0_32, %c0_33] : memref<16x1xf32, #tpu.memory_space<vmem>>, vector<16x1xf32>
      tpu.vector_store %arg9[%c0_32, %c0_33], %41 {strides = array<i32>} : memref<16x1xf32, #tpu.memory_space<vmem>>, vector<16x1xf32>,
      %cst_34 = arith.constant 0.000000e+00 : f32
      %43 = vector.broadcast %cst_34 : f32 to vector<16x128xf32>
      %c0_35 = arith.constant 0 : index
      %c0_36 = arith.constant 0 : index
      %44 = vector.load %arg10[%c0_35, %c0_36] : memref<16x128xf32, #tpu.memory_space<vmem>>, vector<16x128xf32>
      tpu.vector_store %arg10[%c0_35, %c0_36], %43 {strides = array<i32>} : memref<16x128xf32, #tpu.memory_space<vmem>>, vector<16x128xf32>,
    } else {
    }
    %c0 = arith.constant 0 : index
    %c0_1 = arith.constant 0 : index
    %c0_2 = arith.constant 0 : index
    %3 = vector.load %arg3[%c0, %c0_1, %c0_2] : memref<1x16x128xbf16, #tpu.memory_space<vmem>>, vector<1x16x128xbf16>
    %4 = vector.shape_cast %3 : vector<1x16x128xbf16> to vector<16x128xbf16>
    %c0_3 = arith.constant 0 : index
    %c0_4 = arith.constant 0 : index
    %c0_5 = arith.constant 0 : index
    %5 = vector.load %arg4[%c0_3, %c0_4, %c0_5] : memref<1x128x128xbf16, #tpu.memory_space<vmem>>, vector<1x128x128xbf16>
    %6 = vector.shape_cast %5 : vector<1x128x128xbf16> to vector<128x128xbf16>
    %cst = arith.constant dense<0.000000e+00> : vector<16x128xf32>
    %7 = tpu.matmul %4, %6, %cst {dimension_numbers = #tpu.dot_dimension_numbers<[1], [0], [0], [1], [0, 0, 1, 1], [], []>} : vector<16x128xbf16>, vector<128x128xbf16>, vector<16x128xf32> -> vector<16x128xf32>
    %c0_6 = arith.constant 0 : index
    %c0_7 = arith.constant 0 : index
    %8 = vector.load %arg6[%c0_6, %c0_7] : memref<1x128xf32, #tpu.memory_space<vmem>>, vector<1x128xf32>
    %9 = vector.broadcast %8 : vector<1x128xf32> to vector<16x128xf32>
    %10 = arith.addf %7, %9 : vector<16x128xf32>
    %c0_8 = arith.constant 0 : index
    %c0_9 = arith.constant 0 : index
    %11 = vector.load %arg8[%c0_8, %c0_9] : memref<16x1xf32, #tpu.memory_space<vmem>>, vector<16x1xf32>
    %cst_10 = arith.constant dense<0xFF800000> : vector<16xf32>
    %12 = vector.multi_reduction <maximumf>, %10, %cst_10 [1] : vector<16x128xf32> to vector<16xf32>
    %13 = vector.shape_cast %12 : vector<16xf32> to vector<16x1xf32>
    %14 = arith.maximumf %11, %13 : vector<16x1xf32>
    %15 = arith.subf %11, %14 : vector<16x1xf32>
    %16 = math.exp %15 : vector<16x1xf32>
    %17 = vector.broadcast %14 : vector<16x1xf32> to vector<16x128xf32>
    %18 = arith.subf %10, %17 : vector<16x128xf32>
    %19 = math.exp %18 : vector<16x128xf32>
    %c0_11 = arith.constant 0 : index
    %c0_12 = arith.constant 0 : index
    %20 = vector.load %arg9[%c0_11, %c0_12] : memref<16x1xf32, #tpu.memory_space<vmem>>, vector<16x1xf32>
    %21 = arith.mulf %16, %20 : vector<16x1xf32>
    %cst_13 = arith.constant dense<0.000000e+00> : vector<16xf32>
    %22 = vector.multi_reduction <add>, %19, %cst_13 [1] : vector<16x128xf32> to vector<16xf32>
    %23 = vector.shape_cast %22 : vector<16xf32> to vector<16x1xf32>
    %24 = arith.addf %21, %23 : vector<16x1xf32>
    %c0_14 = arith.constant 0 : index
    %c0_15 = arith.constant 0 : index
    %25 = vector.load %arg9[%c0_14, %c0_15] : memref<16x1xf32, #tpu.memory_space<vmem>>, vector<16x1xf32>
    tpu.vector_store %arg9[%c0_14, %c0_15], %24 {strides = array<i32>} : memref<16x1xf32, #tpu.memory_space<vmem>>, vector<16x1xf32>,
    %c0_16 = arith.constant 0 : index
    %c0_17 = arith.constant 0 : index
    %26 = vector.load %arg10[%c0_16, %c0_17] : memref<16x128xf32, #tpu.memory_space<vmem>>, vector<16x128xf32>
    %27 = vector.broadcast %16 : vector<16x1xf32> to vector<16x128xf32>
    %28 = arith.mulf %27, %26 : vector<16x128xf32>
    %29 = arith.truncf %19 : vector<16x128xf32> to vector<16x128xbf16>
    %c0_18 = arith.constant 0 : index
    %c0_19 = arith.constant 0 : index
    %c0_20 = arith.constant 0 : index
    %30 = vector.load %arg5[%c0_18, %c0_19, %c0_20] : memref<1x128x128xbf16, #tpu.memory_space<vmem>>, vector<1x128x128xbf16>
    %31 = vector.shape_cast %30 : vector<1x128x128xbf16> to vector<128x128xbf16>
    %cst_21 = arith.constant dense<0.000000e+00> : vector<16x128xf32>
    %32 = tpu.matmul %29, %31, %cst_21 {dimension_numbers = #tpu.dot_dimension_numbers<[1], [0], [0], [1], [0, 0, 1, 1], [], []>} : vector<16x128xbf16>, vector<128x128xbf16>, vector<16x128xf32> -> vector<16x128xf32>
    %33 = arith.addf %28, %32 : vector<16x128xf32>
    %c0_22 = arith.constant 0 : index
    %c0_23 = arith.constant 0 : index
    %34 = vector.load %arg10[%c0_22, %c0_23] : memref<16x128xf32, #tpu.memory_space<vmem>>, vector<16x128xf32>
    tpu.vector_store %arg10[%c0_22, %c0_23], %33 {strides = array<i32>} : memref<16x128xf32, #tpu.memory_space<vmem>>, vector<16x128xf32>,
    %c0_24 = arith.constant 0 : index
    %c0_25 = arith.constant 0 : index
    %35 = vector.load %arg8[%c0_24, %c0_25] : memref<16x1xf32, #tpu.memory_space<vmem>>, vector<16x1xf32>
    tpu.vector_store %arg8[%c0_24, %c0_25], %14 {strides = array<i32>} : memref<16x1xf32, #tpu.memory_space<vmem>>, vector<16x1xf32>,
    %c0_i32_26 = arith.constant 0 : i32
    %36 = arith.cmpi eq, %arg2, %c0_i32_26 : i32
    %37 = arith.extui %36 : i1 to i32
    %c0_i32_27 = arith.constant 0 : i32
    %38 = arith.cmpi ne, %37, %c0_i32_27 : i32
    scf.if %38 {
      %c0_28 = arith.constant 0 : index
      %c0_29 = arith.constant 0 : index
      %39 = vector.load %arg10[%c0_28, %c0_29] : memref<16x128xf32, #tpu.memory_space<vmem>>, vector<16x128xf32>
      %c0_30 = arith.constant 0 : index
      %c0_31 = arith.constant 0 : index
      %40 = vector.load %arg9[%c0_30, %c0_31] : memref<16x1xf32, #tpu.memory_space<vmem>>, vector<16x1xf32>
      %41 = tpu.reciprocal %40 {approx = true} : vector<16x1xf32> -> vector<16x1xf32>
      %42 = vector.broadcast %41 : vector<16x1xf32> to vector<16x128xf32>
      %43 = arith.mulf %39, %42 : vector<16x128xf32>
      %c0_32 = arith.constant 0 : index
      %c0_33 = arith.constant 0 : index
      %c0_34 = arith.constant 0 : index
      %44 = vector.load %arg7[%c0_32, %c0_33, %c0_34] : memref<1x16x128xf32, #tpu.memory_space<vmem>>, vector<1x16x128xf32>
      %45 = vector.shape_cast %44 : vector<1x16x128xf32> to vector<16x128xf32>
      %46 = vector.shape_cast %43 : vector<16x128xf32> to vector<1x16x128xf32>
      tpu.vector_store %arg7[%c0_32, %c0_33, %c0_34], %46 {strides = array<i32>} : memref<1x16x128xf32, #tpu.memory_space<vmem>>, vector<1x16x128xf32>,
    } else {
    }
    return
  }
  func.func @transform_0(%arg0: i32, %arg1: i32, %arg2: i32) -> (i32, i32, i32) {
    %c0_i32 = arith.constant 0 : i32
    %c0_i32_0 = arith.constant 0 : i32
    return %arg0, %arg1, %c0_i32 : i32, i32, i32
  }
  func.func @transform_1(%arg0: i32, %arg1: i32, %arg2: i32) -> (i32, i32, i32) {
    %c0_i32 = arith.constant 0 : i32
    %c0_i32_0 = arith.constant 0 : i32
    return %arg0, %c0_i32, %arg2 : i32, i32, i32
  }
  func.func @transform_2(%arg0: i32, %arg1: i32, %arg2: i32) -> (i32, i32, i32) {
    %c0_i32 = arith.constant 0 : i32
    %c0_i32_0 = arith.constant 0 : i32
    return %arg0, %arg2, %c0_i32 : i32, i32, i32
  }
  func.func @transform_3(%arg0: i32, %arg1: i32, %arg2: i32) -> (i32, i32) {
    %c0_i32 = arith.constant 0 : i32
    %c0_i32_0 = arith.constant 0 : i32
    return %c0_i32, %arg2 : i32, i32
  }
  func.func @transform_4(%arg0: i32, %arg1: i32, %arg2: i32) -> (i32, i32, i32) {
    %c0_i32 = arith.constant 0 : i32
    %c0_i32_0 = arith.constant 0 : i32
    return %arg0, %arg1, %c0_i32 : i32, i32, i32
  }
}

</mosaic_0001>

<bundles_post_ra>
// kernel: _lambda_.4
= control target key start
LH: loop header
LB: loop body
LE: loop exit
PB: predicated region body
PF: predicated region fallthrough
CT: control target
= control target key end

     0   :  { %vm206_vm0 = vcmask 261120   ;;  %s1441_s1 = inlined_call_operand.vmem [shape: bf16[32,128], index: 1, kind: input, shape index: {}]   ;;  %s1442_s0 = inlined_call_operand.vmem [shape: bf16[384,32], index: 0, kind: input, shape index: {}]   ;;  %s1443_s2 = inlined_call_operand.vmem [shape: f32[1,128], index: 2, kind: input, shape index: {}]   ;;  %s1444_s3 = inlined_call_operand.vmem [shape: bf16[384,128], index: 3, kind: output, shape index: {}]  }
   0x1   :  { %v1168_v0 = vld [vmem:[%s1441_s1 + $0x8] sm:$0xff]   ;;  %v1169_v1 = vld [vmem:[%s1441_s1] sm:$0xff]   ;;  %v1174_v6 = vld [vmem:[%s1442_s0 + $0x10] sm:$0xff]  }
   0x2   :  { %1112 = vmatprep.subr.bf16.mxu0 %v1168_v0  ;;  %1164 = vmatprep.subr.bf16.mxu1 %v1168_v0  ;;  %v1170_v2 = vld [vmem:[%s1442_s0] sm:$0xff]   ;;  %v1172_v4 = vld [vmem:[%s1442_s0 + $0x8] sm:$0xff]   ;;  %v1175_v7 = vld [vmem:[%s1442_s0 + $0x70] sm:$0xff]  }
   0x3   :  { %1113 = vmatpush3.bf16.msra.mxu0 %v1168_v0  ;;  %1166 = vmatpush3.bf16.msra.mxu1 %v1168_v0  ;;  %v1171_v3 = vld [vmem:[%s1442_s0 + $0x60] sm:$0xff]   ;;  %v1173_v5 = vld [vmem:[%s1442_s0 + $0x68] sm:$0xff]   ;;  %v1176_v8 = vld [vmem:[%s1442_s0 + $0x18] sm:$0xff]  }
   0x4   :  { %1114 = vmatprep.subr.bf16.mxu0 %v1169_v1  ;;  %1165 = vmatprep.subr.bf16.mxu1 %v1169_v1  ;;  %v1177_v9 = vld [vmem:[%s1442_s0 + $0x78] sm:$0xff]   ;;  %v1178_v10 = vld [vmem:[%s1442_s0 + $0x20] sm:$0xff]   ;;  %v1180_v12 = vld [vmem:[%s1442_s0 + $0x28] sm:$0xff]  }
   0x5   :  { %1116 = vmatprep.mubr.msk.bf16.mxu0 %vm206_vm0, %v1170_v2  ;;  %1140 = vmatprep.mubr.msk.bf16.mxu1 %vm206_vm0, %v1171_v3  ;;  %v1179_v11 = vld [vmem:[%s1442_s0 + $0x80] sm:$0xff]   ;;  %v1181_v13 = vld [vmem:[%s1442_s0 + $0x88] sm:$0xff]   ;;  %v1182_v14 = vld [vmem:[%s1442_s0 + $0x30] sm:$0xff]  }
   0x6   :  { %v1183_v15 = vld [vmem:[%s1442_s0 + $0x90] sm:$0xff]   ;;  %v1184_v16 = vld [vmem:[%s1442_s0 + $0x38] sm:$0xff]   ;;  %v1186_v18 = vld [vmem:[%s1442_s0 + $0x40] sm:$0xff]  }
   0x7   :  { %1115 = vmatpush3.bf16.msra.mxu0 %v1169_v1  ;;  %1167 = vmatpush3.bf16.msra.mxu1 %v1169_v1  ;;  %v1185_v17 = vld [vmem:[%s1442_s0 + $0x98] sm:$0xff]   ;;  %v1187_v19 = vld [vmem:[%s1442_s0 + $0xa0] sm:$0xff]   ;;  %v1188_v20 = vld [vmem:[%s1442_s0 + $0x48] sm:$0xff]  }
   0x8   :  { %v1189_v21 = vld [vmem:[%s1442_s0 + $0xa8] sm:$0xff]   ;;  %v1190_v22 = vld [vmem:[%s1442_s0 + $0x50] sm:$0xff]   ;;  %v1192_v24 = vld [vmem:[%s1442_s0 + $0x58] sm:$0xff]  }
   0x9   :  { %v1191_v23 = vld [vmem:[%s1442_s0 + $0xb0] sm:$0xff]   ;;  %v1193_v25 = vld [vmem:[%s1442_s0 + $0xb8] sm:$0xff]   ;;  %v1319_v26 = vld [vmem:[%s1443_s2] ss:$0 sm:$0xff] }
   0xa   :  { %1117 = vmatmul.mubr.msk.bf16.vlgmr.msra.gmra.mxu0 %vm206_vm0, %v1172_v4  ;;  %1141 = vmatmul.mubr.msk.bf16.vlgmr.msra.gmra.mxu1 %vm206_vm0, %v1173_v5 }
   0xb   :  { %1120 = vmatprep.mubr.msk.bf16.mxu0 %vm206_vm0, %v1174_v6  ;;  %1144 = vmatprep.mubr.msk.bf16.mxu1 %vm206_vm0, %v1175_v7 }
  0x12   :  { %1121 = vmatmul.mubr.msk.bf16.gmra.mxu0 %vm206_vm0, %v1176_v8  ;;  %1145 = vmatmul.mubr.msk.bf16.gmra.mxu1 %vm206_vm0, %v1177_v9 }
  0x13   :  { %1124 = vmatprep.mubr.msk.bf16.mxu0 %vm206_vm0, %v1178_v10  ;;  %1148 = vmatprep.mubr.msk.bf16.mxu1 %vm206_vm0, %v1179_v11 }
  0x1a   :  { %1125 = vmatmul.mubr.msk.bf16.gmra.mxu0 %vm206_vm0, %v1180_v12  ;;  %1149 = vmatmul.mubr.msk.bf16.gmra.mxu1 %vm206_vm0, %v1181_v13 }
  0x1b   :  { %1128 = vmatprep.mubr.msk.bf16.mxu0 %vm206_vm0, %v1182_v14  ;;  %1152 = vmatprep.mubr.msk.bf16.mxu1 %vm206_vm0, %v1183_v15 }
  0x22   :  { %1129 = vmatmul.mubr.msk.bf16.gmra.mxu0 %vm206_vm0, %v1184_v16  ;;  %1153 = vmatmul.mubr.msk.bf16.gmra.mxu1 %vm206_vm0, %v1185_v17 }
  0x23   :  { %1132 = vmatprep.mubr.msk.bf16.mxu0 %vm206_vm0, %v1186_v18  ;;  %1156 = vmatprep.mubr.msk.bf16.mxu1 %vm206_vm0, %v1187_v19 }
  0x2a   :  { %1133 = vmatmul.mubr.msk.bf16.gmra.mxu0 %vm206_vm0, %v1188_v20  ;;  %1157 = vmatmul.mubr.msk.bf16.gmra.mxu1 %vm206_vm0, %v1189_v21 }
  0x2b   :  { %1136 = vmatprep.mubr.msk.bf16.mxu0 %vm206_vm0, %v1190_v22  ;;  %1160 = vmatprep.mubr.msk.bf16.mxu1 %vm206_vm0, %v1191_v23 }
  0x32   :  { %1137 = vmatmul.mubr.msk.bf16.gmra.mxu0 %vm206_vm0, %v1192_v24  ;;  %1161 = vmatmul.mubr.msk.bf16.gmra.mxu1 %vm206_vm0, %v1193_v25 }
  0xca   :  { %v1118_v27 = vpop.f32.mrf.mxu0  ;;  %v1142_v28 = vpop.f32.mrf.mxu1 }
  0xcb   :  { %v322_v29 = vadd.f32 %v1118_v27, %v1319_v26  ;;  %v418_v30 = vadd.f32 %v1142_v28, %v1319_v26 }
  0xcc   :  { %v313_v31 = vpop.f32.mrf.mxu0  ;;  %v409_v32 = vpop.f32.mrf.mxu1 }
  0xcd   :  { %v314_v33 = vadd.f32 %v1319_v26, %v313_v31  ;;  %v410_v34 = vadd.f32 %v1319_v26, %v409_v32  ;;  %v506_v39 = vmax.f32 %v322_v29, 0.0  ;;  %v530_v40 = vmax.f32 %v418_v30, 0.0 }
  0xce   :  { %v1119_v35 = vpop.f32.mrf.mxu0  ;;  %v1143_v36 = vpop.f32.mrf.mxu1 }
  0xcf   :  { %v325_v37 = vadd.f32 %v1119_v35, %v1319_v26  ;;  %v421_v38 = vadd.f32 %v1143_v36, %v1319_v26  ;;  %v504_v47 = vmax.f32 %v314_v33, 0.0  ;;  %v528_v48 = vmax.f32 %v410_v34, 0.0 }
  0xd0   :  { %v316_v41 = vpop.f32.mrf.mxu0  ;;  %v412_v42 = vpop.f32.mrf.mxu1 }
  0xd1   :  { %v507_v43 = vmax.f32 %v325_v37, 0.0  ;;  %v531_v44 = vmax.f32 %v421_v38, 0.0  ;;  %v317_v45 = vadd.f32 %v1319_v26, %v316_v41  ;;  %v413_v46 = vadd.f32 %v1319_v26, %v412_v42 }
  0xd2   :  { %v1122_v49 = vpop.f32.mrf.mxu0  ;;  %v1146_v50 = vpop.f32.mrf.mxu1 }
  0xd3   :  { %v951_v51 = vpack.c.bf16 %v507_v43, %v506_v39  ;;  %v1011_v52 = vpack.c.bf16 %v531_v44, %v530_v40  ;;  %v505_v53 = vmax.f32 %v317_v45, 0.0  ;;  %v529_v54 = vmax.f32 %v413_v46, 0.0 }
  0xd4   :  { %v338_v55 = vadd.f32 %v1122_v49, %v1319_v26  ;;  %v434_v56 = vadd.f32 %v1146_v50, %v1319_v26  ;;  %v329_v57 = vpop.f32.mrf.mxu0  ;;  %v425_v58 = vpop.f32.mrf.mxu1 }
  0xd5   :  { %1063 = vst [vmem:[%s1444_s3 + $0x8] sm:$0xff] %v951_v51   ;;  %1075 = vst [vmem:[%s1444_s3 + $0x68] sm:$0xff] %v1011_v52   ;;  %v946_v59 = vpack.c.bf16 %v505_v53, %v504_v47  ;;  %v1006_v60 = vpack.c.bf16 %v529_v54, %v528_v48  ;;  %v330_v61 = vadd.f32 %v1319_v26, %v329_v57 }
  0xd6   :  { %v426_v62 = vadd.f32 %v1319_v26, %v425_v58  ;;  %v1123_v63 = vpop.f32.mrf.mxu0  ;;  %v1147_v0 = vpop.f32.mrf.mxu1  ;;  %v510_v3 = vmax.f32 %v338_v55, 0.0  ;;  %v534_v4 = vmax.f32 %v434_v56, 0.0 }
  0xd7   :  { %947 = vst [vmem:[%s1444_s3] sm:$0xff] %v946_v59   ;;  %1074 = vst [vmem:[%s1444_s3 + $0x60] sm:$0xff] %v1006_v60   ;;  %v341_v1 = vadd.f32 %v1123_v63, %v1319_v26  ;;  %v437_v2 = vadd.f32 %v1147_v0, %v1319_v26  ;;  %v508_v11 = vmax.f32 %v330_v61, 0.0 }
  0xd8   :  { %v332_v5 = vpop.f32.mrf.mxu0  ;;  %v428_v6 = vpop.f32.mrf.mxu1  ;;  %v532_v12 = vmax.f32 %v426_v62, 0.0 }
  0xd9   :  { %v511_v7 = vmax.f32 %v341_v1, 0.0  ;;  %v535_v8 = vmax.f32 %v437_v2, 0.0  ;;  %v333_v9 = vadd.f32 %v1319_v26, %v332_v5  ;;  %v429_v10 = vadd.f32 %v1319_v26, %v428_v6 }
  0xda   :  { %v1126_v13 = vpop.f32.mrf.mxu0  ;;  %v1150_v14 = vpop.f32.mrf.mxu1 }
  0xdb   :  { %v961_v15 = vpack.c.bf16 %v511_v7, %v510_v3  ;;  %v1021_v16 = vpack.c.bf16 %v535_v8, %v534_v4  ;;  %v509_v17 = vmax.f32 %v333_v9, 0.0  ;;  %v533_v18 = vmax.f32 %v429_v10, 0.0 }
  0xdc   :  { %v354_v19 = vadd.f32 %v1126_v13, %v1319_v26  ;;  %v450_v20 = vadd.f32 %v1150_v14, %v1319_v26  ;;  %v345_v21 = vpop.f32.mrf.mxu0  ;;  %v441_v22 = vpop.f32.mrf.mxu1 }
  0xdd   :  { %1065 = vst [vmem:[%s1444_s3 + $0x18] sm:$0xff] %v961_v15   ;;  %1077 = vst [vmem:[%s1444_s3 + $0x78] sm:$0xff] %v1021_v16   ;;  %v956_v23 = vpack.c.bf16 %v509_v17, %v508_v11  ;;  %v1016_v24 = vpack.c.bf16 %v533_v18, %v532_v12  ;;  %v346_v25 = vadd.f32 %v1319_v26, %v345_v21 }
  0xde   :  { %v442_v27 = vadd.f32 %v1319_v26, %v441_v22  ;;  %v1127_v28 = vpop.f32.mrf.mxu0  ;;  %v1151_v29 = vpop.f32.mrf.mxu1  ;;  %v514_v32 = vmax.f32 %v354_v19, 0.0  ;;  %v538_v33 = vmax.f32 %v450_v20, 0.0 }
  0xdf   :  { %1064 = vst [vmem:[%s1444_s3 + $0x10] sm:$0xff] %v956_v23   ;;  %1076 = vst [vmem:[%s1444_s3 + $0x70] sm:$0xff] %v1016_v24   ;;  %v357_v30 = vadd.f32 %v1127_v28, %v1319_v26  ;;  %v453_v31 = vadd.f32 %v1151_v29, %v1319_v26  ;;  %v512_v40 = vmax.f32 %v346_v25, 0.0 }
  0xe0   :  { %v348_v34 = vpop.f32.mrf.mxu0  ;;  %v444_v35 = vpop.f32.mrf.mxu1  ;;  %v536_v41 = vmax.f32 %v442_v27, 0.0 }
  0xe1   :  { %v515_v36 = vmax.f32 %v357_v30, 0.0  ;;  %v539_v37 = vmax.f32 %v453_v31, 0.0  ;;  %v349_v38 = vadd.f32 %v1319_v26, %v348_v34  ;;  %v445_v39 = vadd.f32 %v1319_v26, %v444_v35 }
  0xe2   :  { %v1130_v42 = vpop.f32.mrf.mxu0  ;;  %v1154_v43 = vpop.f32.mrf.mxu1 }
  0xe3   :  { %v971_v44 = vpack.c.bf16 %v515_v36, %v514_v32  ;;  %v1031_v45 = vpack.c.bf16 %v539_v37, %v538_v33  ;;  %v513_v46 = vmax.f32 %v349_v38, 0.0  ;;  %v537_v47 = vmax.f32 %v445_v39, 0.0 }
  0xe4   :  { %v370_v48 = vadd.f32 %v1130_v42, %v1319_v26  ;;  %v466_v49 = vadd.f32 %v1154_v43, %v1319_v26  ;;  %v361_v50 = vpop.f32.mrf.mxu0  ;;  %v457_v51 = vpop.f32.mrf.mxu1 }
  0xe5   :  { %1067 = vst [vmem:[%s1444_s3 + $0x28] sm:$0xff] %v971_v44   ;;  %1079 = vst [vmem:[%s1444_s3 + $0x88] sm:$0xff] %v1031_v45   ;;  %v966_v52 = vpack.c.bf16 %v513_v46, %v512_v40  ;;  %v1026_v53 = vpack.c.bf16 %v537_v47, %v536_v41  ;;  %v362_v54 = vadd.f32 %v1319_v26, %v361_v50 }
  0xe6   :  { %v458_v55 = vadd.f32 %v1319_v26, %v457_v51  ;;  %v1131_v56 = vpop.f32.mrf.mxu0  ;;  %v1155_v57 = vpop.f32.mrf.mxu1  ;;  %v518_v60 = vmax.f32 %v370_v48, 0.0  ;;  %v542_v61 = vmax.f32 %v466_v49, 0.0 }
  0xe7   :  { %1066 = vst [vmem:[%s1444_s3 + $0x20] sm:$0xff] %v966_v52   ;;  %1078 = vst [vmem:[%s1444_s3 + $0x80] sm:$0xff] %v1026_v53   ;;  %v373_v58 = vadd.f32 %v1131_v56, %v1319_v26  ;;  %v469_v59 = vadd.f32 %v1155_v57, %v1319_v26  ;;  %v516_v4 = vmax.f32 %v362_v54, 0.0 }
  0xe8   :  { %v364_v62 = vpop.f32.mrf.mxu0  ;;  %v460_v63 = vpop.f32.mrf.mxu1  ;;  %v540_v5 = vmax.f32 %v458_v55, 0.0 }
  0xe9   :  { %v519_v0 = vmax.f32 %v373_v58, 0.0  ;;  %v543_v1 = vmax.f32 %v469_v59, 0.0  ;;  %v365_v2 = vadd.f32 %v1319_v26, %v364_v62  ;;  %v461_v3 = vadd.f32 %v1319_v26, %v460_v63 }
  0xea   :  { %v1134_v6 = vpop.f32.mrf.mxu0  ;;  %v1158_v7 = vpop.f32.mrf.mxu1 }
  0xeb   :  { %v981_v8 = vpack.c.bf16 %v519_v0, %v518_v60  ;;  %v1041_v9 = vpack.c.bf16 %v543_v1, %v542_v61  ;;  %v517_v10 = vmax.f32 %v365_v2, 0.0  ;;  %v541_v11 = vmax.f32 %v461_v3, 0.0 }
  0xec   :  { %v386_v12 = vadd.f32 %v1134_v6, %v1319_v26  ;;  %v482_v13 = vadd.f32 %v1158_v7, %v1319_v26  ;;  %v377_v14 = vpop.f32.mrf.mxu0  ;;  %v473_v15 = vpop.f32.mrf.mxu1 }
  0xed   :  { %1069 = vst [vmem:[%s1444_s3 + $0x38] sm:$0xff] %v981_v8   ;;  %1081 = vst [vmem:[%s1444_s3 + $0x98] sm:$0xff] %v1041_v9   ;;  %v976_v16 = vpack.c.bf16 %v517_v10, %v516_v4  ;;  %v1036_v17 = vpack.c.bf16 %v541_v11, %v540_v5  ;;  %v378_v18 = vadd.f32 %v1319_v26, %v377_v14 }
  0xee   :  { %v474_v19 = vadd.f32 %v1319_v26, %v473_v15  ;;  %v1135_v20 = vpop.f32.mrf.mxu0  ;;  %v1159_v21 = vpop.f32.mrf.mxu1  ;;  %v522_v24 = vmax.f32 %v386_v12, 0.0  ;;  %v546_v25 = vmax.f32 %v482_v13, 0.0 }
  0xef   :  { %1068 = vst [vmem:[%s1444_s3 + $0x30] sm:$0xff] %v976_v16   ;;  %1080 = vst [vmem:[%s1444_s3 + $0x90] sm:$0xff] %v1036_v17   ;;  %v389_v22 = vadd.f32 %v1135_v20, %v1319_v26  ;;  %v485_v23 = vadd.f32 %v1159_v21, %v1319_v26  ;;  %v520_v33 = vmax.f32 %v378_v18, 0.0 }
  0xf0   :  { %v380_v27 = vpop.f32.mrf.mxu0  ;;  %v476_v28 = vpop.f32.mrf.mxu1  ;;  %v544_v34 = vmax.f32 %v474_v19, 0.0 }
  0xf1   :  { %v523_v29 = vmax.f32 %v389_v22, 0.0  ;;  %v547_v30 = vmax.f32 %v485_v23, 0.0  ;;  %v381_v31 = vadd.f32 %v1319_v26, %v380_v27  ;;  %v477_v32 = vadd.f32 %v1319_v26, %v476_v28 }
  0xf2   :  { %v1138_v35 = vpop.f32.mrf.mxu0  ;;  %v1162_v36 = vpop.f32.mrf.mxu1 }
  0xf3   :  { %v991_v37 = vpack.c.bf16 %v523_v29, %v522_v24  ;;  %v1051_v38 = vpack.c.bf16 %v547_v30, %v546_v25  ;;  %v521_v39 = vmax.f32 %v381_v31, 0.0  ;;  %v545_v40 = vmax.f32 %v477_v32, 0.0 }
  0xf4   :  { %v402_v41 = vadd.f32 %v1138_v35, %v1319_v26  ;;  %v498_v42 = vadd.f32 %v1162_v36, %v1319_v26  ;;  %v393_v43 = vpop.f32.mrf.mxu0  ;;  %v489_v44 = vpop.f32.mrf.mxu1 }
  0xf5   :  { %1071 = vst [vmem:[%s1444_s3 + $0x48] sm:$0xff] %v991_v37   ;;  %1083 = vst [vmem:[%s1444_s3 + $0xa8] sm:$0xff] %v1051_v38   ;;  %v986_v45 = vpack.c.bf16 %v521_v39, %v520_v33  ;;  %v1046_v46 = vpack.c.bf16 %v545_v40, %v544_v34  ;;  %v394_v47 = vadd.f32 %v1319_v26, %v393_v43 }
  0xf6   :  { %v490_v48 = vadd.f32 %v1319_v26, %v489_v44  ;;  %v1139_v49 = vpop.f32.mrf.mxu0  ;;  %v1163_v50 = vpop.f32.mrf.mxu1  ;;  %v526_v53 = vmax.f32 %v402_v41, 0.0  ;;  %v550_v54 = vmax.f32 %v498_v42, 0.0 }
  0xf7   :  { %1070 = vst [vmem:[%s1444_s3 + $0x40] sm:$0xff] %v986_v45   ;;  %1082 = vst [vmem:[%s1444_s3 + $0xa0] sm:$0xff] %v1046_v46   ;;  %v405_v51 = vadd.f32 %v1139_v49, %v1319_v26  ;;  %v501_v52 = vadd.f32 %v1163_v50, %v1319_v26  ;;  %v524_v61 = vmax.f32 %v394_v47, 0.0 }
  0xf8   :  { %v396_v55 = vpop.f32.mrf.mxu0  ;;  %v492_v56 = vpop.f32.mrf.mxu1  ;;  %v548_v62 = vmax.f32 %v490_v48, 0.0 }
  0xf9   :  { %v527_v57 = vmax.f32 %v405_v51, 0.0  ;;  %v551_v58 = vmax.f32 %v501_v52, 0.0  ;;  %v397_v59 = vadd.f32 %v1319_v26, %v396_v55  ;;  %v493_v60 = vadd.f32 %v1319_v26, %v492_v56 }
  0xfb   :  { %v1001_v63 = vpack.c.bf16 %v527_v57, %v526_v53  ;;  %v1061_v0 = vpack.c.bf16 %v551_v58, %v550_v54  ;;  %v525_v1 = vmax.f32 %v397_v59, 0.0  ;;  %v549_v2 = vmax.f32 %v493_v60, 0.0 }
  0xfd   :  { %1073 = vst [vmem:[%s1444_s3 + $0x58] sm:$0xff] %v1001_v63   ;;  %1085 = vst [vmem:[%s1444_s3 + $0xb8] sm:$0xff] %v1061_v0   ;;  %v996_v3 = vpack.c.bf16 %v525_v1, %v524_v61  ;;  %v1056_v4 = vpack.c.bf16 %v549_v2, %v548_v62 }
  0xff   :  { %1072 = vst [vmem:[%s1444_s3 + $0x50] sm:$0xff] %v996_v3   ;;  %1084 = vst [vmem:[%s1444_s3 + $0xb0] sm:$0xff] %v1056_v4  }

// kernel: _lambda_.5
= control target key start
LH: loop header
LB: loop body
LE: loop exit
PB: predicated region body
PF: predicated region fallthrough
CT: control target
= control target key end

     0   :  { %s1911_s1 = inlined_call_operand.vmem [shape: bf16[640,256], index: 1, kind: input, shape index: {}]   ;;  %s1912_s0 = inlined_call_operand.vmem [shape: bf16[96,640], index: 0, kind: input, shape index: {}]   ;;  %s1913_s2 = inlined_call_operand.vmem [shape: f32[1,256], index: 2, kind: input, shape index: {}]   ;;  %s1914_s3 = inlined_call_operand.vmem [shape: bf16[96,256], index: 3, kind: output, shape index: {}]  }
   0x1   :  { %v1241_v0 = vld [vmem:[%s1911_s1 + $0x74] ss:$8 sps:$4 sm:$0xff]   ;;  %v1245_v2 = vld [vmem:[%s1911_s1 + $0x70] ss:$8 sps:$4 sm:$0xff]   ;;  %v1247_v4 = vld [vmem:[%s1911_s1 + $0x64] ss:$8 sps:$4 sm:$0xff]  }
   0x2   :  { %v1243_v1 = vld [vmem:[%s1911_s1 + $0x174] ss:$8 sps:$4 sm:$0xff]   ;;  %699 = vmatprep.subr.bf16.mxu0 %v1241_v0  ;;  %v1246_v3 = vld [vmem:[%s1911_s1 + $0x170] ss:$8 sps:$4 sm:$0xff]   ;;  %v1249_v5 = vld [vmem:[%s1911_s1 + $0x164] ss:$8 sps:$4 sm:$0xff]  }
   0x3   :  { %792 = vmatprep.subr.bf16.mxu1 %v1243_v1  ;;  %700 = vmatpush1.bf16.msra.mxu0 %v1245_v2  ;;  %v1251_v6 = vld [vmem:[%s1911_s1 + $0x60] ss:$8 sps:$4 sm:$0xff]   ;;  %v1253_v8 = vld [vmem:[%s1911_s1 + $0x54] ss:$8 sps:$4 sm:$0xff]   ;;  %v1257_v10 = vld [vmem:[%s1911_s1 + $0x50] ss:$8 sps:$4 sm:$0xff]  }
   0x4   :  { %793 = vmatpush1.bf16.msra.mxu1 %v1246_v3  ;;  %701 = vmatprep.subr.bf16.mxu0 %v1247_v4  ;;  %v1252_v7 = vld [vmem:[%s1911_s1 + $0x160] ss:$8 sps:$4 sm:$0xff]   ;;  %v1255_v9 = vld [vmem:[%s1911_s1 + $0x154] ss:$8 sps:$4 sm:$0xff]   ;;  %v1258_v11 = vld [vmem:[%s1911_s1 + $0x150] ss:$8 sps:$4 sm:$0xff]  }
   0x5   :  { %794 = vmatprep.subr.bf16.mxu1 %v1249_v5  ;;  %v1259_v12 = vld [vmem:[%s1911_s1 + $0x44] ss:$8 sps:$4 sm:$0xff]   ;;  %v1263_v14 = vld [vmem:[%s1911_s1 + $0x40] ss:$8 sps:$4 sm:$0xff]   ;;  %v1265_v16 = vld [vmem:[%s1911_s1 + $0x34] ss:$8 sps:$4 sm:$0xff]  }
   0x6   :  { %v1261_v13 = vld [vmem:[%s1911_s1 + $0x144] ss:$8 sps:$4 sm:$0xff]   ;;  %v1264_v15 = vld [vmem:[%s1911_s1 + $0x140] ss:$8 sps:$4 sm:$0xff]   ;;  %v1267_v17 = vld [vmem:[%s1911_s1 + $0x134] ss:$8 sps:$4 sm:$0xff]  }
   0x7   :  { %702 = vmatpush1.bf16.msra.mxu0 %v1251_v6  ;;  %v1269_v18 = vld [vmem:[%s1911_s1 + $0x30] ss:$8 sps:$4 sm:$0xff]   ;;  %v1271_v20 = vld [vmem:[%s1911_s1 + $0x24] ss:$8 sps:$4 sm:$0xff]   ;;  %v1275_v22 = vld [vmem:[%s1911_s1 + $0x20] ss:$8 sps:$4 sm:$0xff]  }
   0x8   :  { %795 = vmatpush1.bf16.msra.mxu1 %v1252_v7  ;;  %703 = vmatprep.subr.bf16.mxu0 %v1253_v8  ;;  %v1270_v19 = vld [vmem:[%s1911_s1 + $0x130] ss:$8 sps:$4 sm:$0xff]   ;;  %v1273_v21 = vld [vmem:[%s1911_s1 + $0x124] ss:$8 sps:$4 sm:$0xff]   ;;  %v1276_v23 = vld [vmem:[%s1911_s1 + $0x120] ss:$8 sps:$4 sm:$0xff]  }
   0x9   :  { %796 = vmatprep.subr.bf16.mxu1 %v1255_v9  ;;  %v1277_v24 = vld [vmem:[%s1911_s1 + $0x14] ss:$8 sps:$4 sm:$0xff]   ;;  %v1281_v26 = vld [vmem:[%s1911_s1 + $0x10] ss:$8 sps:$4 sm:$0xff]   ;;  %v1283_v28 = vld [vmem:[%s1911_s1 + $0x4] ss:$8 sps:$4 sm:$0xff]  }
   0xa   :  { %v1279_v25 = vld [vmem:[%s1911_s1 + $0x114] ss:$8 sps:$4 sm:$0xff]   ;;  %v1282_v27 = vld [vmem:[%s1911_s1 + $0x110] ss:$8 sps:$4 sm:$0xff]   ;;  %v1285_v29 = vld [vmem:[%s1911_s1 + $0x104] ss:$8 sps:$4 sm:$0xff]  }
   0xb   :  { %704 = vmatpush1.bf16.msra.mxu0 %v1257_v10  ;;  %v1287_v30 = vld [vmem:[%s1911_s1] ss:$8 sps:$4 sm:$0xff]   ;;  %v1289_v32 = vld [vmem:[%s1911_s1 + $0xf4] ss:$8 sps:$4 sm:$0xff]   ;;  %v1293_v34 = vld [vmem:[%s1911_s1 + $0xf0] ss:$8 sps:$4 sm:$0xff]  }
   0xc   :  { %797 = vmatpush1.bf16.msra.mxu1 %v1258_v11  ;;  %705 = vmatprep.subr.bf16.mxu0 %v1259_v12  ;;  %v1288_v31 = vld [vmem:[%s1911_s1 + $0x100] ss:$8 sps:$4 sm:$0xff]   ;;  %v1291_v33 = vld [vmem:[%s1911_s1 + $0x1f4] ss:$8 sps:$4 sm:$0xff]   ;;  %v1294_v35 = vld [vmem:[%s1911_s1 + $0x1f0] ss:$8 sps:$4 sm:$0xff]  }
   0xd   :  { %798 = vmatprep.subr.bf16.mxu1 %v1261_v13  ;;  %v1295_v36 = vld [vmem:[%s1911_s1 + $0xe4] ss:$8 sps:$4 sm:$0xff]   ;;  %v1299_v38 = vld [vmem:[%s1911_s1 + $0xe0] ss:$8 sps:$4 sm:$0xff]   ;;  %v1301_v40 = vld [vmem:[%s1911_s1 + $0xd4] ss:$8 sps:$4 sm:$0xff]  }
   0xe   :  { %v1297_v37 = vld [vmem:[%s1911_s1 + $0x1e4] ss:$8 sps:$4 sm:$0xff]   ;;  %v1300_v39 = vld [vmem:[%s1911_s1 + $0x1e0] ss:$8 sps:$4 sm:$0xff]   ;;  %v1303_v41 = vld [vmem:[%s1911_s1 + $0x1d4] ss:$8 sps:$4 sm:$0xff]  }
   0xf   :  { %706 = vmatpush1.bf16.msra.mxu0 %v1263_v14  ;;  %v1305_v42 = vld [vmem:[%s1911_s1 + $0xd0] ss:$8 sps:$4 sm:$0xff]   ;;  %v1307_v44 = vld [vmem:[%s1911_s1 + $0xc4] ss:$8 sps:$4 sm:$0xff]   ;;  %v1311_v46 = vld [vmem:[%s1911_s1 + $0xc0] ss:$8 sps:$4 sm:$0xff]  }
  0x10   :  { %799 = vmatpush1.bf16.msra.mxu1 %v1264_v15  ;;  %707 = vmatprep.subr.bf16.mxu0 %v1265_v16  ;;  %v1306_v43 = vld [vmem:[%s1911_s1 + $0x1d0] ss:$8 sps:$4 sm:$0xff]   ;;  %v1309_v45 = vld [vmem:[%s1911_s1 + $0x1c4] ss:$8 sps:$4 sm:$0xff]   ;;  %v1312_v47 = vld [vmem:[%s1911_s1 + $0x1c0] ss:$8 sps:$4 sm:$0xff]  }
  0x11   :  { %800 = vmatprep.subr.bf16.mxu1 %v1267_v17  ;;  %v1313_v48 = vld [vmem:[%s1911_s1 + $0xb4] ss:$8 sps:$4 sm:$0xff]   ;;  %v1339_v49 = vld [vmem:[%s1912_s0 + $0x4] ss:$20 sps:$4 sm:$0xff]   ;;  %v1342_v51 = vld [vmem:[%s1912_s0 + $0xc] ss:$20 sps:$4 sm:$0xff]  }
  0x12   :  { %v1315_v50 = vld [vmem:[%s1911_s1 + $0x1b4] ss:$8 sps:$4 sm:$0xff]   ;;  %731 = vmatprep.mubr.bf16.mxu0 %v1339_v49  ;;  %v1317_v52 = vld [vmem:[%s1911_s1 + $0xb0] ss:$8 sps:$4 sm:$0xff]   ;;  %824 = vmatprep.mubr.bf16.mxu1 %v1342_v51  ;;  %v1319_v54 = vld [vmem:[%s1911_s1 + $0xa4] ss:$8 sps:$4 sm:$0xff]  }
  0x13   :  { %708 = vmatpush1.bf16.msra.mxu0 %v1269_v18  ;;  %v1318_v53 = vld [vmem:[%s1911_s1 + $0x1b0] ss:$8 sps:$4 sm:$0xff]   ;;  %v1321_v55 = vld [vmem:[%s1911_s1 + $0x1a4] ss:$8 sps:$4 sm:$0xff]   ;;  %v1323_v56 = vld [vmem:[%s1911_s1 + $0xa0] ss:$8 sps:$4 sm:$0xff]  }
  0x14   :  { %801 = vmatpush1.bf16.msra.mxu1 %v1270_v19  ;;  %709 = vmatprep.subr.bf16.mxu0 %v1271_v20  ;;  %v1324_v57 = vld [vmem:[%s1911_s1 + $0x1a0] ss:$8 sps:$4 sm:$0xff]   ;;  %v1325_v58 = vld [vmem:[%s1911_s1 + $0x94] ss:$8 sps:$4 sm:$0xff]   ;;  %v1329_v60 = vld [vmem:[%s1911_s1 + $0x90] ss:$8 sps:$4 sm:$0xff]  }
  0x15   :  { %802 = vmatprep.subr.bf16.mxu1 %v1273_v21  ;;  %v1327_v59 = vld [vmem:[%s1911_s1 + $0x194] ss:$8 sps:$4 sm:$0xff]   ;;  %v1330_v61 = vld [vmem:[%s1911_s1 + $0x190] ss:$8 sps:$4 sm:$0xff]   ;;  %v1331_v62 = vld [vmem:[%s1911_s1 + $0x84] ss:$8 sps:$4 sm:$0xff]  }
  0x16   :  { %v1333_v63 = vld [vmem:[%s1911_s1 + $0x184] ss:$8 sps:$4 sm:$0xff]   ;;  %v1335_v0 = vld [vmem:[%s1911_s1 + $0x80] ss:$8 sps:$4 sm:$0xff]   ;;  %v1345_v2 = vld [vmem:[%s1911_s1 + $0x274] ss:$8 sps:$4 sm:$0xff]  }
  0x17   :  { %710 = vmatpush1.bf16.msra.mxu0 %v1275_v22  ;;  %v1336_v1 = vld [vmem:[%s1911_s1 + $0x180] ss:$8 sps:$4 sm:$0xff]   ;;  %v1343_v5 = vld [vmem:[%s1911_s1 + $0x270] ss:$8 sps:$4 sm:$0xff]   ;;  %v1348_v6 = vld [vmem:[%s1911_s1 + $0x264] ss:$8 sps:$4 sm:$0xff]  }
  0x18   :  { %803 = vmatpush1.bf16.msra.mxu1 %v1276_v23  ;;  %711 = vmatprep.subr.bf16.mxu0 %v1277_v24  ;;  %v1337_v3 = vld [vmem:[%s1912_s0] ss:$20 sps:$4 sm:$0xff]   ;;  %v1340_v4 = vld [vmem:[%s1912_s0 + $0x8] ss:$20 sps:$4 sm:$0xff]   ;;  %v1354_v12 = vld [vmem:[%s1912_s0 + $0x30] ss:$20 sps:$4 sm:$0xff]  }
  0x19   :  { %804 = vmatprep.subr.bf16.mxu1 %v1279_v25  ;;  %v1349_v7 = vld [vmem:[%s1912_s0 + $0x2c] ss:$20 sps:$4 sm:$0xff]   ;;  %v1351_v8 = vld [vmem:[%s1912_s0 + $0x34] ss:$20 sps:$4 sm:$0xff]   ;;  %v1355_v13 = vld [vmem:[%s1911_s1 + $0x250] ss:$8 sps:$4 sm:$0xff]  }
  0x1a   :  { %v1346_v9 = vld [vmem:[%s1911_s1 + $0x260] ss:$8 sps:$4 sm:$0xff]   ;;  %v1357_v11 = vld [vmem:[%s1911_s1 + $0x254] ss:$8 sps:$4 sm:$0xff]   ;;  %v1366_v16 = vld [vmem:[%s1911_s1 + $0x244] ss:$8 sps:$4 sm:$0xff]  }
  0x1b   :  { %712 = vmatpush1.bf16.msra.mxu0 %v1281_v26  ;;  %v1353_v10 = vld [vmem:[%s1912_s0 + $0x28] ss:$20 sps:$4 sm:$0xff]   ;;  %v1362_v19 = vld [vmem:[%s1912_s0 + $0x50] ss:$20 sps:$4 sm:$0xff]   ;;  %v1363_v20 = vld [vmem:[%s1912_s0 + $0x58] ss:$20 sps:$4 sm:$0xff]  }
  0x1c   :  { %805 = vmatpush1.bf16.msra.mxu1 %v1282_v27  ;;  %713 = vmatprep.subr.bf16.mxu0 %v1283_v28  ;;  %v1358_v14 = vld [vmem:[%s1912_s0 + $0x54] ss:$20 sps:$4 sm:$0xff]   ;;  %v1360_v15 = vld [vmem:[%s1912_s0 + $0x5c] ss:$20 sps:$4 sm:$0xff]   ;;  %v1369_v22 = vld [vmem:[%s1912_s0 + $0x84] ss:$20 sps:$4 sm:$0xff]  }
  0x1d   :  { %806 = vmatprep.subr.bf16.mxu1 %v1285_v29  ;;  %v1364_v17 = vld [vmem:[%s1911_s1 + $0x240] ss:$8 sps:$4 sm:$0xff]   ;;  %v1375_v18 = vld [vmem:[%s1911_s1 + $0x234] ss:$8 sps:$4 sm:$0xff]   ;;  %v1373_v23 = vld [vmem:[%s1911_s1 + $0x230] ss:$8 sps:$4 sm:$0xff]  }
  0x1e   :  { %v1367_v21 = vld [vmem:[%s1912_s0 + $0x7c] ss:$20 sps:$4 sm:$0xff]   ;;  %v1378_v24 = vld [vmem:[%s1911_s1 + $0x224] ss:$8 sps:$4 sm:$0xff]   ;;  %v1376_v25 = vld [vmem:[%s1911_s1 + $0x220] ss:$8 sps:$4 sm:$0xff]  }
  0x1f   :  { %714 = vmatpush1.bf16.msra.mxu0 %v1287_v30  ;;  %v1387_v26 = vld [vmem:[%s1911_s1 + $0x214] ss:$8 sps:$4 sm:$0xff]   ;;  %v1371_v27 = vld [vmem:[%s1912_s0 + $0x78] ss:$20 sps:$4 sm:$0xff]  }
  0x20   :  { %807 = vmatpush1.bf16.msra.mxu1 %v1288_v31  ;;  %715 = vmatprep.subr.bf16.mxu0 %v1289_v32  ;;  %v1372_v28 = vld [vmem:[%s1912_s0 + $0x80] ss:$20 sps:$4 sm:$0xff]   ;;  %v1379_v29 = vld [vmem:[%s1912_s0 + $0xa4] ss:$20 sps:$4 sm:$0xff]  }
  0x21   :  { %808 = vmatprep.subr.bf16.mxu1 %v1291_v33  ;;  %v1381_v30 = vld [vmem:[%s1912_s0 + $0xac] ss:$20 sps:$4 sm:$0xff]   ;;  %v1385_v31 = vld [vmem:[%s1911_s1 + $0x210] ss:$8 sps:$4 sm:$0xff]  }
  0x22   :  { %v1396_v32 = vld [vmem:[%s1911_s1 + $0x204] ss:$8 sps:$4 sm:$0xff]   ;;  %v1394_v33 = vld [vmem:[%s1911_s1 + $0x200] ss:$8 sps:$4 sm:$0xff]  }
  0x23   :  { %716 = vmatpush2.bf16.msra.mxu0 %v1293_v34  ;;  %v1383_v34 = vld [vmem:[%s1912_s0 + $0xa0] ss:$20 sps:$4 sm:$0xff]  }
  0x24   :  { %809 = vmatpush2.bf16.msra.mxu1 %v1294_v35  ;;  %717 = vmatprep.subr.bf16.mxu0 %v1295_v36  ;;  %v1384_v35 = vld [vmem:[%s1912_s0 + $0xa8] ss:$20 sps:$4 sm:$0xff]   ;;  %v1388_v36 = vld [vmem:[%s1912_s0 + $0xcc] ss:$20 sps:$4 sm:$0xff]  }
  0x25   :  { %810 = vmatprep.subr.bf16.mxu1 %v1297_v37  ;;  %v1390_v37 = vld [vmem:[%s1912_s0 + $0xd4] ss:$20 sps:$4 sm:$0xff]  }
  0x27   :  { %718 = vmatpush2.bf16.msra.mxu0 %v1299_v38  ;;  %v1392_v38 = vld [vmem:[%s1912_s0 + $0xc8] ss:$20 sps:$4 sm:$0xff]  }
  0x28   :  { %811 = vmatpush2.bf16.msra.mxu1 %v1300_v39  ;;  %719 = vmatprep.subr.bf16.mxu0 %v1301_v40  ;;  %v1393_v39 = vld [vmem:[%s1912_s0 + $0xd0] ss:$20 sps:$4 sm:$0xff]   ;;  %v1403_v40 = vmov 0  }
  0x29   :  { %812 = vmatprep.subr.bf16.mxu1 %v1303_v41  ;;  %v1397_v41 = vld [vmem:[%s1912_s0 + $0x10] ss:$20 sps:$4 sm:$0xff]  }
  0x2b   :  { %720 = vmatpush2.bf16.msra.mxu0 %v1305_v42  ;;  %v1398_v42 = vld [vmem:[%s1912_s0 + $0x88] ss:$20 sps:$4 sm:$0xff]  }
  0x2c   :  { %813 = vmatpush2.bf16.msra.mxu1 %v1306_v43  ;;  %721 = vmatprep.subr.bf16.mxu0 %v1307_v44  ;;  %v1399_v43 = vld [vmem:[%s1912_s0 + $0x38] ss:$20 sps:$4 sm:$0xff]   ;;  %v1400_v44 = vld [vmem:[%s1912_s0 + $0xb0] ss:$20 sps:$4 sm:$0xff]  }
  0x2d   :  { %814 = vmatprep.subr.bf16.mxu1 %v1309_v45  ;;  %v1401_v45 = vld [vmem:[%s1912_s0 + $0x60] ss:$20 sps:$4 sm:$0xff]  }
  0x2f   :  { %722 = vmatpush2.bf16.msra.mxu0 %v1311_v46  ;;  %v1402_v46 = vld [vmem:[%s1912_s0 + $0xd8] ss:$20 sps:$4 sm:$0xff]  }
  0x30   :  { %815 = vmatpush2.bf16.msra.mxu1 %v1312_v47  ;;  %723 = vmatprep.subr.bf16.mxu0 %v1313_v48 }
  0x31   :  { %816 = vmatprep.subr.bf16.mxu1 %v1315_v50 }
  0x33   :  { %724 = vmatpush2.bf16.msra.mxu0 %v1317_v52 }
  0x34   :  { %817 = vmatpush2.bf16.msra.mxu1 %v1318_v53  ;;  %725 = vmatprep.subr.bf16.mxu0 %v1319_v54 }
  0x35   :  { %818 = vmatprep.subr.bf16.mxu1 %v1321_v55 }
  0x37   :  { %726 = vmatpush2.bf16.msra.mxu0 %v1323_v56 }
  0x38   :  { %819 = vmatpush2.bf16.msra.mxu1 %v1324_v57  ;;  %727 = vmatprep.subr.bf16.mxu0 %v1325_v58 }
  0x39   :  { %820 = vmatprep.subr.bf16.mxu1 %v1327_v59 }
  0x3b   :  { %728 = vmatpush2.bf16.msra.mxu0 %v1329_v60 }
  0x3c   :  { %821 = vmatpush2.bf16.msra.mxu1 %v1330_v61  ;;  %729 = vmatprep.subr.bf16.mxu0 %v1331_v62 }
  0x3d   :  { %822 = vmatprep.subr.bf16.mxu1 %v1333_v63 }
  0x3f   :  { %730 = vmatpush2.bf16.msra.mxu0 %v1335_v0 }
  0x40   :  { %823 = vmatpush2.bf16.msra.mxu1 %v1336_v1  ;;  %885 = vmatprep.subr.bf16.mxu0 %v1345_v2 }
  0x41   :  { %1224 = vmatprep.subr.bf16.mxu1 %v1345_v2 }
  0x42   :  { %732 = vmatmul.mubr.bf16.vlgmr.msra.gmra.mxu0 %v1337_v3 }
  0x43   :  { %825 = vmatmul.mubr.bf16.vlgmr.msra.gmra.mxu1 %v1340_v4  ;;  %886 = vmatpush1.bf16.msra.mxu0 %v1343_v5 }
  0x44   :  { %1232 = vmatpush1.bf16.msra.mxu1 %v1343_v5  ;;  %887 = vmatprep.subr.bf16.mxu0 %v1348_v6 }
  0x45   :  { %1225 = vmatprep.subr.bf16.mxu1 %v1348_v6  ;;  %741 = vmatprep.mubr.bf16.mxu0 %v1349_v7 }
  0x46   :  { %834 = vmatprep.mubr.bf16.mxu1 %v1351_v8 }
  0x47   :  { %888 = vmatpush1.bf16.msra.mxu0 %v1346_v9 }
  0x48   :  { %1233 = vmatpush1.bf16.msra.mxu1 %v1346_v9  ;;  %889 = vmatprep.subr.bf16.mxu0 %v1357_v11 }
  0x49   :  { %1226 = vmatprep.subr.bf16.mxu1 %v1357_v11  ;;  %v133_v11 = vlaneseq }
  0x4a   :  { %742 = vmatmul.mubr.bf16.gmra.mxu0 %v1353_v10 }
  0x4b   :  { %835 = vmatmul.mubr.bf16.gmra.mxu1 %v1354_v12  ;;  %890 = vmatpush1.bf16.msra.mxu0 %v1355_v13 }
  0x4c   :  { %1234 = vmatpush1.bf16.msra.mxu1 %v1355_v13  ;;  %751 = vmatprep.mubr.bf16.mxu0 %v1358_v14 }
  0x4d   :  { %844 = vmatprep.mubr.bf16.mxu1 %v1360_v15  ;;  %891 = vmatprep.subr.bf16.mxu0 %v1366_v16 }
  0x4e   :  { %1227 = vmatprep.subr.bf16.mxu1 %v1366_v16  ;;  %v134_v16 = vshrl.u32 %v133_v11, 7 }
  0x4f   :  { %892 = vmatpush1.bf16.msra.mxu0 %v1364_v17 }
  0x50   :  { %1235 = vmatpush1.bf16.msra.mxu1 %v1364_v17  ;;  %893 = vmatprep.subr.bf16.mxu0 %v1375_v18 }
  0x51   :  { %1228 = vmatprep.subr.bf16.mxu1 %v1375_v18 }
  0x52   :  { %752 = vmatmul.mubr.bf16.gmra.mxu0 %v1362_v19 }
  0x53   :  { %845 = vmatmul.mubr.bf16.gmra.mxu1 %v1363_v20  ;;  %761 = vmatprep.mubr.bf16.mxu0 %v1367_v21  ;;  %v135_v21 = vsub.s32 0, %v134_v16 }
  0x54   :  { %854 = vmatprep.mubr.bf16.mxu1 %v1369_v22  ;;  %894 = vmatpush1.bf16.msra.mxu0 %v1373_v23  ;;  %v131_v22 = vld [vmem:[%s1913_s2] sm:$0x3] }
  0x55   :  { %1236 = vmatpush1.bf16.msra.mxu1 %v1373_v23  ;;  %895 = vmatprep.subr.bf16.mxu0 %v1378_v24 }
  0x56   :  { %1229 = vmatprep.subr.bf16.mxu1 %v1378_v24 }
  0x58   :  { %896 = vmatpush1.bf16.msra.mxu0 %v1376_v25 }
  0x59   :  { %1237 = vmatpush1.bf16.msra.mxu1 %v1376_v25  ;;  %897 = vmatprep.subr.bf16.mxu0 %v1387_v26  ;;  %v139_v25 = vsub.s32 1, %v134_v16 }
  0x5a   :  { %1230 = vmatprep.subr.bf16.mxu1 %v1387_v26  ;;  %762 = vmatmul.mubr.bf16.gmra.mxu0 %v1371_v27 }
  0x5b   :  { %855 = vmatmul.mubr.bf16.gmra.mxu1 %v1372_v28  ;;  %771 = vmatprep.mubr.bf16.mxu0 %v1379_v29  ;;  %v1801_v28 = vrot.slane %v131_v22, %v135_v21 }
  0x5c   :  { %864 = vmatprep.mubr.bf16.mxu1 %v1381_v30  ;;  %898 = vmatpush1.bf16.msra.mxu0 %v1385_v31 }
  0x5d   :  { %1238 = vmatpush1.bf16.msra.mxu1 %v1385_v31  ;;  %899 = vmatprep.subr.bf16.mxu0 %v1396_v32  ;;  %v1807_v31 = vrot.slane %v131_v22, %v139_v25 }
  0x5e   :  { %1231 = vmatprep.subr.bf16.mxu1 %v1396_v32 }
  0x60   :  { %900 = vmatpush1.bf16.msra.mxu0 %v1394_v33 }
  0x61   :  { %1239 = vmatpush1.bf16.msra.mxu1 %v1394_v33 }
  0x62   :  { %772 = vmatmul.mubr.bf16.gmra.mxu0 %v1383_v34 }
  0x63   :  { %865 = vmatmul.mubr.bf16.gmra.mxu1 %v1384_v35  ;;  %781 = vmatprep.mubr.bf16.mxu0 %v1388_v36 }
  0x64   :  { %874 = vmatprep.mubr.bf16.mxu1 %v1390_v37 }
  0x6a   :  { %782 = vmatmul.mubr.bf16.gmra.mxu0 %v1392_v38 }
  0x6b   :  { %875 = vmatmul.mubr.bf16.gmra.mxu1 %v1393_v39  ;;  %917 = vmatprep.mubr.bf16.mxu0 %v1403_v40 }
  0x6c   :  { %947 = vmatprep.mubr.bf16.mxu1 %v1403_v40 }
  0x72   :  { %918 = vmatmul.mubr.bf16.vlgmr.msra.gmra.mxu0 %v1397_v41 }
  0x73   :  { %948 = vmatmul.mubr.bf16.vlgmr.msra.gmra.mxu1 %v1398_v42  ;;  %927 = vmatprep.mubr.bf16.mxu0 %v1403_v40 }
  0x74   :  { %957 = vmatprep.mubr.bf16.mxu1 %v1403_v40 }
  0x7a   :  { %928 = vmatmul.mubr.bf16.gmra.mxu0 %v1399_v43 }
  0x7b   :  { %958 = vmatmul.mubr.bf16.gmra.mxu1 %v1400_v44  ;;  %937 = vmatprep.mubr.bf16.mxu0 %v1403_v40 }
  0x7c   :  { %967 = vmatprep.mubr.bf16.mxu1 %v1403_v40 }
  0x82   :  { %938 = vmatmul.mubr.bf16.gmra.mxu0 %v1401_v45 }
  0x83   :  { %968 = vmatmul.mubr.bf16.gmra.mxu1 %v1402_v46 }
 0x102   :  { %v733_v47 = vpop.f32.mrf.mxu0 }
 0x103   :  { %v826_v48 = vpop.f32.mrf.mxu1  ;;  %v734_v34 = vadd.f32 %v733_v47, %v1801_v28 }
 0x104   :  { %v735_v49 = vpop.f32.mrf.mxu0 }
 0x105   :  { %v1754_v50 = vpop.f32.mrf.mxu1  ;;  %v736_v38 = vadd.f32 %v735_v49, %v1807_v31  ;;  %v827_v44 = vadd.f32 %v826_v48, %v734_v34 }
 0x106   :  { %v737_v51 = vpop.f32.mrf.mxu0 }
 0x107   :  { %v1756_v52 = vpop.f32.mrf.mxu1  ;;  %v738_v40 = vadd.f32 %v737_v51, %v1801_v28  ;;  %v829_v51 = vadd.f32 %v1754_v50, %v736_v38 }
 0x108   :  { %v739_v53 = vpop.f32.mrf.mxu0 }
 0x109   :  { %v1758_v54 = vpop.f32.mrf.mxu1  ;;  %v740_v41 = vadd.f32 %v739_v53, %v1807_v31  ;;  %v831_v22 = vadd.f32 %v1756_v52, %v738_v40 }
 0x10a   :  { %v743_v55 = vpop.f32.mrf.mxu0 }
 0x10b   :  { %v1760_v56 = vpop.f32.mrf.mxu1  ;;  %v744_v45 = vadd.f32 %v743_v55, %v1801_v28  ;;  %v833_v48 = vadd.f32 %v1758_v54, %v740_v41 }
 0x10c   :  { %v745_v57 = vpop.f32.mrf.mxu0 }
 0x10d   :  { %v1762_v58 = vpop.f32.mrf.mxu1  ;;  %v746_v47 = vadd.f32 %v745_v57, %v1807_v31 }
 0x10e   :  { %v747_v59 = vpop.f32.mrf.mxu0 }
 0x10f   :  { %v1764_v60 = vpop.f32.mrf.mxu1  ;;  %v839_v50 = vadd.f32 %v1762_v58, %v746_v47 }
 0x110   :  { %v749_v61 = vpop.f32.mrf.mxu0 }
 0x111   :  { %v1766_v62 = vpop.f32.mrf.mxu1  ;;  %v750_v55 = vadd.f32 %v749_v61, %v1807_v31 }
 0x112   :  { %v1768_v63 = vpop.f32.mrf.mxu0 }
 0x113   :  { %v1770_v0 = vpop.f32.mrf.mxu1  ;;  %v754_v58 = vadd.f32 %v1768_v63, %v1801_v28 }
 0x114   :  { %v1772_v1 = vpop.f32.mrf.mxu0 }
 0x115   :  { %v1774_v2 = vpop.f32.mrf.mxu1  ;;  %v756_v47 = vadd.f32 %v1772_v1, %v1807_v31 }
 0x116   :  { %v1776_v3 = vpop.f32.mrf.mxu0 }
 0x117   :  { %v1778_v4 = vpop.f32.mrf.mxu1 }
 0x118   :  { %v1780_v5 = vpop.f32.mrf.mxu0 }
 0x119   :  { %v1782_v6 = vpop.f32.mrf.mxu1 }
 0x11a   :  { %v763_v7 = vpop.f32.mrf.mxu0 }
 0x11b   :  { %v856_v8 = vpop.f32.mrf.mxu1  ;;  %v764_v35 = vadd.f32 %v763_v7, %v1801_v28  ;;  %v748_v7 = vadd.f32 %v747_v59, %v1801_v28  ;;  %v837_v59 = vadd.f32 %v1760_v56, %v744_v45 }
 0x11c   :  { %v765_v9 = vpop.f32.mrf.mxu0 }
 0x11d   :  { %v858_v10 = vpop.f32.mrf.mxu1  ;;  %v766_v39 = vadd.f32 %v765_v9, %v1807_v31  ;;  %v857_v46 = vadd.f32 %v856_v8, %v764_v35 }
 0x11e   :  { %v767_v12 = vpop.f32.mrf.mxu0 }
 0x11f   :  { %v860_v13 = vpop.f32.mrf.mxu1  ;;  %v768_v49 = vadd.f32 %v767_v12, %v1801_v28  ;;  %v859_v16 = vadd.f32 %v858_v10, %v766_v39  ;;  %v841_v10 = vadd.f32 %v1764_v60, %v748_v7 }
 0x120   :  { %v769_v14 = vpop.f32.mrf.mxu0 }
 0x121   :  { %v1784_v15 = vpop.f32.mrf.mxu1  ;;  %v770_v8 = vadd.f32 %v769_v14, %v1807_v31  ;;  %v861_v38 = vadd.f32 %v860_v13, %v768_v49 }
 0x122   :  { %v773_v17 = vpop.f32.mrf.mxu0 }
 0x123   :  { %v1786_v18 = vpop.f32.mrf.mxu1  ;;  %v774_v12 = vadd.f32 %v773_v17, %v1801_v28  ;;  %v863_v56 = vadd.f32 %v1784_v15, %v770_v8 }
 0x124   :  { %v775_v19 = vpop.f32.mrf.mxu0 }
 0x125   :  { %v1788_v20 = vpop.f32.mrf.mxu1  ;;  %v776_v52 = vadd.f32 %v775_v19, %v1807_v31  ;;  %v867_v60 = vadd.f32 %v1786_v18, %v774_v12 }
 0x126   :  { %v1793_v23 = vpop.f32.mrf.mxu0 }
 0x127   :  { %v1795_v24 = vpop.f32.mrf.mxu1  ;;  %v778_v7 = vadd.f32 %v1793_v23, %v1801_v28 }
 0x128   :  { %v1797_v26 = vpop.f32.mrf.mxu0 }
 0x129   :  { %v1799_v27 = vpop.f32.mrf.mxu1 }
 0x12a   :  { %v1803_v29 = vpop.f32.mrf.mxu0 }
 0x12b   :  { %v1805_v30 = vpop.f32.mrf.mxu1 }
 0x12c   :  { %v1809_v32 = vpop.f32.mrf.mxu0 }
 0x12d   :  { %v1811_v33 = vpop.f32.mrf.mxu1 }
 0x12e   :  { %v1815_v36 = vpop.f32.mrf.mxu0 }
 0x12f   :  { %v1817_v37 = vpop.f32.mrf.mxu1 }
 0x130   :  { %v1823_v42 = vpop.f32.mrf.mxu0 }
 0x131   :  { %v1825_v43 = vpop.f32.mrf.mxu1 }
 0x132   :  { %v919_v11 = vpop.f32.mrf.mxu0 }
 0x133   :  { %v949_v9 = vpop.f32.mrf.mxu1  ;;  %v920_v53 = vadd.f32 %v919_v11, %v827_v44  ;;  %v843_v44 = vadd.f32 %v1766_v62, %v750_v55 }
 0x134   :  { %v950_v21 = vadd.f32 %v949_v9, %v857_v46  ;;  %v921_v57 = vpop.f32.mrf.mxu0 }
 0x135   :  { %v951_v25 = vpop.f32.mrf.mxu1  ;;  %v922_v34 = vadd.f32 %v921_v57, %v829_v51  ;;  %v978_v61 = vmax.f32 %v920_v53, 0.0  ;;  %v869_v51 = vadd.f32 %v1788_v20, %v776_v52  ;;  %v847_v20 = vadd.f32 %v1770_v0, %v754_v58 }
 0x136   :  { %v952_v35 = vadd.f32 %v951_v25, %v859_v16  ;;  %v923_v54 = vpop.f32.mrf.mxu0  ;;  %v990_v40 = vmax.f32 %v950_v21, 0.0  ;;  %v780_v16 = vadd.f32 %v1797_v26, %v1807_v31  ;;  %v784_v26 = vadd.f32 %v1803_v29, %v1801_v28 }
 0x137   :  { %v953_v39 = vpop.f32.mrf.mxu1  ;;  %v979_v14 = vmax.f32 %v922_v34, 0.0  ;;  %v924_v17 = vadd.f32 %v923_v54, %v831_v22  ;;  %v871_v57 = vadd.f32 %v1795_v24, %v778_v7  ;;  %v786_v25 = vadd.f32 %v1809_v32, %v1807_v31 }
 0x138   :  { %v991_v41 = vmax.f32 %v952_v35, 0.0  ;;  %v954_v45 = vadd.f32 %v953_v39, %v861_v38  ;;  %v925_v46 = vpop.f32.mrf.mxu0  ;;  %v849_v0 = vadd.f32 %v1774_v2, %v756_v47  ;;  %v790_v58 = vadd.f32 %v1823_v42, %v1807_v31 }
 0x139   :  { %v955_v11 = vpop.f32.mrf.mxu1  ;;  %v1212_v13 = vpack.c.bf16 %v979_v14, %v978_v61  ;;  %v926_v62 = vadd.f32 %v925_v46, %v833_v48  ;;  %v980_v18 = vmax.f32 %v924_v17, 0.0  ;;  %v873_v61 = vadd.f32 %v1799_v27, %v780_v16 }
 0x13a   :  { %v1218_v19 = vpack.c.bf16 %v991_v41, %v990_v40  ;;  %v956_v49 = vadd.f32 %v955_v11, %v863_v56  ;;  %v929_v15 = vpop.f32.mrf.mxu0  ;;  %v992_v23 = vmax.f32 %v954_v45, 0.0  ;;  %v758_v40 = vadd.f32 %v1776_v3, %v1801_v28 }
 0x13b   :  { %v959_v9 = vpop.f32.mrf.mxu1  ;;  %1074 = vst [vmem:[%s1914_s3] sm:$0xff] %v1212_v13  ;;  %v930_v63 = vadd.f32 %v929_v15, %v837_v59  ;;  %v981_v53 = vmax.f32 %v926_v62, 0.0  ;;  %v877_v14 = vadd.f32 %v1805_v30, %v784_v26  ;;  %v760_v27 = vadd.f32 %v1780_v5, %v1807_v31 }
 0x13c   :  { %1080 = vst [vmem:[%s1914_s3 + $0x30] sm:$0xff] %v1218_v19  ;;  %v960_v1 = vadd.f32 %v959_v9, %v867_v60  ;;  %v993_v21 = vmax.f32 %v956_v49, 0.0  ;;  %v931_v22 = vpop.f32.mrf.mxu0  ;;  %v788_v56 = vadd.f32 %v1815_v36, %v1801_v28  ;;  %v879_v11 = vadd.f32 %v1811_v33, %v786_v25 }
 0x13d   :  { %v961_v48 = vpop.f32.mrf.mxu1  ;;  %v932_v55 = vadd.f32 %v931_v22, %v839_v50  ;;  %v1213_v59 = vpack.c.bf16 %v981_v53, %v980_v18  ;;  %v982_v38 = vmax.f32 %v930_v63, 0.0  ;;  %v851_v31 = vadd.f32 %v1778_v4, %v758_v40 }
 0x13e   :  { %v962_v8 = vadd.f32 %v961_v48, %v869_v51  ;;  %v1219_v12 = vpack.c.bf16 %v993_v21, %v992_v23  ;;  %v933_v34 = vpop.f32.mrf.mxu0  ;;  %v994_v52 = vmax.f32 %v960_v1, 0.0  ;;  %v881_v42 = vadd.f32 %v1817_v37, %v788_v56 }
 0x13f   :  { %v963_v35 = vpop.f32.mrf.mxu1  ;;  %v983_v54 = vmax.f32 %v932_v55, 0.0  ;;  %1075 = vst [vmem:[%s1914_s3 + $0x8] sm:$0xff] %v1213_v59  ;;  %v934_v24 = vadd.f32 %v933_v34, %v841_v10  ;;  %v853_v63 = vadd.f32 %v1782_v6, %v760_v27  ;;  %v883_v1 = vadd.f32 %v1825_v43, %v790_v58 }
 0x140   :  { %v995_v39 = vmax.f32 %v962_v8, 0.0  ;;  %1081 = vst [vmem:[%s1914_s3 + $0x38] sm:$0xff] %v1219_v12  ;;  %v964_v29 = vadd.f32 %v963_v35, %v871_v57  ;;  %v935_v32 = vpop.f32.mrf.mxu0 }
 0x141   :  { %v965_v50 = vpop.f32.mrf.mxu1  ;;  %v1214_v2 = vpack.c.bf16 %v983_v54, %v982_v38  ;;  %v936_v17 = vadd.f32 %v935_v32, %v843_v44  ;;  %v984_v28 = vmax.f32 %v934_v24, 0.0 }
 0x142   :  { %v1220_v41 = vpack.c.bf16 %v995_v39, %v994_v52  ;;  %v966_v45 = vadd.f32 %v965_v50, %v873_v61  ;;  %v939_v46 = vpop.f32.mrf.mxu0  ;;  %v996_v30 = vmax.f32 %v964_v29, 0.0 }
 0x143   :  { %v969_v10 = vpop.f32.mrf.mxu1  ;;  %1076 = vst [vmem:[%s1914_s3 + $0x10] sm:$0xff] %v1214_v2  ;;  %v940_v3 = vadd.f32 %v939_v46, %v847_v20  ;;  %v985_v36 = vmax.f32 %v936_v17, 0.0 }
 0x144   :  { %1082 = vst [vmem:[%s1914_s3 + $0x40] sm:$0xff] %v1220_v41  ;;  %v970_v5 = vadd.f32 %v969_v10, %v877_v14  ;;  %v997_v44 = vmax.f32 %v966_v45, 0.0  ;;  %v941_v60 = vpop.f32.mrf.mxu0 }
 0x145   :  { %v971_v13 = vpop.f32.mrf.mxu1  ;;  %v942_v33 = vadd.f32 %v941_v60, %v849_v0  ;;  %v1215_v47 = vpack.c.bf16 %v985_v36, %v984_v28  ;;  %v986_v15 = vmax.f32 %v940_v3, 0.0 }
 0x146   :  { %v972_v19 = vadd.f32 %v971_v13, %v879_v11  ;;  %v1221_v7 = vpack.c.bf16 %v997_v44, %v996_v30  ;;  %v943_v62 = vpop.f32.mrf.mxu0  ;;  %v998_v9 = vmax.f32 %v970_v5, 0.0 }
 0x147   :  { %v973_v49 = vpop.f32.mrf.mxu1  ;;  %v987_v51 = vmax.f32 %v942_v33, 0.0  ;;  %1077 = vst [vmem:[%s1914_s3 + $0x18] sm:$0xff] %v1215_v47  ;;  %v944_v4 = vadd.f32 %v943_v62, %v851_v31 }
 0x148   :  { %v999_v16 = vmax.f32 %v972_v19, 0.0  ;;  %1083 = vst [vmem:[%s1914_s3 + $0x48] sm:$0xff] %v1221_v7  ;;  %v974_v37 = vadd.f32 %v973_v49, %v881_v42  ;;  %v945_v18 = vpop.f32.mrf.mxu0 }
 0x149   :  { %v975_v23 = vpop.f32.mrf.mxu1  ;;  %v1216_v53 = vpack.c.bf16 %v987_v51, %v986_v15  ;;  %v946_v22 = vadd.f32 %v945_v18, %v853_v63  ;;  %v988_v6 = vmax.f32 %v944_v4, 0.0 }
 0x14a   :  { %v1222_v21 = vpack.c.bf16 %v999_v16, %v998_v9  ;;  %v976_v48 = vadd.f32 %v975_v23, %v883_v1  ;;  %v1000_v43 = vmax.f32 %v974_v37, 0.0 }
 0x14b   :  { %1078 = vst [vmem:[%s1914_s3 + $0x20] sm:$0xff] %v1216_v53  ;;  %v989_v20 = vmax.f32 %v946_v22, 0.0 }
 0x14c   :  { %1084 = vst [vmem:[%s1914_s3 + $0x50] sm:$0xff] %v1222_v21  ;;  %v1001_v26 = vmax.f32 %v976_v48, 0.0 }
 0x14d   :  { %v1217_v55 = vpack.c.bf16 %v989_v20, %v988_v6 }
 0x14e   :  { %v1223_v8 = vpack.c.bf16 %v1001_v26, %v1000_v43 }
 0x14f   :  { %1079 = vst [vmem:[%s1914_s3 + $0x28] sm:$0xff] %v1217_v55 }
 0x150   :  { %1085 = vst [vmem:[%s1914_s3 + $0x58] sm:$0xff] %v1223_v8 }

// kernel: _lambda_.6
= control target key start
LH: loop header
LB: loop body
LE: loop exit
PB: predicated region body
PF: predicated region fallthrough
CT: control target
= control target key end

     0   :  { %s3036_s12 = smov 0   ;;  %s3593_s0 = inlined_call_operand.vmem [shape: bf16[6,42,256], index: 0, kind: input, shape index: {}]   ;;  %s3594_s1 = inlined_call_operand.vmem [shape: bf16[9,256,128], index: 1, kind: input, shape index: {}]   ;;  %s3595_s2 = inlined_call_operand.vmem [shape: f32[1,128], index: 2, kind: input, shape index: {}]   ;;  %s3596_s3 = inlined_call_operand.vmem [shape: bf16[6,24,128], index: 3, kind: output, shape index: {}]  }
   0x1 LB: > { %s2112_s13 = sadd.s32 4294967295, %s3014_s12   ;;  %p2116_p0 = scmp.ge.s32.totalorder %s3014_s12, 1  ;;  %s3014_s12 = sphi %s3036_s12, %s13_s12  }
   0x2   : > { %p137_p1 = scmp.lt.s32.totalorder %s3014_s12, 7 }
   0x4   : > { %p138_p2 = pnand %p2116_p0, %p137_p1 }
   0x5   : > { %p161_p3 = scmp.lt.s32.totalorder (!%p138_p2), %s2112_s13, 5 }
   0x6   : > { %141 = sbr.rel (%p138_p2) target bundleno = 381 (0x17d), region = 32 }
   0xb   : > { %v2837_v0 = vld [vmem:[%s3594_s1 + $0xf8] sm:$0xff]   ;;  %v2841_v4 = vld [vmem:[%s3594_s1 + $0xf0] sm:$0xff]   ;;  %v2845_v8 = vld [vmem:[%s3594_s1 + $0xe8] sm:$0xff]   ;;  %s3598_s13 = smov (!%p161_p3, %s2112_s13), 5  ;;  %vm257_vm0 = vsmask.f32 7424 }
   0xc   : > { %v2838_v1 = vld [vmem:[%s3594_s1 + $0x78] sm:$0xff]   ;;  %2559 = vmatprep.subr.bf16.mxu0 %v2837_v0  ;;  %v2842_v5 = vld [vmem:[%s3594_s1 + $0x70] sm:$0xff]   ;;  %v2846_v9 = vld [vmem:[%s3594_s1 + $0x68] sm:$0xff]   ;;  %s2827_s16 = smul.u32 48, %s3598_s13  ;;  %vm625_vm1 = vcmask 1046528   ;;  %vm828_vm2 = vcmask 1044480  }
   0xd   : > { %v2839_v2 = vld [vmem:[%s3594_s1 + $0xb8] sm:$0xff]   ;;  %2587 = vmatprep.subr.bf16.mxu1 %v2838_v1  ;;  %v2843_v6 = vld [vmem:[%s3594_s1 + $0xb0] sm:$0xff]   ;;  %v2847_v10 = vld [vmem:[%s3594_s1 + $0xa8] sm:$0xff]   ;;  %vm1025_vm3 = vsmask.f32 4352  ;;  %vm1452_vm4 = vcmask 1045504  }
   0xe   : > { %v2840_v3 = vld [vmem:[%s3594_s1 + $0x38] sm:$0xff]   ;;  %2560 = vmatpush3.bf16.msra.mxu0 %v2839_v2  ;;  %v2844_v7 = vld [vmem:[%s3594_s1 + $0x30] sm:$0xff]   ;;  %v2848_v11 = vld [vmem:[%s3594_s1 + $0x28] sm:$0xff]   ;;  %s3144_s27 = scalar_lea.vmem %s3593_s0, %s2827_s16  ;;  %vm1649_vm5 = vsmask.f32 5376  ;;  %s2828_s16 = smul.u32 12, %s3598_s13 }
   0xf   : > { %2588 = vmatpush3.bf16.msra.mxu1 %v2840_v3  ;;  %2561 = vmatprep.subr.bf16.mxu0 %v2841_v4  ;;  %v2849_v12 = vld [vmem:[%s3594_s1 + $0xe0] sm:$0xff]   ;;  %v2853_v16 = vld [vmem:[%s3594_s1 + $0xd8] sm:$0xff]   ;;  %v2857_v20 = vld [vmem:[%s3594_s1 + $0xd0] sm:$0xff]  }
  0x10   : > { %2589 = vmatprep.subr.bf16.mxu1 %v2842_v5  ;;  %v2850_v13 = vld [vmem:[%s3594_s1 + $0x60] sm:$0xff]   ;;  %v2854_v17 = vld [vmem:[%s3594_s1 + $0x58] sm:$0xff]   ;;  %v2858_v21 = vld [vmem:[%s3594_s1 + $0x50] sm:$0xff]   ;;  %s170_s19 = scalar_lea.vmem %s3596_s3, %s2828_s16 }
  0x11   : > { %v2851_v14 = vld [vmem:[%s3594_s1 + $0xa0] sm:$0xff]   ;;  %v2855_v18 = vld [vmem:[%s3594_s1 + $0x98] sm:$0xff]   ;;  %v2859_v22 = vld [vmem:[%s3594_s1 + $0x90] sm:$0xff]  }
  0x12   : > { %2562 = vmatpush3.bf16.msra.mxu0 %v2843_v6  ;;  %v2852_v15 = vld [vmem:[%s3594_s1 + $0x20] sm:$0xff]   ;;  %v2856_v19 = vld [vmem:[%s3594_s1 + $0x18] sm:$0xff]   ;;  %v2860_v23 = vld [vmem:[%s3594_s1 + $0x10] sm:$0xff]  }
  0x13   : > { %2590 = vmatpush3.bf16.msra.mxu1 %v2844_v7  ;;  %2563 = vmatprep.subr.bf16.mxu0 %v2845_v8  ;;  %v2861_v24 = vld [vmem:[%s3594_s1 + $0xc8] sm:$0xff]   ;;  %v2865_v28 = vld [vmem:[%s3594_s1 + $0xc0] sm:$0xff]   ;;  %v3157_v34 = vld [vmem:[%s3144_s27 + $0x10] sm:$0xff] }
  0x14   : > { %2591 = vmatprep.subr.bf16.mxu1 %v2846_v9  ;;  %v2862_v25 = vld [vmem:[%s3594_s1 + $0x48] sm:$0xff]   ;;  %v2866_v29 = vld [vmem:[%s3594_s1 + $0x40] sm:$0xff]   ;;  %v207_v35 = vld [vmem:[%s3144_s27 + $0x18] sm:$0x11]  ;;  %v2172_v38 = vcombine.high %v3157_v34, %v3157_v34  ;;  %v2171_v0 = vcombine.low %v3157_v34, %v3157_v34 }
  0x15   : > { %v2863_v26 = vld [vmem:[%s3594_s1 + $0x88] sm:$0xff]   ;;  %v2867_v30 = vld [vmem:[%s3594_s1 + $0x80] sm:$0xff]   ;;  %v3165_v39 = vcombine.high %v3157_v34, %v207_v35  ;;  %v3168_v40 = vcombine.low %v3157_v34, %v207_v35  ;;  %v2873_v41 = vld [vmem:[%s3594_s1 + $0x178] sm:$0xff]  }
  0x16   : > { %2564 = vmatpush3.bf16.msra.mxu0 %v2847_v10  ;;  %v2864_v27 = vld [vmem:[%s3594_s1 + $0x8] sm:$0xff]   ;;  %v2868_v31 = vld [vmem:[%s3594_s1] sm:$0xff]   ;;  %v2874_v46 = vld [vmem:[%s3594_s1 + $0x1f8] sm:$0xff]  }
  0x17   : > { %2592 = vmatpush3.bf16.msra.mxu1 %v2848_v11  ;;  %2565 = vmatprep.subr.bf16.mxu0 %v2849_v12  ;;  %v172_v32 = vld [vmem:[%s3144_s27] sm:$0xff]  ;;  %v3154_v33 = vld [vmem:[%s3144_s27 + $0x8] sm:$0xff]  ;;  %v278_v47 = vshll.u32 %v3165_v39, 16  ;;  %v266_v48 = vshll.u32 %v3168_v40, 16  ;;  %v2875_v53 = vld [vmem:[%s3594_s1 + $0x138] sm:$0xff]   ;;  %v285_v58 = vshrl.u32 %v3165_v39, 16 }
  0x18   : > { %2593 = vmatprep.subr.bf16.mxu1 %v2850_v13  ;;  %v2152_v36 = vcombine.high %v172_v32, %v3154_v33  ;;  %v2151_v37 = vcombine.low %v172_v32, %v3154_v33  ;;  %v2876_v54 = vld [vmem:[%s3594_s1 + $0x1b8] sm:$0xff]   ;;  %v2878_v57 = vld [vmem:[%s3594_s1 + $0x1f0] sm:$0xff]   ;;  %v282_v2 = vshrl.u32 %v3168_v40, 16  ;;  %v2882_v3 = vld [vmem:[%s3594_s1 + $0x1e8] sm:$0xff]  }
  0x19   : > { %v280_v51 = vrot.slane %v278_v47, 1  ;;  %v268_v52 = vrot.slane %v266_v48, 1  ;;  %v2877_v61 = vld [vmem:[%s3594_s1 + $0x170] sm:$0xff]   ;;  %v2881_v4 = vld [vmem:[%s3594_s1 + $0x168] sm:$0xff]   ;;  %v2886_v8 = vld [vmem:[%s3594_s1 + $0x1e0] sm:$0xff]  }
  0x1a   : > { %2566 = vmatpush3.bf16.msra.mxu0 %v2851_v14  ;;  %v271_v42 = vshrl.u32 %v2152_v36, 16  ;;  %v273_v43 = vshll.u32 %v2152_v36, 16  ;;  %570 = vmatprep.mubr.bf16.mxu1 %v2152_v36  ;;  %v259_v44 = vshrl.u32 %v2151_v37, 16  ;;  %v261_v45 = vshll.u32 %v2151_v37, 16  ;;  %v2880_v62 = vld [vmem:[%s3594_s1 + $0x1b0] sm:$0xff]   ;;  %v2884_v5 = vld [vmem:[%s3594_s1 + $0x1a8] sm:$0xff]  }
  0x1b   : > { %2594 = vmatpush3.bf16.msra.mxu1 %v2852_v15  ;;  %2567 = vmatprep.subr.bf16.mxu0 %v2853_v16  ;;  %v287_v63 = vor.u32 %v285_v58, %v280_v51  ;;  %v2879_v1 = vld [vmem:[%s3594_s1 + $0x130] sm:$0xff]   ;;  %v2883_v6 = vld [vmem:[%s3594_s1 + $0x128] sm:$0xff]   ;;  %v284_v7 = vor.u32 %v282_v2, %v268_v52  ;;  %v2885_v9 = vld [vmem:[%s3594_s1 + $0x160] sm:$0xff]  }
  0x1c   : > { %2595 = vmatprep.subr.bf16.mxu1 %v2854_v17  ;;  %v275_v49 = vrot.slane %v273_v43, 1  ;;  %v263_v50 = vrot.slane %v261_v45, 1  ;;  %v2888_v10 = vld [vmem:[%s3594_s1 + $0x1a0] sm:$0xff]   ;;  %v2890_v12 = vld [vmem:[%s3594_s1 + $0x1d8] sm:$0xff]   ;;  %v2894_v16 = vld [vmem:[%s3594_s1 + $0x1d0] sm:$0xff]  }
  0x1d   : > { %v2887_v11 = vld [vmem:[%s3594_s1 + $0x120] sm:$0xff]   ;;  %v2889_v13 = vld [vmem:[%s3594_s1 + $0x158] sm:$0xff]   ;;  %v2893_v17 = vld [vmem:[%s3594_s1 + $0x150] sm:$0xff]  }
  0x1e   : > { %2568 = vmatpush3.bf16.msra.mxu0 %v2855_v18  ;;  %v276_v55 = vor.u32 %v275_v49, %v271_v42  ;;  %v264_v56 = vor.u32 %v263_v50, %v259_v44  ;;  %v2892_v14 = vld [vmem:[%s3594_s1 + $0x198] sm:$0xff]   ;;  %v2896_v18 = vld [vmem:[%s3594_s1 + $0x190] sm:$0xff]   ;;  %v2927_v2 = vld [vmem:[%s3594_s1 + $0x220] sm:$0xff]  }
  0x1f   : > { %2596 = vmatpush3.bf16.msra.mxu1 %v2856_v19  ;;  %2569 = vmatprep.subr.bf16.mxu0 %v2857_v20  ;;  %v2891_v15 = vld [vmem:[%s3594_s1 + $0x118] sm:$0xff]   ;;  %v2895_v19 = vld [vmem:[%s3594_s1 + $0x110] sm:$0xff]   ;;  %v2900_v20 = vld [vmem:[%s3594_s1 + $0x1c8] sm:$0xff]  }
  0x20   : > { %2597 = vmatprep.subr.bf16.mxu1 %v2858_v21  ;;  %v281_v59 = vsel %vm257_vm0, %v276_v55, %v280_v51  ;;  %v269_v60 = vsel %vm257_vm0, %v264_v56, %v268_v52  ;;  %v2899_v21 = vld [vmem:[%s3594_s1 + $0x148] sm:$0xff]   ;;  %v784_v32 = vld [vmem:[%s3144_s27 + $0x18] sm:$0x77]  ;;  %v2917_v55 = vld [vmem:[%s3594_s1 + $0x270] sm:$0xff]  }
  0x21   : > { %420 = vmatprep.mubr.bf16.mxu0 %v281_v59  ;;  %v2914_v47 = vld [vmem:[%s3594_s1 + $0x2f8] sm:$0xff]   ;;  %v2918_v56 = vld [vmem:[%s3594_s1 + $0x2f0] sm:$0xff]   ;;  %v2921_v59 = vld [vmem:[%s3594_s1 + $0x268] sm:$0xff]  }
  0x22   : > { %2570 = vmatpush3.bf16.msra.mxu0 %v2859_v22  ;;  %v2902_v22 = vld [vmem:[%s3594_s1 + $0x188] sm:$0xff]   ;;  %v2916_v51 = vld [vmem:[%s3594_s1 + $0x2b8] sm:$0xff]   ;;  %v2920_v58 = vld [vmem:[%s3594_s1 + $0x2b0] sm:$0xff]  }
  0x23   : > { %2598 = vmatpush3.bf16.msra.mxu1 %v2860_v23  ;;  %2571 = vmatprep.subr.bf16.mxu0 %v2861_v24  ;;  %v2901_v23 = vld [vmem:[%s3594_s1 + $0x108] sm:$0xff]   ;;  %v2904_v24 = vld [vmem:[%s3594_s1 + $0x1c0] sm:$0xff]  }
  0x24   : > { %2599 = vmatprep.subr.bf16.mxu1 %v2862_v25  ;;  %v2903_v25 = vld [vmem:[%s3594_s1 + $0x140] sm:$0xff]  }
  0x26   : > { %2572 = vmatpush3.bf16.msra.mxu0 %v2863_v26  ;;  %v2906_v26 = vld [vmem:[%s3594_s1 + $0x180] sm:$0xff]  }
  0x27   : > { %2600 = vmatpush3.bf16.msra.mxu1 %v2864_v27  ;;  %2573 = vmatprep.subr.bf16.mxu0 %v2865_v28  ;;  %v586_v27 = vld [vmem:[%s3144_s27] sm:$0xee]  ;;  %v630_v28 = vrot.slane %v3165_v39, 1  ;;  %v2274_v39 = vcombine.high %v3157_v34, %v784_v32 }
  0x28   : > { %2601 = vmatprep.subr.bf16.mxu1 %v2866_v29  ;;  %v783_v29 = vld [vmem:[%s3144_s27] sm:$0x88] }
  0x29   : > { %v3278_v35 = vcombine.low %v783_v29, %v3154_v33  ;;  %v3281_v36 = vcombine.high %v783_v29, %v3154_v33  ;;  %v833_v49 = vrot.slane %v2274_v39, 3  ;;  %v2949_v29 = vld [vmem:[%s3594_s1 + $0x378] sm:$0xff]  }
  0x2a   : > { %2574 = vmatpush3.bf16.msra.mxu0 %v2867_v30  ;;  %v2221_v30 = vcombine.low %v586_v27, %v3154_v33 }
  0x2b   : > { %2602 = vmatpush3.bf16.msra.mxu1 %v2868_v31  ;;  %2615 = vmatprep.subr.bf16.mxu0 %v2873_v41  ;;  %v2222_v31 = vcombine.high %v586_v27, %v3154_v33  ;;  %v627_v41 = vrot.slane %v3168_v40, 1  ;;  %v832_v44 = vrot.slane %v3281_v36, 3  ;;  %v829_v45 = vrot.slane %v3278_v35, 3  ;;  %v2915_v40 = vld [vmem:[%s3594_s1 + $0x238] sm:$0xff]  }
  0x2c   : > { %2643 = vmatprep.subr.bf16.mxu1 %v2874_v46  ;;  %v626_v42 = vrot.slane %v2221_v30, 1  ;;  %v2913_v46 = vld [vmem:[%s3594_s1 + $0x278] sm:$0xff]  }
  0x2d   : > { %421 = vmatmul.mubr.bf16.vlgmr.msra.gmra.mxu0 %v269_v60  ;;  %v629_v43 = vrot.slane %v2222_v31, 1  ;;  %v834_v52 = vsel %vm828_vm2, %v832_v44, %v833_v49  ;;  %v2922_v60 = vld [vmem:[%s3594_s1 + $0x2e8] sm:$0xff]  }
  0x2e   : > { %571 = vmatmul.mubr.bf16.vlgmr.msra.gmra.mxu1 %v2151_v37  ;;  %2616 = vmatpush3.bf16.msra.mxu0 %v2875_v53  ;;  %v2905_v37 = vld [vmem:[%s3594_s1 + $0x100] sm:$0xff]   ;;  %v628_v53 = vsel %vm625_vm1, %v626_v42, %v627_v41  ;;  %v2952_v42 = vld [vmem:[%s3594_s1 + $0x3b8] sm:$0xff]  }
  0x2f   : > { %578 = vmatprep.mubr.bf16.mxu1 %v2172_v38  ;;  %2644 = vmatpush3.bf16.msra.mxu1 %v2876_v54  ;;  %v2273_v38 = vcombine.low %v3157_v34, %v784_v32  ;;  %v631_v50 = vsel %vm625_vm1, %v629_v43, %v630_v28  ;;  %v2373_v32 = vcombine.low %v3154_v33, %v3157_v34 }
  0x30   : > { %2645 = vmatprep.subr.bf16.mxu1 %v2878_v57  ;;  %2617 = vmatprep.subr.bf16.mxu0 %v2877_v61  ;;  %v2919_v57 = vld [vmem:[%s3594_s1 + $0x230] sm:$0xff]   ;;  %v2923_v61 = vld [vmem:[%s3594_s1 + $0x228] sm:$0xff]  }
  0x31   : > { %428 = vmatprep.mubr.bf16.mxu0 %v287_v63  ;;  %v830_v48 = vrot.slane %v2273_v38, 3  ;;  %v2925_v63 = vld [vmem:[%s3594_s1 + $0x260] sm:$0xff]  }
  0x32   : > { %2618 = vmatpush3.bf16.msra.mxu0 %v2879_v1  ;;  %v2374_v1 = vcombine.high %v3154_v33, %v3157_v34 }
  0x33   : > { %2646 = vmatpush3.bf16.msra.mxu1 %v2880_v62  ;;  %2619 = vmatprep.subr.bf16.mxu0 %v2881_v4  ;;  %v831_v54 = vsel %vm828_vm2, %v829_v45, %v830_v48  ;;  %v2924_v62 = vld [vmem:[%s3594_s1 + $0x2a8] sm:$0xff]   ;;  %v2929_v4 = vld [vmem:[%s3594_s1 + $0x258] sm:$0xff]  }
  0x34   : > { %2647 = vmatprep.subr.bf16.mxu1 %v2882_v3  ;;  %v2928_v3 = vld [vmem:[%s3594_s1 + $0x2a0] sm:$0xff]  }
  0x35   : > { %429 = vmatmul.mubr.bf16.gmra.mxu0 %v284_v7  ;;  %v2932_v7 = vld [vmem:[%s3594_s1 + $0x298] sm:$0xff]  }
  0x36   : > { %579 = vmatmul.mubr.bf16.gmra.mxu1 %v2171_v0  ;;  %2620 = vmatpush3.bf16.msra.mxu0 %v2883_v6  ;;  %v2926_v0 = vld [vmem:[%s3594_s1 + $0x2e0] sm:$0xff]   ;;  %v2931_v6 = vld [vmem:[%s3594_s1 + $0x218] sm:$0xff]  }
  0x37   : > { %2648 = vmatpush3.bf16.msra.mxu1 %v2884_v5  ;;  %2621 = vmatprep.subr.bf16.mxu0 %v2885_v9  ;;  %v2930_v5 = vld [vmem:[%s3594_s1 + $0x2d8] sm:$0xff]   ;;  %v2934_v9 = vld [vmem:[%s3594_s1 + $0x2d0] sm:$0xff]  }
  0x38   : > { %2649 = vmatprep.subr.bf16.mxu1 %v2886_v8  ;;  %764 = vmatprep.mubr.bf16.mxu0 %v631_v50  ;;  %v2933_v8 = vld [vmem:[%s3594_s1 + $0x250] sm:$0xff]  }
  0x39   : > { %967 = vmatprep.mubr.bf16.mxu1 %v834_v52  ;;  %v2954_v50 = vld [vmem:[%s3594_s1 + $0x3f0] sm:$0xff]  }
  0x3a   : > { %2622 = vmatpush3.bf16.msra.mxu0 %v2887_v11  ;;  %v2936_v11 = vld [vmem:[%s3594_s1 + $0x290] sm:$0xff]  }
  0x3b   : > { %2650 = vmatpush3.bf16.msra.mxu1 %v2888_v10  ;;  %2623 = vmatprep.subr.bf16.mxu0 %v2889_v13  ;;  %v2935_v10 = vld [vmem:[%s3594_s1 + $0x210] sm:$0xff]   ;;  %v1044_v13 = vshrl.u32 %v3281_v36, 16 }
  0x3c   : > { %2651 = vmatprep.subr.bf16.mxu1 %v2890_v12  ;;  %v2937_v12 = vld [vmem:[%s3594_s1 + $0x248] sm:$0xff]  }
  0x3e   : > { %2624 = vmatpush3.bf16.msra.mxu0 %v2891_v15  ;;  %v1047_v15 = vshll.u32 %v3281_v36, 16 }
  0x3f   : > { %2652 = vmatpush3.bf16.msra.mxu1 %v2892_v14  ;;  %2625 = vmatprep.subr.bf16.mxu0 %v2893_v17  ;;  %v2938_v14 = vld [vmem:[%s3594_s1 + $0x2c8] sm:$0xff]   ;;  %v1027_v17 = vshrl.u32 %v3278_v35, 16 }
  0x40   : > { %2653 = vmatprep.subr.bf16.mxu1 %v2894_v16  ;;  %v2939_v16 = vld [vmem:[%s3594_s1 + $0x208] sm:$0xff]  }
  0x42   : > { %2626 = vmatpush3.bf16.msra.mxu0 %v2895_v19  ;;  %v1030_v19 = vshll.u32 %v3278_v35, 16  ;;  %v2950_v35 = vld [vmem:[%s3594_s1 + $0x3f8] sm:$0xff]  }
  0x43   : > { %2654 = vmatpush3.bf16.msra.mxu1 %v2896_v18  ;;  %2627 = vmatprep.subr.bf16.mxu0 %v2899_v21  ;;  %v2940_v18 = vld [vmem:[%s3594_s1 + $0x288] sm:$0xff]   ;;  %v1046_v21 = vrot.slane %v1044_v13, 3  ;;  %v2980_v13 = vld [vmem:[%s3594_s1 + $0x3c0] sm:$0xff]  }
  0x44   : > { %2655 = vmatprep.subr.bf16.mxu1 %v2900_v20  ;;  %v2941_v20 = vld [vmem:[%s3594_s1 + $0x240] sm:$0xff]   ;;  %v1032_v27 = vrot.slane %v1030_v19, 4 }
  0x46   : > { %2628 = vmatpush3.bf16.msra.mxu0 %v2901_v23  ;;  %v1049_v23 = vrot.slane %v1047_v15, 4  ;;  %v2982_v15 = vld [vmem:[%s3594_s1 + $0x380] sm:$0xff]  }
  0x47   : > { %2656 = vmatpush3.bf16.msra.mxu1 %v2902_v22  ;;  %2629 = vmatprep.subr.bf16.mxu0 %v2903_v25  ;;  %v2942_v22 = vld [vmem:[%s3594_s1 + $0x2c0] sm:$0xff]   ;;  %v1029_v25 = vrot.slane %v1027_v17, 3 }
  0x48   : > { %2657 = vmatprep.subr.bf16.mxu1 %v2904_v24  ;;  %v2943_v24 = vld [vmem:[%s3594_s1 + $0x200] sm:$0xff]   ;;  %v1050_v43 = vor.u32 %v1049_v23, %v1046_v21 }
  0x49   : > { %v1033_v44 = vor.u32 %v1032_v27, %v1029_v25  ;;  %v1402_v17 = vld [vmem:[%s3144_s27 + $0x20] sm:$0x33] }
  0x4a   : > { %2630 = vmatpush3.bf16.msra.mxu0 %v2905_v37  ;;  %v2981_v23 = vld [vmem:[%s3594_s1 + $0x300] sm:$0xff]  }
  0x4b   : > { %2658 = vmatpush3.bf16.msra.mxu1 %v2906_v26  ;;  %2671 = vmatprep.subr.bf16.mxu0 %v2913_v46  ;;  %v2944_v26 = vld [vmem:[%s3594_s1 + $0x280] sm:$0xff]  }
  0x4c   : > { %2699 = vmatprep.subr.bf16.mxu1 %v2914_v47 }
  0x4d   : > { %765 = vmatmul.mubr.bf16.vlgmr.msra.gmra.mxu0 %v628_v53 }
  0x4e   : > { %968 = vmatmul.mubr.bf16.vlgmr.msra.gmra.mxu1 %v831_v54  ;;  %2672 = vmatpush3.bf16.msra.mxu0 %v2915_v40  ;;  %v2956_v54 = vld [vmem:[%s3594_s1 + $0x3b0] sm:$0xff]  }
  0x4f   : > { %2700 = vmatpush3.bf16.msra.mxu1 %v2916_v51  ;;  %2673 = vmatprep.subr.bf16.mxu0 %v2917_v55  ;;  %v2953_v51 = vld [vmem:[%s3594_s1 + $0x370] sm:$0xff]  }
  0x50   : > { %2701 = vmatprep.subr.bf16.mxu1 %v2918_v56  ;;  %772 = vmatprep.mubr.bf16.mxu0 %v630_v28  ;;  %v3398_v28 = vld [vmem:[%s3144_s27 + $0x18] sm:$0xff]  ;;  %v2955_v55 = vld [vmem:[%s3594_s1 + $0x330] sm:$0xff]  }
  0x51   : > { %975 = vmatprep.mubr.bf16.mxu1 %v833_v49  ;;  %v2324_v30 = vcombine.high %v3157_v34, %v3398_v28  ;;  %v2323_v31 = vcombine.low %v3157_v34, %v3398_v28  ;;  %v2376_v36 = vcombine.high %v3398_v28, %v3398_v28  ;;  %v2375_v56 = vcombine.low %v3398_v28, %v3398_v28 }
  0x52   : > { %2674 = vmatpush3.bf16.msra.mxu0 %v2919_v57  ;;  %v2958_v57 = vld [vmem:[%s3594_s1 + $0x3e8] sm:$0xff]   ;;  %v2428_v21 = vcombine.high %v3398_v28, %v1402_v17 }
  0x53   : > { %2702 = vmatpush3.bf16.msra.mxu1 %v2920_v58  ;;  %2675 = vmatprep.subr.bf16.mxu0 %v2921_v59  ;;  %v1052_v37 = vshrl.u32 %v2324_v30, 16  ;;  %v1055_v38 = vshll.u32 %v2324_v30, 16  ;;  %v1035_v39 = vshrl.u32 %v2323_v31, 16  ;;  %v2957_v58 = vld [vmem:[%s3594_s1 + $0x368] sm:$0xff]  }
  0x54   : > { %2703 = vmatprep.subr.bf16.mxu1 %v2922_v60  ;;  %v2961_v59 = vld [vmem:[%s3594_s1 + $0x3a8] sm:$0xff]  }
  0x55   : > { %773 = vmatmul.mubr.bf16.gmra.mxu0 %v627_v41  ;;  %v1038_v41 = vshll.u32 %v2323_v31, 16  ;;  %v1054_v33 = vrot.slane %v1052_v37, 3  ;;  %v1057_v45 = vrot.slane %v1055_v38, 4  ;;  %v1037_v46 = vrot.slane %v1035_v39, 3  ;;  %v2960_v60 = vld [vmem:[%s3594_s1 + $0x328] sm:$0xff]  }
  0x56   : > { %976 = vmatmul.mubr.bf16.gmra.mxu1 %v830_v48  ;;  %2676 = vmatpush3.bf16.msra.mxu0 %v2923_v61  ;;  %v2951_v48 = vld [vmem:[%s3594_s1 + $0x338] sm:$0xff]   ;;  %v2964_v61 = vld [vmem:[%s3594_s1 + $0x3e0] sm:$0xff]  }
  0x57   : > { %2704 = vmatpush3.bf16.msra.mxu1 %v2924_v62  ;;  %2677 = vmatprep.subr.bf16.mxu0 %v2925_v63  ;;  %v1040_v47 = vrot.slane %v1038_v41, 4  ;;  %v1058_v49 = vor.u32 %v1057_v45, %v1054_v33  ;;  %v2963_v62 = vld [vmem:[%s3594_s1 + $0x360] sm:$0xff]   ;;  %v2990_v33 = vld [vmem:[%s3594_s1 + $0x438] sm:$0xff]  }
  0x58   : > { %2705 = vmatprep.subr.bf16.mxu1 %v2926_v0  ;;  %1380 = vmatprep.mubr.bf16.mxu1 %v2374_v1  ;;  %v2966_v63 = vld [vmem:[%s3594_s1 + $0x3a0] sm:$0xff]   ;;  %v2968_v1 = vld [vmem:[%s3594_s1 + $0x3d8] sm:$0xff]  }
  0x59   : > { %v1041_v40 = vor.u32 %v1040_v47, %v1037_v46  ;;  %v1059_v52 = vsel %vm1025_vm3, %v1050_v43, %v1058_v49  ;;  %v2965_v0 = vld [vmem:[%s3594_s1 + $0x320] sm:$0xff]  }
  0x5a   : > { %2678 = vmatpush3.bf16.msra.mxu0 %v2927_v2  ;;  %1192 = vmatprep.mubr.bf16.mxu0 %v1059_v52  ;;  %v2967_v2 = vld [vmem:[%s3594_s1 + $0x358] sm:$0xff]  }
  0x5b   : > { %2706 = vmatpush3.bf16.msra.mxu1 %v2928_v3  ;;  %2679 = vmatprep.subr.bf16.mxu0 %v2929_v4  ;;  %v1042_v53 = vsel %vm1025_vm3, %v1033_v44, %v1041_v40  ;;  %v2970_v3 = vld [vmem:[%s3594_s1 + $0x398] sm:$0xff]  }
  0x5c   : > { %2707 = vmatprep.subr.bf16.mxu1 %v2930_v5  ;;  %v2969_v4 = vld [vmem:[%s3594_s1 + $0x318] sm:$0xff]   ;;  %v2972_v5 = vld [vmem:[%s3594_s1 + $0x3d0] sm:$0xff]  }
  0x5e   : > { %2680 = vmatpush3.bf16.msra.mxu0 %v2931_v6  ;;  %v2971_v6 = vld [vmem:[%s3594_s1 + $0x350] sm:$0xff]  }
  0x5f   : > { %2708 = vmatpush3.bf16.msra.mxu1 %v2932_v7  ;;  %2681 = vmatprep.subr.bf16.mxu0 %v2933_v8  ;;  %v2974_v7 = vld [vmem:[%s3594_s1 + $0x390] sm:$0xff]  }
  0x60   : > { %2709 = vmatprep.subr.bf16.mxu1 %v2934_v9  ;;  %v2973_v8 = vld [vmem:[%s3594_s1 + $0x310] sm:$0xff]   ;;  %v2976_v9 = vld [vmem:[%s3594_s1 + $0x3c8] sm:$0xff]  }
  0x62   : > { %2682 = vmatpush3.bf16.msra.mxu0 %v2935_v10  ;;  %v2975_v10 = vld [vmem:[%s3594_s1 + $0x348] sm:$0xff]  }
  0x63   : > { %2710 = vmatpush3.bf16.msra.mxu1 %v2936_v11  ;;  %2683 = vmatprep.subr.bf16.mxu0 %v2937_v12  ;;  %v2978_v11 = vld [vmem:[%s3594_s1 + $0x388] sm:$0xff]  }
  0x64   : > { %2711 = vmatprep.subr.bf16.mxu1 %v2938_v14  ;;  %v2977_v12 = vld [vmem:[%s3594_s1 + $0x308] sm:$0xff]   ;;  %v2979_v14 = vld [vmem:[%s3594_s1 + $0x340] sm:$0xff]  }
  0x66   : > { %2684 = vmatpush3.bf16.msra.mxu0 %v2939_v16  ;;  %v1399_v16 = vld [vmem:[%s3144_s27 + $0x8] sm:$0xcc] }
  0x67   : > { %2712 = vmatpush3.bf16.msra.mxu1 %v2940_v18  ;;  %2685 = vmatprep.subr.bf16.mxu0 %v2941_v20  ;;  %v2425_v18 = vcombine.low %v1399_v16, %v3157_v34  ;;  %v2426_v19 = vcombine.high %v1399_v16, %v3157_v34  ;;  %v2427_v20 = vcombine.low %v3398_v28, %v1402_v17  ;;  %v2989_v34 = vld [vmem:[%s3594_s1 + $0x478] sm:$0xff]  }
  0x68   : > { %2713 = vmatprep.subr.bf16.mxu1 %v2942_v22  ;;  %v1610_v22 = vld [vmem:[%s3144_s27 + $0x20] sm:$0x77] }
  0x69   : > { %v3519_v25 = vcombine.high %v3398_v28, %v1610_v22  ;;  %v1456_v27 = vrot.slane %v2426_v19, 2  ;;  %v1668_v30 = vshrl.u32 %v2426_v19, 16  ;;  %v1671_v31 = vshll.u32 %v2426_v19, 16 }
  0x6a   : > { %2686 = vmatpush3.bf16.msra.mxu0 %v2943_v24  ;;  %v3516_v24 = vcombine.low %v3398_v28, %v1610_v22  ;;  %v1651_v38 = vshrl.u32 %v2425_v18, 16  ;;  %v1654_v39 = vshll.u32 %v2425_v18, 16 }
  0x6b   : > { %2714 = vmatpush3.bf16.msra.mxu1 %v2944_v26  ;;  %2727 = vmatprep.subr.bf16.mxu0 %v2949_v29  ;;  %v1454_v26 = vrot.slane %v2427_v20, 2  ;;  %v1457_v29 = vrot.slane %v2428_v21, 2  ;;  %v1670_v37 = vrot.slane %v1668_v30, 2  ;;  %v1673_v41 = vrot.slane %v1671_v31, 3 }
  0x6c   : > { %2755 = vmatprep.subr.bf16.mxu1 %v2950_v35  ;;  %v1679_v35 = vshll.u32 %v3519_v25, 16  ;;  %v1653_v45 = vrot.slane %v1651_v38, 2  ;;  %v1656_v46 = vrot.slane %v1654_v39, 3  ;;  %v1659_v47 = vshrl.u32 %v3516_v24, 16 }
  0x6d   : > { %1193 = vmatmul.mubr.bf16.vlgmr.msra.gmra.mxu0 %v1042_v53  ;;  %v1458_v28 = vsel %vm1452_vm4, %v1456_v27, %v1457_v29 }
  0x6e   : > { %1381 = vmatmul.mubr.bf16.vlgmr.msra.gmra.mxu1 %v2373_v32  ;;  %2728 = vmatpush3.bf16.msra.mxu0 %v2951_v48  ;;  %v1676_v32 = vshrl.u32 %v3519_v25, 16  ;;  %v1681_v43 = vrot.slane %v1679_v35, 3  ;;  %v1662_v48 = vshll.u32 %v3516_v24, 16  ;;  %v1661_v52 = vrot.slane %v1659_v47, 2 }
  0x6f   : > { %2756 = vmatpush3.bf16.msra.mxu1 %v2952_v42  ;;  %1388 = vmatprep.mubr.bf16.mxu1 %v2376_v36  ;;  %v1453_v36 = vrot.slane %v2425_v18, 2 }
  0x70   : > { %2757 = vmatprep.subr.bf16.mxu1 %v2954_v50  ;;  %1200 = vmatprep.mubr.bf16.mxu0 %v1058_v49  ;;  %v1678_v42 = vrot.slane %v1676_v32, 2  ;;  %v1674_v49 = vor.u32 %v1673_v41, %v1670_v37  ;;  %v2991_v50 = vld [vmem:[%s3594_s1 + $0x470] sm:$0xff]   ;;  %v1664_v53 = vrot.slane %v1662_v48, 3 }
  0x71   : > { %2729 = vmatprep.subr.bf16.mxu0 %v2953_v51  ;;  %v1455_v44 = vsel %vm1452_vm4, %v1453_v36, %v1454_v26  ;;  %v1657_v51 = vor.u32 %v1656_v46, %v1653_v45 }
  0x72   : > { %2730 = vmatpush3.bf16.msra.mxu0 %v2955_v55  ;;  %v1665_v55 = vor.u32 %v1664_v53, %v1661_v52 }
  0x73   : > { %2758 = vmatpush3.bf16.msra.mxu1 %v2956_v54  ;;  %2731 = vmatprep.subr.bf16.mxu0 %v2957_v58 }
  0x74   : > { %2759 = vmatprep.subr.bf16.mxu1 %v2958_v57  ;;  %v2993_v57 = vld [vmem:[%s3594_s1 + $0x468] sm:$0xff]   ;;  %v1666_v58 = vsel %vm1649_vm5, %v1657_v51, %v1665_v55 }
  0x75   : > { %1201 = vmatmul.mubr.bf16.gmra.mxu0 %v1041_v40  ;;  %v1682_v40 = vor.u32 %v1681_v43, %v1678_v42 }
  0x76   : > { %1389 = vmatmul.mubr.bf16.gmra.mxu1 %v2375_v56  ;;  %2732 = vmatpush3.bf16.msra.mxu0 %v2960_v60  ;;  %v2992_v56 = vld [vmem:[%s3594_s1 + $0x430] sm:$0xff]   ;;  %v2995_v60 = vld [vmem:[%s3594_s1 + $0x460] sm:$0xff]  }
  0x77   : > { %2760 = vmatpush3.bf16.msra.mxu1 %v2961_v59  ;;  %2733 = vmatprep.subr.bf16.mxu0 %v2963_v62  ;;  %v1683_v54 = vsel %vm1649_vm5, %v1674_v49, %v1682_v40  ;;  %v2994_v59 = vld [vmem:[%s3594_s1 + $0x428] sm:$0xff]   ;;  %v2997_v62 = vld [vmem:[%s3594_s1 + $0x458] sm:$0xff]  }
  0x78   : > { %2761 = vmatprep.subr.bf16.mxu1 %v2964_v61  ;;  %1591 = vmatprep.mubr.bf16.mxu0 %v1458_v28  ;;  %v2996_v61 = vld [vmem:[%s3594_s1 + $0x420] sm:$0xff]  }
  0x79   : > { %1816 = vmatprep.mubr.bf16.mxu1 %v1683_v54 }
  0x7a   : > { %2734 = vmatpush3.bf16.msra.mxu0 %v2965_v0  ;;  %v3007_v0 = vld [vmem:[%s3144_s27 + $0x10] sm:$0xff] }
  0x7b   : > { %2762 = vmatpush3.bf16.msra.mxu1 %v2966_v63  ;;  %2735 = vmatprep.subr.bf16.mxu0 %v2967_v2  ;;  %v1835_v63 = vld [vmem:[%s3144_s27 + $0x8] sm:$0x88]  ;;  %v1878_v2 = vrot.slane %v3519_v25, 3 }
  0x7c   : > { %2763 = vmatprep.subr.bf16.mxu1 %v2968_v1  ;;  %v2528_v1 = vcombine.high %v1835_v63, %v3007_v0 }
  0x7e   : > { %2736 = vmatpush3.bf16.msra.mxu0 %v2969_v4  ;;  %v1877_v4 = vrot.slane %v2528_v1, 3 }
  0x7f   : > { %2764 = vmatpush3.bf16.msra.mxu1 %v2970_v3  ;;  %2737 = vmatprep.subr.bf16.mxu0 %v2971_v6  ;;  %v2998_v3 = vld [vmem:[%s3594_s1 + $0x418] sm:$0xff]  }
  0x80   : > { %2765 = vmatprep.subr.bf16.mxu1 %v2972_v5  ;;  %v2999_v5 = vld [vmem:[%s3594_s1 + $0x450] sm:$0xff]   ;;  %v1879_v6 = vsel %vm828_vm2, %v1877_v4, %v1878_v2 }
  0x82   : > { %2738 = vmatpush3.bf16.msra.mxu0 %v2973_v8  ;;  %v3001_v8 = vld [vmem:[%s3594_s1 + $0x448] sm:$0xff]  }
  0x83   : > { %2766 = vmatpush3.bf16.msra.mxu1 %v2974_v7  ;;  %2739 = vmatprep.subr.bf16.mxu0 %v2975_v10  ;;  %v3000_v7 = vld [vmem:[%s3594_s1 + $0x410] sm:$0xff]   ;;  %v2527_v10 = vcombine.low %v1835_v63, %v3007_v0 }
  0x84   : > { %2767 = vmatprep.subr.bf16.mxu1 %v2976_v9  ;;  %v3002_v9 = vld [vmem:[%s3594_s1 + $0x408] sm:$0xff]  }
  0x86   : > { %2740 = vmatpush3.bf16.msra.mxu0 %v2977_v12  ;;  %v3004_v12 = vld [vmem:[%s3594_s1 + $0x400] sm:$0xff]  }
  0x87   : > { %2768 = vmatpush3.bf16.msra.mxu1 %v2978_v11  ;;  %2741 = vmatprep.subr.bf16.mxu0 %v2979_v14  ;;  %v3003_v11 = vld [vmem:[%s3594_s1 + $0x440] sm:$0xff]   ;;  %v1875_v14 = vrot.slane %v3516_v24, 3 }
  0x88   : > { %2769 = vmatprep.subr.bf16.mxu1 %v2980_v13  ;;  %v1874_v13 = vrot.slane %v2527_v10, 3 }
  0x8a   : > { %2742 = vmatpush3.bf16.msra.mxu0 %v2981_v23 }
  0x8b   : > { %2770 = vmatpush3.bf16.msra.mxu1 %v2982_v15  ;;  %2783 = vmatprep.subr.bf16.mxu0 %v2989_v34  ;;  %v1876_v15 = vsel %vm828_vm2, %v1874_v13, %v1875_v14 }
  0x8c   : > { %2811 = vmatprep.subr.bf16.mxu1 %v2989_v34 }
  0x8d   : > { %1592 = vmatmul.mubr.bf16.vlgmr.msra.gmra.mxu0 %v1455_v44 }
  0x8e   : > { %2784 = vmatpush3.bf16.msra.mxu0 %v2990_v33  ;;  %1599 = vmatprep.mubr.bf16.mxu0 %v1457_v29 }
  0x8f   : > { %2785 = vmatprep.subr.bf16.mxu0 %v2991_v50  ;;  %1817 = vmatmul.mubr.bf16.vlgmr.msra.gmra.mxu1 %v1666_v58 }
  0x90   : > { %2819 = vmatpush3.bf16.msra.mxu1 %v2990_v33  ;;  %1824 = vmatprep.mubr.bf16.mxu1 %v1682_v40 }
  0x91   : > { %2812 = vmatprep.subr.bf16.mxu1 %v2991_v50 }
  0x92   : > { %2786 = vmatpush3.bf16.msra.mxu0 %v2992_v56 }
  0x93   : > { %2787 = vmatprep.subr.bf16.mxu0 %v2993_v57 }
  0x94   : > { %2820 = vmatpush3.bf16.msra.mxu1 %v2992_v56 }
  0x95   : > { %1600 = vmatmul.mubr.bf16.gmra.mxu0 %v1454_v26  ;;  %2813 = vmatprep.subr.bf16.mxu1 %v2993_v57 }
  0x96   : > { %2788 = vmatpush3.bf16.msra.mxu0 %v2994_v59  ;;  %2012 = vmatprep.mubr.bf16.mxu0 %v1879_v6 }
  0x97   : > { %2789 = vmatprep.subr.bf16.mxu0 %v2995_v60  ;;  %1825 = vmatmul.mubr.bf16.gmra.mxu1 %v1665_v55 }
  0x98   : > { %2821 = vmatpush3.bf16.msra.mxu1 %v2994_v59  ;;  %2020 = vmatprep.mubr.bf16.mxu1 %v1878_v2 }
  0x99   : > { %2814 = vmatprep.subr.bf16.mxu1 %v2995_v60 }
  0x9a   : > { %2790 = vmatpush3.bf16.msra.mxu0 %v2996_v61 }
  0x9b   : > { %2791 = vmatprep.subr.bf16.mxu0 %v2997_v62 }
  0x9c   : > { %2822 = vmatpush3.bf16.msra.mxu1 %v2996_v61 }
  0x9d   : > { %2815 = vmatprep.subr.bf16.mxu1 %v2997_v62 }
  0x9e   : > { %2792 = vmatpush3.bf16.msra.mxu0 %v2998_v3 }
  0x9f   : > { %2793 = vmatprep.subr.bf16.mxu0 %v2999_v5 }
  0xa0   : > { %2823 = vmatpush3.bf16.msra.mxu1 %v2998_v3 }
  0xa1   : > { %2816 = vmatprep.subr.bf16.mxu1 %v2999_v5 }
  0xa2   : > { %2794 = vmatpush3.bf16.msra.mxu0 %v3000_v7 }
  0xa3   : > { %2795 = vmatprep.subr.bf16.mxu0 %v3001_v8 }
  0xa4   : > { %2824 = vmatpush3.bf16.msra.mxu1 %v3000_v7 }
  0xa5   : > { %2817 = vmatprep.subr.bf16.mxu1 %v3001_v8 }
  0xa6   : > { %2796 = vmatpush3.bf16.msra.mxu0 %v3002_v9 }
  0xa7   : > { %2797 = vmatprep.subr.bf16.mxu0 %v3003_v11 }
  0xa8   : > { %2825 = vmatpush3.bf16.msra.mxu1 %v3002_v9 }
  0xa9   : > { %2818 = vmatprep.subr.bf16.mxu1 %v3003_v11 }
  0xaa   : > { %2798 = vmatpush3.bf16.msra.mxu0 %v3004_v12 }
  0xac   : > { %2826 = vmatpush3.bf16.msra.mxu1 %v3004_v12 }
  0xad   : > { %2013 = vmatmul.mubr.bf16.vlgmr.msra.gmra.mxu0 %v1876_v15 }
  0xaf   : > { %2021 = vmatmul.mubr.bf16.vlgmr.msra.gmra.mxu1 %v1875_v14 }
  0xed   : > { %v2575_v21 = vpop.f32.mrf.mxu0 }
  0xee   : > { %v2603_v16 = vpop.f32.mrf.mxu1 }
  0xef   : > { %v2576_v23 = vpop.f32.mrf.mxu0 }
  0xf0   : > { %v2604_v17 = vpop.f32.mrf.mxu1  ;;  %v2577_v25 = vadd.f32 %v2576_v23, %v2575_v21 }
  0xf1   : > { %v2605_v18 = vadd.f32 %v2604_v17, %v2603_v16  ;;  %v2578_v34 = vpop.f32.mrf.mxu0 }
  0xf2   : > { %v2606_v19 = vpop.f32.mrf.mxu1 }
  0xf3   : > { %v573_v26 = vadd.f32 %v2605_v18, %v2577_v25  ;;  %v2579_v29 = vpop.f32.mrf.mxu0 }
  0xf4   : > { %v2607_v20 = vpop.f32.mrf.mxu1  ;;  %v2580_v31 = vadd.f32 %v2579_v29, %v2578_v34 }
  0xf5   : > { %v2608_v22 = vadd.f32 %v2607_v20, %v2606_v19  ;;  %v2581_v35 = vpop.f32.mrf.mxu0 }
  0xf6   : > { %v2609_v24 = vpop.f32.mrf.mxu1 }
  0xf7   : > { %v576_v36 = vadd.f32 %v2608_v22, %v2580_v31  ;;  %v2582_v37 = vpop.f32.mrf.mxu0 }
  0xf8   : > { %v2610_v27 = vpop.f32.mrf.mxu1  ;;  %v2583_v38 = vadd.f32 %v2582_v37, %v2581_v35 }
  0xf9   : > { %v2611_v30 = vadd.f32 %v2610_v27, %v2609_v24  ;;  %v2584_v39 = vpop.f32.mrf.mxu0 }
  0xfa   : > { %v2612_v32 = vpop.f32.mrf.mxu1 }
  0xfb   : > { %v581_v41 = vadd.f32 %v2611_v30, %v2583_v38  ;;  %v2585_v42 = vpop.f32.mrf.mxu0 }
  0xfc   : > { %v2613_v28 = vpop.f32.mrf.mxu1 }
 0x10d   : > { %v2631_v44 = vpop.f32.mrf.mxu0 }
 0x10e   : > { %v2659_v43 = vpop.f32.mrf.mxu1 }
 0x10f   : > { %v2632_v45 = vpop.f32.mrf.mxu0 }
 0x110   : > { %v2660_v33 = vpop.f32.mrf.mxu1  ;;  %v2633_v47 = vadd.f32 %v2632_v45, %v2631_v44 }
 0x111   : > { %v2661_v46 = vadd.f32 %v2660_v33, %v2659_v43  ;;  %v2634_v49 = vpop.f32.mrf.mxu0 }
 0x112   : > { %v2662_v48 = vpop.f32.mrf.mxu1  ;;  %v780_v40 = vadd.f32 %v2633_v47, %v573_v26 }
 0x113   : > { %v2635_v51 = vpop.f32.mrf.mxu0 }
 0x114   : > { %v2663_v50 = vpop.f32.mrf.mxu1  ;;  %v983_v53 = vadd.f32 %v2661_v46, %v780_v40  ;;  %v2636_v54 = vadd.f32 %v2635_v51, %v2634_v49 }
 0x115   : > { %v2664_v52 = vadd.f32 %v2663_v50, %v2662_v48  ;;  %v2637_v56 = vpop.f32.mrf.mxu0 }
 0x116   : > { %v2665_v55 = vpop.f32.mrf.mxu1  ;;  %v781_v57 = vadd.f32 %v2636_v54, %v576_v36 }
 0x117   : > { %v2638_v59 = vpop.f32.mrf.mxu0 }
 0x118   : > { %v2666_v58 = vpop.f32.mrf.mxu1  ;;  %v984_v61 = vadd.f32 %v2664_v52, %v781_v57  ;;  %v2639_v62 = vadd.f32 %v2638_v59, %v2637_v56 }
 0x119   : > { %v2667_v60 = vadd.f32 %v2666_v58, %v2665_v55  ;;  %v2640_v0 = vpop.f32.mrf.mxu0 }
 0x11a   : > { %v2668_v63 = vpop.f32.mrf.mxu1  ;;  %v782_v1 = vadd.f32 %v2639_v62, %v581_v41 }
 0x11b   : > { %v2641_v3 = vpop.f32.mrf.mxu0 }
 0x11c   : > { %v2669_v2 = vpop.f32.mrf.mxu1  ;;  %v985_v4 = vadd.f32 %v2667_v60, %v782_v1 }
 0x12d   : > { %v2687_v9 = vpop.f32.mrf.mxu0 }
 0x12e   : > { %v2715_v5 = vpop.f32.mrf.mxu1 }
 0x12f   : > { %v2688_v11 = vpop.f32.mrf.mxu0 }
 0x130   : > { %v2716_v6 = vpop.f32.mrf.mxu1  ;;  %v2689_v12 = vadd.f32 %v2688_v11, %v2687_v9 }
 0x131   : > { %v2717_v7 = vadd.f32 %v2716_v6, %v2715_v5  ;;  %v2690_v14 = vpop.f32.mrf.mxu0 }
 0x132   : > { %v2718_v8 = vpop.f32.mrf.mxu1  ;;  %v1208_v15 = vadd.f32 %v2689_v12, %v983_v53 }
 0x133   : > { %v2691_v17 = vpop.f32.mrf.mxu0 }
 0x134   : > { %v2719_v10 = vpop.f32.mrf.mxu1  ;;  %v1396_v18 = vadd.f32 %v2717_v7, %v1208_v15  ;;  %v2692_v19 = vadd.f32 %v2691_v17, %v2690_v14  ;;  %v2545_v7 = vld [vmem:[%s3595_s2] ss:$0 sm:$0xff] }
 0x135   : > { %v2693_v21 = vpop.f32.mrf.mxu0  ;;  %v2720_v23 = vadd.f32 %v2719_v10, %v2718_v8 }
 0x136   : > { %v2721_v13 = vpop.f32.mrf.mxu1  ;;  %v1209_v22 = vadd.f32 %v2692_v19, %v984_v61 }
 0x137   : > { %v2694_v24 = vpop.f32.mrf.mxu0 }
 0x138   : > { %v2722_v16 = vpop.f32.mrf.mxu1  ;;  %v1397_v34 = vadd.f32 %v2720_v23, %v1209_v22  ;;  %v2695_v46 = vadd.f32 %v2694_v24, %v2693_v21 }
 0x139   : > { %v2696_v26 = vpop.f32.mrf.mxu0  ;;  %v2723_v48 = vadd.f32 %v2722_v16, %v2721_v13 }
 0x13a   : > { %v2724_v20 = vpop.f32.mrf.mxu1  ;;  %v1210_v47 = vadd.f32 %v2695_v46, %v985_v4 }
 0x13b   : > { %v2697_v27 = vpop.f32.mrf.mxu0 }
 0x13c   : > { %v2725_v25 = vpop.f32.mrf.mxu1  ;;  %v1398_v52 = vadd.f32 %v2723_v48, %v1210_v47 }
 0x14d   : > { %v2743_v29 = vpop.f32.mrf.mxu0 }
 0x14f   : > { %v2744_v30 = vpop.f32.mrf.mxu0  ;;  %v2771_v31 = vpop.f32.mrf.mxu1 }
 0x150   : > { %v2745_v49 = vadd.f32 %v2744_v30, %v2743_v29 }
 0x151   : > { %v2746_v32 = vpop.f32.mrf.mxu0  ;;  %v2772_v35 = vpop.f32.mrf.mxu1 }
 0x152   : > { %v1607_v53 = vadd.f32 %v2745_v49, %v1396_v18  ;;  %v2773_v54 = vadd.f32 %v2772_v35, %v2771_v31 }
 0x153   : > { %v2747_v36 = vpop.f32.mrf.mxu0  ;;  %v2774_v28 = vpop.f32.mrf.mxu1 }
 0x154   : > { %v2748_v40 = vadd.f32 %v2747_v36, %v2746_v32  ;;  %v1832_v63 = vadd.f32 %v2773_v54, %v1607_v53 }
 0x155   : > { %v2749_v37 = vpop.f32.mrf.mxu0  ;;  %v2775_v38 = vpop.f32.mrf.mxu1 }
 0x156   : > { %v1608_v55 = vadd.f32 %v2748_v40, %v1397_v34  ;;  %v2776_v60 = vadd.f32 %v2775_v38, %v2774_v28 }
 0x157   : > { %v2750_v39 = vpop.f32.mrf.mxu0  ;;  %v2777_v41 = vpop.f32.mrf.mxu1 }
 0x158   : > { %v2751_v50 = vadd.f32 %v2750_v39, %v2749_v37  ;;  %v1833_v0 = vadd.f32 %v2776_v60, %v1608_v55 }
 0x159   : > { %v2752_v42 = vpop.f32.mrf.mxu0  ;;  %v2778_v43 = vpop.f32.mrf.mxu1 }
 0x15a   : > { %v1609_v57 = vadd.f32 %v2751_v50, %v1398_v52  ;;  %v2779_v58 = vadd.f32 %v2778_v43, %v2777_v41 }
 0x15b   : > { %v2753_v44 = vpop.f32.mrf.mxu0  ;;  %v2780_v33 = vpop.f32.mrf.mxu1 }
 0x15c   : > { %v1834_v3 = vadd.f32 %v2779_v58, %v1609_v57 }
 0x15d   : > { %v2781_v45 = vpop.f32.mrf.mxu1 }
 0x16d   : > { %v2799_v51 = vpop.f32.mrf.mxu0 }
 0x16f   : > { %v2800_v56 = vpop.f32.mrf.mxu0  ;;  %v2805_v61 = vpop.f32.mrf.mxu1 }
 0x170   : > { %v2801_v59 = vadd.f32 %v2800_v56, %v2799_v51 }
 0x171   : > { %v2802_v62 = vpop.f32.mrf.mxu0  ;;  %v2806_v1 = vpop.f32.mrf.mxu1 }
 0x172   : > { %v2028_v4 = vadd.f32 %v2801_v59, %v1832_v63  ;;  %v2807_v5 = vadd.f32 %v2806_v1, %v2805_v61 }
 0x173   : > { %v2803_v2 = vpop.f32.mrf.mxu0  ;;  %v2808_v8 = vpop.f32.mrf.mxu1 }
 0x174   : > { %v2804_v6 = vadd.f32 %v2803_v2, %v2802_v62  ;;  %v2030_v9 = vadd.f32 %v2807_v5, %v1834_v3  ;;  %v2038_v12 = vadd.f32 %v2545_v7, %v2028_v4 }
 0x175   : > { %v2809_v11 = vpop.f32.mrf.mxu1 }
 0x176   : > { %v2029_v10 = vadd.f32 %v2804_v6, %v1833_v0  ;;  %v2040_v13 = vadd.f32 %v2545_v7, %v2030_v9 }
 0x178   : > { %v2039_v14 = vadd.f32 %v2545_v7, %v2029_v10  ;;  %v2553_v15 = vpack.c.bf16 %v2040_v13, %v2040_v13 }
 0x17a   : > { %v2557_v16 = vpack.c.bf16 %v2039_v14, %v2038_v12  ;;  %2056 = vst [vmem:[%s170_s19 + $0x8] sm:$0xf] %v2553_v15 }
 0x17c   : > { %2558 = vst [vmem:[%s170_s19] sm:$0xff] %v2557_v16  }
 0x17d PF: > { %s13_s12 = sadd.s32 1, %s3014_s12  }
 0x17e   : > { %p10_p4 = scmp.ge.s32.totalorder %s13_s12, 8  }
 0x180   :  { %12 = sbr.rel (!%p10_p4) target bundleno = 1 (0x1), region = 70 }

// kernel: _lambda_.7
= control target key start
LH: loop header
LB: loop body
LE: loop exit
PB: predicated region body
PF: predicated region fallthrough
CT: control target
= control target key end

     0   :  { %9 = vsyncpa [#allocation6], 0  ;;  %s1254_s0 = inlined_call_operand.vmem [shape: bf16[2,16,128], index: 0, kind: input, shape index: {}]   ;;  %s1255_s1 = inlined_call_operand.vmem [shape: bf16[2,128,128], index: 1, kind: input, shape index: {}]   ;;  %s1256_s2 = inlined_call_operand.vmem [shape: bf16[2,128,128], index: 2, kind: input, shape index: {}]   ;;  %s1257_s3 = inlined_call_operand.vmem [shape: f32[1,128], index: 3, kind: input, shape index: {}]   ;;  %s1258_s4 = inlined_call_operand.hbm [shape: f32[2,16,128], index: 4, kind: output, shape index: {}]  }
   0x1   :  { %11 = vsyncpa [#allocation6 + $0x1], 0  ;;  %s1085_s15 = smov 0   ;;  %s1087_s16 = smov 0  }
   0x2   :  { %s1089_s17 = smov 0   ;;  %s1091_s18 = smov 0  }
   0x3   :  { %s1093_s19 = smov 0   ;;  %s1095_s20 = smov 0  }
   0x4 LB: > { %s785_s21 = sadd.s32 4294967295, %s1051_s20   ;;  %s786_s22 = sadd.s32 4294967294, %s1051_s20   ;;  %s1051_s20 = sphi %s1095_s20, %s17_s20   ;;  %s1047_s19 = sphi %s1093_s19, %s1265_s19   ;;  %s1043_s18 = sphi %s1091_s18, %s1264_s18   ;;  %s1039_s17 = sphi %s1089_s17, %s1263_s17   ;;  %s1035_s16 = sphi %s1087_s16, %s1262_s16   ;;  %s1031_s15 = sphi %s1085_s15, %s1261_s15  }
   0x5   : > { %s36_s23 = sadd.s32 1, %s1047_s19  ;;  %s155_s24 = sadd.s32 1, %s1039_s17 }
   0x6   : > { %p38_p0 = scmp.ge.s32.totalorder %s36_s23, 2  ;;  %p165_p1 = scmp.ne.s32.totalorder %s1039_s17, %s1035_s16 }
   0x7   : > { %p166_p2 = scmp.eq.s32.totalorder %s785_s21, 1  ;;  %p171_p3 = scmp.ne.s32.totalorder %s1035_s16, %s1031_s15 }
   0x8   : > { %s1267_s23 = smov (%p38_p0, %s36_s23), 0  ;;  %p172_p5 = scmp.eq.s32.totalorder %s786_s22, 1 }
   0x9   : > { %p1125_p4 = por %p166_p2, %p165_p1  ;;  %s150_s26 = ssub.s32 %s1047_s19, %s1267_s23 }
   0xa   : > { %p790_p6 = scmp.ge.s32.totalorder %s1051_s20, 1  ;;  %p153_p7 = scmp.eq.s32.totalorder %s150_s26, 0 }
   0xb   : > { %p1132_p8 = por %p172_p5, %p171_p3  ;;  %p233_p9 = scmp.lt.s32.totalorder %s1051_s20, 3 }
   0xc   : > { %s1138_s28 = scalar_select %p153_p7, %s1039_s17, %s155_s24  }
   0xd   : > { %p234_p10 = pnand %p790_p6, %p233_p9 }
   0xe   : > { %p284_p11 = scmp.lt.s32.totalorder (!%p234_p10), %s1043_s18, 1  ;;  %s280_s24 = sand.u32 (!%p234_p10), 1, %s1035_s16  }
   0xf   : > { %237 = sbr.rel (%p234_p10) target bundleno = 839 (0x347), region = 36  ;;  %s791_s26 = sshll.u32 (!%p234_p10), %s280_s24, 4 }
  0x10   : > { %s824_s5 = sshll.u32 (!%p234_p10), %s1043_s18, 8  ;;  %s1209_s9 = scalar_lea.sflag (!%p234_p10), [#allocation6], %s280_s24 }
  0x14   : > { %v1053_v0 = vmov 0.0   ;;  %vm1054_vm0 = vmmov 0   ;;  %s1144_s29 = scalar_select %p284_p11, %s1043_s18, 1  ;;  %vm320_vm1 = vcmask 7168   ;;  %v1055_v10 = vmov -1e+30  }
  0x15   : > { %843 = vmatprep.subr.bf16.mxu0 %v1053_v0  ;;  %859 = vmatprep.mubr.msk.bf16.mxu0 %vm1054_vm0, %v1053_v0  ;;  %321 = vst.msk [vmem:[#allocation2] sm:$0xff] %vm320_vm1, %v1055_v10  ;;  %322 = vst.msk [vmem:[#allocation2 + $0x8] sm:$0xff] %vm320_vm1, %v1055_v10  ;;  %v798_v11 = vld [vmem:[%s1257_s3] ss:$0 sm:$0xff]  ;;  %v1056_v18 = vmov 0   ;;  %s1057_s18 = smov [#allocation5]  }
  0x16   : > { %863 = vmatprep.subr.bf16.mxu1 %v1053_v0  ;;  %879 = vmatprep.mubr.msk.bf16.mxu1 %vm1054_vm0, %v1053_v0  ;;  %s822_s30 = sshll.u32 %s1144_s29, 6  ;;  %s821_s8 = sshll.u32 %s1144_s29, 3  ;;  %323 = vst.msk [vmem:[#allocation3] sm:$0xff] %vm320_vm1, %v1053_v0  ;;  %324 = vst.msk [vmem:[#allocation3 + $0x8] sm:$0xff] %vm320_vm1, %v1053_v0 }
  0x17   : > { %s300_s7 = scalar_lea.vmem %s1255_s1, %s822_s30  ;;  %s291_s11 = scalar_lea.vmem %s1254_s0, %s821_s8  ;;  %944 = vset.pattern.permute.xlu1 %v1056_v18  ;;  %945 = vset.pattern.permute.xlu0 %v1056_v18 }
  0x18   : > { %v946_v1 = vld [vmem:[%s300_s7 + $0x38] sm:$0xff]   ;;  %v947_v2 = vld [vmem:[%s300_s7 + $0x30] sm:$0xff]   ;;  %v948_v3 = vld [vmem:[%s300_s7 + $0x28] sm:$0xff]   ;;  %s1179_s22 = scalar_lea.vmem %s1256_s2, %s822_s30  ;;  %s282_s29 = scalar_lea.vmem [#allocation5], %s791_s26 }
  0x19   : > { %844 = vmatpush3.bf16.msra.mxu0 %v946_v1  ;;  %v949_v4 = vld [vmem:[%s300_s7 + $0x20] sm:$0xff]   ;;  %v950_v5 = vld [vmem:[%s300_s7 + $0x18] sm:$0xff]   ;;  %v951_v6 = vld [vmem:[%s300_s7 + $0x10] sm:$0xff]   ;;  %s655_s30 = sshll.u32 %s282_s29, 4  ;;  %s1207_s8 = scalar_lea.hbm %s1258_s4, %s824_s5  ;;  %s1202_s30 = int_to_ptr.vmem [resolvable:$true] %s655_s30 }
  0x1a   : > { %845 = vmatprep.subr.bf16.mxu0 %v1053_v0  ;;  %v952_v7 = vld [vmem:[%s300_s7 + $0x8] sm:$0xff]   ;;  %v953_v8 = vld [vmem:[%s300_s7] sm:$0xff]   ;;  %v955_v19 = vld [vmem:[%s1179_s22 + $0x38] sm:$0xff]   ;;  %s975_s10 = scalar_lea.vmem %s1202_s30, 256 }
  0x1b   : > { %v954_v9 = vld [vmem:[%s291_s11] sm:$0xff]   ;;  %v956_v20 = vld [vmem:[%s1179_s22 + $0x30] sm:$0xff]   ;;  %864 = vmatpush3.bf16.msra.mxu1 %v955_v19  ;;  %v957_v22 = vld [vmem:[%s1179_s22 + $0x28] sm:$0xff]   ;;  %p976_p12 = scmp.ne.s32.totalorder %s1202_s30, %s975_s10  ;;  %s979_s11 = sshll.u32 %s1057_s18, 4  ;;  %s980_s11 = int_to_ptr.vmem [resolvable:$false] %s979_s11 }
  0x1c   : > { %865 = vmatprep.subr.bf16.mxu1 %v1053_v0  ;;  %v447_v21 = vld [vmem:[#allocation2] sm:$0xff]  ;;  %v448_v25 = vld [vmem:[#allocation2 + $0x8] sm:$0xff]  ;;  %v959_v30 = vld [vmem:[%s1179_s22 + $0x18] sm:$0xff]   ;;  %s981_s12 = scalar_lea.vmem %s980_s11, 512  ;;  %p982_p1 = scmp.lt.s32.totalorder %s1202_s30, %s980_s11 }
  0x1d   : > { %846 = vmatpush3.bf16.msra.mxu0 %v947_v2  ;;  %v958_v26 = vld [vmem:[%s1179_s22 + $0x20] sm:$0xff]   ;;  %v960_v32 = vld [vmem:[%s1179_s22 + $0x10] sm:$0xff]   ;;  %v961_v33 = vld [vmem:[%s1179_s22 + $0x8] sm:$0xff]   ;;  %p977_p13 = pnand %p976_p12, %p1125_p4  ;;  %p983_p2 = scmp.lt.s32.totalorder %s981_s12, %s975_s10 }
  0x1e   : > { %847 = vmatprep.subr.bf16.mxu0 %v1053_v0  ;;  %v962_v34 = vld [vmem:[%s1179_s22] sm:$0xff]   ;;  %v477_v48 = vld [vmem:[#allocation3] sm:$0xff]  ;;  %v478_v51 = vld [vmem:[#allocation3 + $0x8] sm:$0xff] }
  0x1f   : > { %866 = vmatpush3.bf16.msra.mxu1 %v956_v20  ;;  %p978_p0 = pneg %p977_p13  ;;  %p984_p3 = por %p983_p2, %p982_p1 }
  0x20   : > { %867 = vmatprep.subr.bf16.mxu1 %v1053_v0 }
  0x21   : > { %848 = vmatpush3.bf16.msra.mxu0 %v948_v3  ;;  %p985_p5 = pnand %p984_p3, %p978_p0 }
  0x22   : > { %849 = vmatprep.subr.bf16.mxu0 %v1053_v0 }
  0x23   : > { %868 = vmatpush3.bf16.msra.mxu1 %v957_v22 }
  0x24   : > { %869 = vmatprep.subr.bf16.mxu1 %v1053_v0 }
  0x25   : > { %850 = vmatpush3.bf16.msra.mxu0 %v949_v4 }
  0x26   : > { %851 = vmatprep.subr.bf16.mxu0 %v1053_v0 }
  0x27   : > { %870 = vmatpush3.bf16.msra.mxu1 %v958_v26 }
  0x28   : > { %871 = vmatprep.subr.bf16.mxu1 %v1053_v0 }
  0x29   : > { %852 = vmatpush3.bf16.msra.mxu0 %v950_v5 }
  0x2a   : > { %853 = vmatprep.subr.bf16.mxu0 %v1053_v0 }
  0x2b   : > { %872 = vmatpush3.bf16.msra.mxu1 %v959_v30 }
  0x2c   : > { %873 = vmatprep.subr.bf16.mxu1 %v1053_v0 }
  0x2d   : > { %854 = vmatpush3.bf16.msra.mxu0 %v951_v6 }
  0x2e   : > { %855 = vmatprep.subr.bf16.mxu0 %v1053_v0 }
  0x2f   : > { %874 = vmatpush3.bf16.msra.mxu1 %v960_v32 }
  0x30   : > { %875 = vmatprep.subr.bf16.mxu1 %v1053_v0 }
  0x31   : > { %856 = vmatpush3.bf16.msra.mxu0 %v952_v7 }
  0x32   : > { %857 = vmatprep.subr.bf16.mxu0 %v1053_v0 }
  0x33   : > { %876 = vmatpush3.bf16.msra.mxu1 %v961_v33 }
  0x34   : > { %877 = vmatprep.subr.bf16.mxu1 %v1053_v0 }
  0x35   : > { %858 = vmatpush3.bf16.msra.mxu0 %v953_v8 }
  0x37   : > { %878 = vmatpush3.bf16.msra.mxu1 %v962_v34 }
  0x38   : > { %860 = vmatmul.mubr.bf16.vlgmr.msra.gmra.mxu0 %v954_v9 }
  0xf8   : > { %v440_v12 = vpop.f32.mrf.mxu0 }
  0xf9   : > { %v441_v13 = vadd.f32 %v798_v11, %v440_v12 }
  0xfa   : > { %v861_v14 = vpop.f32.mrf.mxu0 }
  0xfb   : > { %449 = vmax.xlane.f32.xlu0 %v441_v13 }
  0xfc   : > { %v443_v15 = vpop.f32.mrf.mxu0 }
  0xfd   : > { %v444_v16 = vadd.f32 %v798_v11, %v443_v15 }
  0xfe   : > { %v862_v17 = vpop.f32.mrf.mxu0 }
  0xff   : > { %451 = vmax.xlane.f32.xlu0 %v444_v16 }
 0x184   : > { %v450_v23 = vpop.xlane.xlu0 %449 }
 0x185   : > { %v453_v24 = vmax.f32 %v447_v21, %v450_v23 }
 0x187   : > { %v455_v27 = vsub.f32 %v447_v21, %v453_v24  ;;  %614 = vst.msk [vmem:[#allocation2] sm:$0xff] %vm320_vm1, %v453_v24  ;;  %463 = vperm.xlu1 %944, %v453_v24  }
 0x188   : > { %v452_v28 = vpop.xlane.xlu0 %451 }
 0x189   : > { %v454_v29 = vmax.f32 %v448_v25, %v452_v28  ;;  %v457_v44 = vmul.f32 1.442695, %v455_v27 }
 0x18b   : > { %v456_v31 = vsub.f32 %v448_v25, %v454_v29  ;;  %615 = vst.msk [vmem:[#allocation2 + $0x8] sm:$0xff] %vm320_vm1, %v454_v29  ;;  %468 = vperm.xlu1 %944, %v454_v29  }
 0x18d   : > { %v459_v43 = vmul.f32 1.442695, %v456_v31 }
 0x202   : > { %v464_v35 = vpop.permute.xlu1 %463 }
 0x203   : > { %v471_v36 = vsub.f32 %v441_v13, %v464_v35 }
 0x205   : > { %v473_v37 = vmul.f32 1.442695, %v471_v36 }
 0x206   : > { %v469_v38 = vpop.permute.xlu1 %468 }
 0x207   : > { %963 = vpow2.f32 %v473_v37  ;;  %v472_v39 = vsub.f32 %v444_v16, %v469_v38 }
 0x209   : > { %v475_v40 = vmul.f32 1.442695, %v472_v39 }
 0x20b   : > { %965 = vpow2.f32 %v475_v40 }
 0x20c   : > { %967 = vpow2.f32 %v459_v43 }
 0x20d   : > { %969 = vpow2.f32 %v457_v44 }
 0x214   : > { %v964_v41 = vpop.eup %963 }
 0x215   : > { %481 = vadd.xlane.f32.xlu0 %v964_v41 }
 0x218   : > { %v966_v42 = vpop.eup %965 }
 0x219   : > { %483 = vadd.xlane.f32.xlu1 %v966_v42  ;;  %v504_v45 = vpack.c.bf16 %v966_v42, %v964_v41  ;;  %v968_v46 = vpop.eup %967 }
 0x21a   : > { %v970_v47 = vpop.eup %969  ;;  %v480_v53 = vmul.f32 %v968_v46, %v478_v51 }
 0x21b   : > { %880 = vmatmul.mubr.bf16.vlgmr.msra.gmra.mxu1 %v504_v45  ;;  %v479_v49 = vmul.f32 %v970_v47, %v477_v48 }
 0x22a   : > { %499 = vperm.xlu1 %944, %v968_v46  }
 0x22b   : > { %494 = vperm.xlu0 %945, %v970_v47  }
 0x29e   : > { %v482_v50 = vpop.xlane.xlu0 %481 }
 0x29f   : > { %v485_v52 = vadd.f32 %v482_v50, %v479_v49 }
 0x2a1   : > { %488 = vst.msk [vmem:[#allocation3] sm:$0xff] %vm320_vm1, %v485_v52 }
 0x2a2   : > { %v484_v54 = vpop.xlane.xlu1 %483 }
 0x2a3   : > { %v486_v55 = vadd.f32 %v484_v54, %v480_v53 }
 0x2a5   : > { %489 = vst.msk [vmem:[#allocation3 + $0x8] sm:$0xff] %vm320_vm1, %v486_v55 }
 0x2a6   : > { %v495_v0 = vpop.permute.xlu0 %494  ;;  %v500_v2 = vpop.permute.xlu1 %499 }
 0x2a7   : > { %v502_v1 = vmul.f32 0.0, %v495_v0  ;;  %v503_v5 = vmul.f32 0.0, %v500_v2 }
 0x2a8   : > { %v621_v56 = vld [vmem:[#allocation3] sm:$0xff] }
 0x2a9   : > { %971 = vrcp.f32 %v621_v56 }
 0x2ac   : > { %v622_v57 = vld [vmem:[#allocation3 + $0x8] sm:$0xff] }
 0x2ad   : > { %973 = vrcp.f32 %v622_v57 }
 0x2b6   : > { %v972_v58 = vpop.eup %971 }
 0x2b7   : > { %627 = vperm.xlu0 %945, %v972_v58  }
 0x2ba   : > { %v974_v59 = vpop.eup %973 }
 0x2bb   : > { %632 = vperm.xlu0 %945, %v974_v59  }
 0x2db   : > { %v603_v60 = vpop.f32.mrf.mxu1 }
 0x2dc   : > { %v610_v3 = vadd.f32 %v603_v60, %v502_v1 }
 0x2dd   : > { %v881_v61 = vpop.f32.mrf.mxu1 }
 0x2df   : > { %v606_v62 = vpop.f32.mrf.mxu1 }
 0x2e0   : > { %v611_v7 = vadd.f32 %v606_v62, %v503_v5 }
 0x2e1   : > { %v882_v63 = vpop.f32.mrf.mxu1 }
 0x332   : > { %v628_v4 = vpop.permute.xlu0 %627 }
 0x333   : > { %v635_v6 = vmul.f32 %v628_v4, %v610_v3 }
 0x335   : > { %637 = vst [vmem:[%s282_s29] sm:$0xff] %v635_v6 }
 0x336   : > { %v633_v8 = vpop.permute.xlu0 %632 }
 0x337   : > { %v636_v9 = vmul.f32 %v633_v8, %v611_v7 }
 0x339   : > { %638 = vst [vmem:[%s282_s29 + $0x8] sm:$0xff] %v636_v9 }
 0x33a   : > { %988 = shalt.err (!%p985_p5)
}
 0x33b   : > { %s989_s13 = scalar_lea.hbm %s1207_s8, 256  ;;  %s993_s22 = scalar_lea.hbm %s1258_s4, 512 }
 0x33c   : > { %p990_p6 = scmp.ne.s32.totalorder %s1207_s8, %s989_s13  ;;  %p994_p10 = scmp.lt.s32.totalorder %s1207_s8, %s1258_s4 }
 0x33d   : > { %p995_p11 = scmp.lt.s32.totalorder %s993_s22, %s989_s13 }
 0x33e   : > { %p991_p7 = pnand %p990_p6, %p1125_p4 }
 0x33f   : > { %p996_p12 = por %p995_p11, %p994_p10 }
 0x340   : > { %p992_p9 = pneg %p991_p7 }
 0x342   : > { %p997_p13 = pnand %p996_p12, %p992_p9 }
 0x344   : > { %1000 = shalt.err (!%p997_p13)
}
 0x345   : > { %s1058_s29 = smov 128   ;;  %s1059_s5 = smov 8  }
 0x346   : > { %883 = dma.vmem_to_hbm [thread:$0]  (%p1125_p4), %s1202_s30, 256, %s1207_s8, %s1209_s9, %s1058_s29, %s1058_s29, %s1059_s5  }
 0x347 PF: > { %p889_p0 = scmp.ge.s32.totalorder %s1051_s20, 2  ;;  %s670_s6 = sand.u32 1, %s1031_s15  }
 0x348   : > { %s671_s7 = scalar_lea.sflag [#allocation6], %s670_s6 }
 0x349   : > { %p886_p1 = pnand %p889_p0, %p1132_p8 }
 0x34b   : > { %p887_p2 = pneg %p886_p1 }
 0x34d   : > { %1026 = dma.done.wait (%p887_p2), %s671_s7, 256  }
 0x34e   : > { %1028 = vsyncadd (%p887_p2), %s671_s7, 4294967040  ;;  %s17_s20 = sadd.s32 1, %s1051_s20   ;;  %s1261_s15 = smov %s1035_s16 }
 0x34f   : > { %p14_p3 = scmp.ge.s32.totalorder %s17_s20, 4   ;;  %s1262_s16 = smov %s1039_s17 }
 0x350   : > { %s1263_s17 = smov %s1138_s28  ;;  %s1264_s18 = smov %s1047_s19 }
 0x351   : > { %s1265_s19 = smov %s1267_s23  ;;  %16 = sbr.rel (!%p14_p3) target bundleno = 4 (0x4), region = 88 }
 0x356   :  { %676 = vsyncpa [#allocation6], 1 }
 0x357   :  { %678 = vsyncpa [#allocation6 + $0x1], 1 }

</bundles_post_ra>
